<compile_context>
chip_gen: v7x
topology: tpu7x:2x2x1
jax: 0.10.0
libtpu: 0.0.40
codegen_flags: <defaults>
</compile_context>

<pallas_src>
import math
import functools

import jax
import jax.numpy as jnp
from jax import lax
from jax.experimental import pallas as pl
from jax.experimental.pallas import tpu as pltpu


# ----------------------------------------------------------------------------
# In-kernel helpers
# ----------------------------------------------------------------------------
def _layernorm(xv, alpha, bias, eps, d):
    # PyTorch "Norm": alpha * (x - mean) / (std + eps) + bias, std UNBIASED (N-1).
    mean = jnp.mean(xv, axis=-1, keepdims=True)
    c = xv - mean
    var = jnp.sum(c * c, axis=-1, keepdims=True) / (d - 1.0)
    inv = pl.reciprocal(jnp.sqrt(var) + eps)      # one reciprocal per row (EUP)
    return alpha * (c * inv) + bias


def _softmax(s):
    m = jnp.max(s, axis=-1, keepdims=True)
    e = jnp.exp(s - m)
    return e * pl.reciprocal(jnp.sum(e, axis=-1, keepdims=True))


def _mha(xq2, kv, wq, bq, wk, bk, wv, bv, wo, bo, bias, *, heads, d_model, scale):
    """Multi-head attention with per-head pre-split weight refs.

    xq2: (TQ, D) f32 query-side activations; kv: (S, D) f32 key/value source.
    wq/wk/wv refs: (H, D, d_k); bq/bk/bv: (H, 1, d_k); wo: (H, d_k, D); bo: (1, D).
    bias: (TQ, S) additive mask bias in f32.  Returns (TQ, D) f32.
    """
    mm = wq.dtype                     # matmul operand dtype (bf16 or f32)
    xq_m = xq2.astype(mm)
    kv_m = kv.astype(mm)
    acc = jnp.zeros((xq2.shape[0], d_model), jnp.float32)
    for h in range(heads):            # static unroll; only `acc` carries across heads
        qh = jnp.dot(xq_m, wq[h], preferred_element_type=jnp.float32) + bq[h]
        kh = jnp.dot(kv_m, wk[h], preferred_element_type=jnp.float32) + bk[h]
        vh = jnp.dot(kv_m, wv[h], preferred_element_type=jnp.float32) + bv[h]
        # q @ k^T without materializing a transpose ("NT" matmul), f32 accumulate.
        s = lax.dot_general(
            qh.astype(mm), kh.astype(mm), (((1,), (1,)), ((), ())),
            preferred_element_type=jnp.float32) * scale + bias
        p = _softmax(s)
        # TODO(synk): attention-probability dropout omitted (eval-mode identity).
        oh = jnp.dot(p.astype(mm), vh.astype(mm), preferred_element_type=jnp.float32)
        # Fold concat + output projection into a per-head accumulation.
        acc = acc + jnp.dot(oh.astype(mm), wo[h], preferred_element_type=jnp.float32)
    return acc + bo[...]


# ----------------------------------------------------------------------------
# Fused decoder-layer kernel
# ----------------------------------------------------------------------------
def decoder_layer_kernel(
    x_ref, e_ref, tb_ref, sb_ref,
    n1a_ref, n1b_ref, n2a_ref, n2b_ref, n3a_ref, n3b_ref,
    wq1_ref, bq1_ref, wk1_ref, bk1_ref, wv1_ref, bv1_ref, wo1_ref, bo1_ref,
    wq2_ref, bq2_ref, wk2_ref, bk2_ref, wv2_ref, bv2_ref, wo2_ref, bo2_ref,
    w1_ref, b1_ref, w2_ref, b2_ref,
    out_ref,
    *, heads, d_model, d_k, tq, eps,
):
    scale = 1.0 / math.sqrt(d_k)
    q0 = pl.multiple_of(pl.program_id(1) * tq, tq)

    x_full = x_ref[0]                      # (S_t, D) — self-attn K/V source
    x_q = x_ref[0, pl.ds(q0, tq), :]       # (TQ, D)  — this step's query rows
    e_full = e_ref[0]                      # (S_e, D) — cross-attn K/V source
    trg_bias = tb_ref[0]                   # (TQ, S_t) additive mask bias
    src_bias = sb_ref[0]                   # (TQ, S_e)

    # ---- masked self-attention (pre-norm) ----
    x2_kv = _layernorm(x_full, n1a_ref[...], n1b_ref[...], eps, d_model)
    x2_q = _layernorm(x_q, n1a_ref[...], n1b_ref[...], eps, d_model)
    attn1 = _mha(x2_q, x2_kv, wq1_ref, bq1_ref, wk1_ref, bk1_ref,
                 wv1_ref, bv1_ref, wo1_ref, bo1_ref, trg_bias,
                 heads=heads, d_model=d_model, scale=scale)
    xq = x_q + attn1                       # dropout_1 = identity (eval)

    # ---- cross-attention over encoder outputs ----
    x2 = _layernorm(xq, n2a_ref[...], n2b_ref[...], eps, d_model)
    attn2 = _mha(x2, e_full, wq2_ref, bq2_ref, wk2_ref, bk2_ref,
                 wv2_ref, bv2_ref, wo2_ref, bo2_ref, src_bias,
                 heads=heads, d_model=d_model, scale=scale)
    xq = xq + attn2                        # dropout_2 = identity

    # ---- feed-forward ----
    x2 = _layernorm(xq, n3a_ref[...], n3b_ref[...], eps, d_model)
    mm = w1_ref.dtype
    h1 = jnp.dot(x2.astype(mm), w1_ref[...],
                 preferred_element_type=jnp.float32) + b1_ref[...]
    h1 = jnp.maximum(h1, 0.0)              # ReLU; inner FF dropout = identity
    ff = jnp.dot(h1.astype(mm), w2_ref[...],
                 preferred_element_type=jnp.float32) + b2_ref[...]

    out_ref[0] = (xq + ff).astype(out_ref.dtype)   # dropout_3 = identity


# ----------------------------------------------------------------------------
# Host-side wrapper
# ----------------------------------------------------------------------------
def _pick_q_tile(s):
    if s <= 512:
        return s
    for tq in (512, 256, 128, 64, 32, 16, 8):
        if s % tq == 0:
            return tq
    return s


def decoder_layer(x, e_outputs, src_mask, trg_mask, params, *,
                  heads, eps=1e-6, matmul_dtype=jnp.bfloat16):
    B, S_t, D = x.shape
    S_e = e_outputs.shape[1]
    assert D % heads == 0
    d_k = D // heads

    TQ = _pick_q_tile(S_t)
    n_qt = S_t // TQ
    f32 = jnp.float32

    # Hoisted mask handling: additive -1e9 bias computed once on the host.
    trg_bias = jnp.where(trg_mask == 0, -1000000000.0, 0.0).astype(f32)
    src_bias = jnp.where(src_mask == 0, -1000000000.0, 0.0).astype(f32)

    def split_w_qkv(key):   # (D, D) -> (H, D, d_k)
        return params[key].reshape(D, heads, d_k).transpose(1, 0, 2).astype(matmul_dtype)

    def split_b_qkv(key):   # (1, D) -> (H, 1, d_k)
        return params[key].reshape(heads, 1, d_k).astype(f32)

    def split_w_out(key):   # (D, D) -> (H, d_k, D)
        return params[key].reshape(heads, d_k, D).astype(matmul_dtype)

    attn_inputs = []
    for a in ("a1", "a2"):
        attn_inputs += [
            split_w_qkv(f"{a}_wq"), split_b_qkv(f"{a}_bq"),
            split_w_qkv(f"{a}_wk"), split_b_qkv(f"{a}_bk"),
            split_w_qkv(f"{a}_wv"), split_b_qkv(f"{a}_bv"),
            split_w_out(f"{a}_wo"), params[f"{a}_bo"].astype(f32),
        ]

    inputs = [
        x.astype(f32), e_outputs.astype(f32), trg_bias, src_bias,
        params["n1a"].astype(f32), params["n1b"].astype(f32),
        params["n2a"].astype(f32), params["n2b"].astype(f32),
        params["n3a"].astype(f32), params["n3b"].astype(f32),
        *attn_inputs,
        params["ff_w1"].astype(matmul_dtype), params["ff_b1"].astype(f32),
        params["ff_w2"].astype(matmul_dtype), params["ff_b2"].astype(f32),
    ]

    def rep(arr):
        zeros = (0,) * arr.ndim
        return pl.BlockSpec(arr.shape, lambda b, qi, _z=zeros: _z)

    in_specs = [
        pl.BlockSpec((1, S_t, D), lambda b, qi: (b, 0, 0)),    # x (full seq: K/V)
        pl.BlockSpec((1, S_e, D), lambda b, qi: (b, 0, 0)),    # e_outputs
        pl.BlockSpec((1, TQ, S_t), lambda b, qi: (b, qi, 0)),  # trg mask bias (q-tiled)
        pl.BlockSpec((1, TQ, S_e), lambda b, qi: (b, qi, 0)),  # src mask bias (q-tiled)
    ] + [rep(a) for a in inputs[4:]]

    out_specs = pl.BlockSpec((1, TQ, D), lambda b, qi: (b, qi, 0))

    kernel = functools.partial(
        decoder_layer_kernel, heads=heads, d_model=D, d_k=d_k, tq=TQ, eps=eps)

    return pl.pallas_call(
        kernel,
        grid=(B, n_qt),
        in_specs=in_specs,
        out_specs=out_specs,
        out_shape=jax.ShapeDtypeStruct((B, S_t, D), jnp.float32),
        compiler_params=pltpu.CompilerParams(
            dimension_semantics=("parallel", "parallel")),
    )(*inputs)


# ----------------------------------------------------------------------------
# Pure-JAX reference (mirrors the PyTorch forward in eval mode)
# ----------------------------------------------------------------------------
def decoder_layer_ref(x, e_outputs, src_mask, trg_mask, params, *, heads, eps=1e-6):
    D = x.shape[-1]
    d_k = D // heads

    def norm(xv, a, b):
        m = jnp.mean(xv, axis=-1, keepdims=True)
        c = xv - m
        var = jnp.sum(c * c, axis=-1, keepdims=True) / (D - 1.0)
        return a.reshape(-1) * c / (jnp.sqrt(var) + eps) + b.reshape(-1)

    def mha(q_in, kv_in, pfx, mask):
        bs, sq, _ = q_in.shape
        sk = kv_in.shape[1]
        q = q_in @ params[f"{pfx}_wq"] + params[f"{pfx}_bq"].reshape(-1)
        k = kv_in @ params[f"{pfx}_wk"] + params[f"{pfx}_bk"].reshape(-1)
        v = kv_in @ params[f"{pfx}_wv"] + params[f"{pfx}_bv"].reshape(-1)
        q = q.reshape(bs, sq, heads, d_k).transpose(0, 2, 1, 3)
        k = k.reshape(bs, sk, heads, d_k).transpose(0, 2, 1, 3)
        v = v.reshape(bs, sk, heads, d_k).transpose(0, 2, 1, 3)
        s = jnp.einsum("bhqd,bhkd->bhqk", q, k) / math.sqrt(d_k)
        s = jnp.where(mask[:, None] == 0, -1000000000.0, s)
        p = jax.nn.softmax(s, axis=-1)
        o = jnp.einsum("bhqk,bhkd->bhqd", p, v)
        concat = o.transpose(0, 2, 1, 3).reshape(bs, sq, D)
        return concat @ params[f"{pfx}_wo"] + params[f"{pfx}_bo"].reshape(-1)

    x2 = norm(x, params["n1a"], params["n1b"])
    x = x + mha(x2, x2, "a1", trg_mask)
    x2 = norm(x, params["n2a"], params["n2b"])
    x = x + mha(x2, e_outputs, "a2", src_mask)
    x2 = norm(x, params["n3a"], params["n3b"])
    h1 = jnp.maximum(x2 @ params["ff_w1"] + params["ff_b1"].reshape(-1), 0.0)
    return x + h1 @ params["ff_w2"] + params["ff_b2"].reshape(-1)


def make_params(key, d_model, d_ff):
    ks = jax.random.split(key, 20)
    scale = 0.1

    def w(k, shape):
        return (scale * jax.random.normal(k, shape)).astype(jnp.float32)

    p = {
        "n1a": jnp.ones((1, d_model), jnp.float32), "n1b": jnp.zeros((1, d_model), jnp.float32),
        "n2a": jnp.ones((1, d_model), jnp.float32), "n2b": jnp.zeros((1, d_model), jnp.float32),
        "n3a": jnp.ones((1, d_model), jnp.float32), "n3b": jnp.zeros((1, d_model), jnp.float32),
        "ff_w1": w(ks[16], (d_model, d_ff)), "ff_b1": w(ks[17], (1, d_ff)),
        "ff_w2": w(ks[18], (d_ff, d_model)), "ff_b2": w(ks[19], (1, d_model)),
    }
    idx = 0
    for a in ("a1", "a2"):
        for nm in ("q", "k", "v", "o"):
            p[f"{a}_w{nm}"] = w(ks[idx], (d_model, d_model)); idx += 1
            p[f"{a}_b{nm}"] = w(ks[idx], (1, d_model)); idx += 1
    return p


if __name__ == "__main__":
    B, S_T, S_E, D, HEADS, D_FF = 2, 8, 16, 32, 4, 64

    key = jax.random.PRNGKey(0)
    kx, ke, ks, kp = jax.random.split(key, 4)
    x = jax.random.normal(kx, (B, S_T, D), dtype=jnp.float32)
    e_outputs = jax.random.normal(ke, (B, S_E, D), dtype=jnp.float32)
    trg_mask = jnp.tile(jnp.tril(jnp.ones((S_T, S_T), jnp.float32))[None], (B, 1, 1))
    src_mask = (jax.random.uniform(ks, (B, S_T, S_E)) > 0.2).astype(jnp.float32)
    src_mask = src_mask.at[:, :, 0].set(1.0)   # guarantee no fully-masked row
    params = make_params(kp, D, D_FF)

    ref = decoder_layer_ref(x, e_outputs, src_mask, trg_mask, params, heads=HEADS)
    ref = jax.block_until_ready(ref)

    # f32 matmul path: must match the reference tightly.
    out_f32 = decoder_layer(x, e_outputs, src_mask, trg_mask, params,
                            heads=HEADS, matmul_dtype=jnp.float32)
    out_f32 = jax.block_until_ready(out_f32)
    err = float(jnp.max(jnp.abs(out_f32 - ref)))
    assert jnp.allclose(out_f32, ref, rtol=1e-4, atol=1e-4), f"f32 max abs err {err}"

    # bf16 matmul path (perf config for v6e/v7x): loose tolerance vs f32 reference.
    out_bf16 = decoder_layer(x, e_outputs, src_mask, trg_mask, params,
                             heads=HEADS, matmul_dtype=jnp.bfloat16)
    out_bf16 = jax.block_until_ready(out_bf16)
    err_bf16 = float(jnp.max(jnp.abs(out_bf16 - ref)))
    assert jnp.allclose(out_bf16, ref, rtol=1e-1, atol=1e-1), f"bf16 max abs err {err_bf16}"

    print("KERNEL_OK")
</pallas_src>

<mosaic_0001>
module attributes {stable_mosaic.version = 11 : i64} {
  func.func @decoder_layer_kernel(%arg0: i32, %arg1: i32, %arg2: memref<1x8x32xf32, #tpu.memory_space<vmem>>, %arg3: memref<1x16x32xf32, #tpu.memory_space<vmem>>, %arg4: memref<1x8x8xf32, #tpu.memory_space<vmem>>, %arg5: memref<1x8x16xf32, #tpu.memory_space<vmem>>, %arg6: memref<1x32xf32, #tpu.memory_space<vmem>>, %arg7: memref<1x32xf32, #tpu.memory_space<vmem>>, %arg8: memref<1x32xf32, #tpu.memory_space<vmem>>, %arg9: memref<1x32xf32, #tpu.memory_space<vmem>>, %arg10: memref<1x32xf32, #tpu.memory_space<vmem>>, %arg11: memref<1x32xf32, #tpu.memory_space<vmem>>, %arg12: memref<4x32x8xf32, #tpu.memory_space<vmem>>, %arg13: memref<4x1x8xf32, #tpu.memory_space<vmem>>, %arg14: memref<4x32x8xf32, #tpu.memory_space<vmem>>, %arg15: memref<4x1x8xf32, #tpu.memory_space<vmem>>, %arg16: memref<4x32x8xf32, #tpu.memory_space<vmem>>, %arg17: memref<4x1x8xf32, #tpu.memory_space<vmem>>, %arg18: memref<4x8x32xf32, #tpu.memory_space<vmem>>, %arg19: memref<1x32xf32, #tpu.memory_space<vmem>>, %arg20: memref<4x32x8xf32, #tpu.memory_space<vmem>>, %arg21: memref<4x1x8xf32, #tpu.memory_space<vmem>>, %arg22: memref<4x32x8xf32, #tpu.memory_space<vmem>>, %arg23: memref<4x1x8xf32, #tpu.memory_space<vmem>>, %arg24: memref<4x32x8xf32, #tpu.memory_space<vmem>>, %arg25: memref<4x1x8xf32, #tpu.memory_space<vmem>>, %arg26: memref<4x8x32xf32, #tpu.memory_space<vmem>>, %arg27: memref<1x32xf32, #tpu.memory_space<vmem>>, %arg28: memref<32x64xf32, #tpu.memory_space<vmem>>, %arg29: memref<1x64xf32, #tpu.memory_space<vmem>>, %arg30: memref<64x32xf32, #tpu.memory_space<vmem>>, %arg31: memref<1x32xf32, #tpu.memory_space<vmem>>, %arg32: memref<1x8x32xf32, #tpu.memory_space<vmem>>) attributes {dimension_semantics = [#tpu.dimension_semantics<parallel>, #tpu.dimension_semantics<parallel>], iteration_bounds = array<i64: 2, 1>, scalar_prefetch = 0 : i64, scratch_operands = 0 : i64, tpu.core_type = #tpu.core_type<tc>, window_params = [{transform_indices = @transform_0, window_bounds = array<i64: 1, 8, 32>}, {transform_indices = @transform_1, window_bounds = array<i64: 1, 16, 32>}, {transform_indices = @transform_2, window_bounds = array<i64: 1, 8, 8>}, {transform_indices = @transform_3, window_bounds = array<i64: 1, 8, 16>}, {pipeline_mode = #tpu.pipeline_mode<synchronous>, transform_indices = @transform_4, window_bounds = array<i64: 1, 32>}, {pipeline_mode = #tpu.pipeline_mode<synchronous>, transform_indices = @transform_5, window_bounds = array<i64: 1, 32>}, {pipeline_mode = #tpu.pipeline_mode<synchronous>, transform_indices = @transform_6, window_bounds = array<i64: 1, 32>}, {pipeline_mode = #tpu.pipeline_mode<synchronous>, transform_indices = @transform_7, window_bounds = array<i64: 1, 32>}, {pipeline_mode = #tpu.pipeline_mode<synchronous>, transform_indices = @transform_8, window_bounds = array<i64: 1, 32>}, {pipeline_mode = #tpu.pipeline_mode<synchronous>, transform_indices = @transform_9, window_bounds = array<i64: 1, 32>}, {pipeline_mode = #tpu.pipeline_mode<synchronous>, transform_indices = @transform_10, window_bounds = array<i64: 4, 32, 8>}, {pipeline_mode = #tpu.pipeline_mode<synchronous>, transform_indices = @transform_11, window_bounds = array<i64: 4, 1, 8>}, {pipeline_mode = #tpu.pipeline_mode<synchronous>, transform_indices = @transform_12, window_bounds = array<i64: 4, 32, 8>}, {pipeline_mode = #tpu.pipeline_mode<synchronous>, transform_indices = @transform_13, window_bounds = array<i64: 4, 1, 8>}, {pipeline_mode = #tpu.pipeline_mode<synchronous>, transform_indices = @transform_14, window_bounds = array<i64: 4, 32, 8>}, {pipeline_mode = #tpu.pipeline_mode<synchronous>, transform_indices = @transform_15, window_bounds = array<i64: 4, 1, 8>}, {pipeline_mode = #tpu.pipeline_mode<synchronous>, transform_indices = @transform_16, window_bounds = array<i64: 4, 8, 32>}, {pipeline_mode = #tpu.pipeline_mode<synchronous>, transform_indices = @transform_17, window_bounds = array<i64: 1, 32>}, {pipeline_mode = #tpu.pipeline_mode<synchronous>, transform_indices = @transform_18, window_bounds = array<i64: 4, 32, 8>}, {pipeline_mode = #tpu.pipeline_mode<synchronous>, transform_indices = @transform_19, window_bounds = array<i64: 4, 1, 8>}, {pipeline_mode = #tpu.pipeline_mode<synchronous>, transform_indices = @transform_20, window_bounds = array<i64: 4, 32, 8>}, {pipeline_mode = #tpu.pipeline_mode<synchronous>, transform_indices = @transform_21, window_bounds = array<i64: 4, 1, 8>}, {pipeline_mode = #tpu.pipeline_mode<synchronous>, transform_indices = @transform_22, window_bounds = array<i64: 4, 32, 8>}, {pipeline_mode = #tpu.pipeline_mode<synchronous>, transform_indices = @transform_23, window_bounds = array<i64: 4, 1, 8>}, {pipeline_mode = #tpu.pipeline_mode<synchronous>, transform_indices = @transform_24, window_bounds = array<i64: 4, 8, 32>}, {pipeline_mode = #tpu.pipeline_mode<synchronous>, transform_indices = @transform_25, window_bounds = array<i64: 1, 32>}, {pipeline_mode = #tpu.pipeline_mode<synchronous>, transform_indices = @transform_26, window_bounds = array<i64: 32, 64>}, {pipeline_mode = #tpu.pipeline_mode<synchronous>, transform_indices = @transform_27, window_bounds = array<i64: 1, 64>}, {pipeline_mode = #tpu.pipeline_mode<synchronous>, transform_indices = @transform_28, window_bounds = array<i64: 64, 32>}, {pipeline_mode = #tpu.pipeline_mode<synchronous>, transform_indices = @transform_29, window_bounds = array<i64: 1, 32>}, {transform_indices = @transform_30, window_bounds = array<i64: 1, 8, 32>}]} {
    %c8_i32 = arith.constant 8 : i32
    %0 = arith.muli %arg1, %c8_i32 : i32
    %1 = tpu.assume_multiple %0, 8 : i32
    %c0 = arith.constant 0 : index
    %c0_0 = arith.constant 0 : index
    %c0_1 = arith.constant 0 : index
    %2 = vector.load %arg2[%c0, %c0_0, %c0_1] : memref<1x8x32xf32, #tpu.memory_space<vmem>>, vector<1x8x32xf32>
    %3 = vector.shape_cast %2 : vector<1x8x32xf32> to vector<8x32xf32>
    %c0_2 = arith.constant 0 : index
    %4 = arith.index_cast %1 : i32 to index
    %c0_3 = arith.constant 0 : index
    %5 = vector.load %arg2[%c0_2, %4, %c0_3] : memref<1x8x32xf32, #tpu.memory_space<vmem>>, vector<1x8x32xf32>
    %6 = vector.shape_cast %5 : vector<1x8x32xf32> to vector<8x32xf32>
    %c0_4 = arith.constant 0 : index
    %c0_5 = arith.constant 0 : index
    %c0_6 = arith.constant 0 : index
    %7 = vector.load %arg3[%c0_4, %c0_5, %c0_6] : memref<1x16x32xf32, #tpu.memory_space<vmem>>, vector<1x16x32xf32>
    %8 = vector.shape_cast %7 : vector<1x16x32xf32> to vector<16x32xf32>
    %c0_7 = arith.constant 0 : index
    %c0_8 = arith.constant 0 : index
    %c0_9 = arith.constant 0 : index
    %9 = vector.load %arg4[%c0_7, %c0_8, %c0_9] : memref<1x8x8xf32, #tpu.memory_space<vmem>>, vector<1x8x8xf32>
    %10 = vector.shape_cast %9 : vector<1x8x8xf32> to vector<8x8xf32>
    %c0_10 = arith.constant 0 : index
    %c0_11 = arith.constant 0 : index
    %c0_12 = arith.constant 0 : index
    %11 = vector.load %arg5[%c0_10, %c0_11, %c0_12] : memref<1x8x16xf32, #tpu.memory_space<vmem>>, vector<1x8x16xf32>
    %12 = vector.shape_cast %11 : vector<1x8x16xf32> to vector<8x16xf32>
    %c0_13 = arith.constant 0 : index
    %c0_14 = arith.constant 0 : index
    %13 = vector.load %arg6[%c0_13, %c0_14] : memref<1x32xf32, #tpu.memory_space<vmem>>, vector<1x32xf32>
    %c0_15 = arith.constant 0 : index
    %c0_16 = arith.constant 0 : index
    %14 = vector.load %arg7[%c0_15, %c0_16] : memref<1x32xf32, #tpu.memory_space<vmem>>, vector<1x32xf32>
    %cst = arith.constant dense<0.000000e+00> : vector<8xf32>
    %15 = vector.multi_reduction <add>, %3, %cst [1] : vector<8x32xf32> to vector<8xf32>
    %16 = vector.shape_cast %15 : vector<8xf32> to vector<8x1xf32>
    %cst_17 = arith.constant 3.200000e+01 : f32
    %17 = vector.broadcast %cst_17 : f32 to vector<8x1xf32>
    %18 = arith.divf %16, %17 : vector<8x1xf32>
    %19 = vector.broadcast %18 : vector<8x1xf32> to vector<8x32xf32>
    %20 = arith.subf %3, %19 : vector<8x32xf32>
    %21 = arith.mulf %20, %20 : vector<8x32xf32>
    %cst_18 = arith.constant dense<0.000000e+00> : vector<8xf32>
    %22 = vector.multi_reduction <add>, %21, %cst_18 [1] : vector<8x32xf32> to vector<8xf32>
    %23 = vector.shape_cast %22 : vector<8xf32> to vector<8x1xf32>
    %cst_19 = arith.constant 3.100000e+01 : f32
    %24 = vector.broadcast %cst_19 : f32 to vector<8x1xf32>
    %25 = arith.divf %23, %24 : vector<8x1xf32>
    %26 = math.sqrt %25 : vector<8x1xf32>
    %cst_20 = arith.constant 9.99999997E-7 : f32
    %27 = vector.broadcast %cst_20 : f32 to vector<8x1xf32>
    %28 = arith.addf %26, %27 : vector<8x1xf32>
    %29 = tpu.reciprocal %28 : vector<8x1xf32> -> vector<8x1xf32>
    %30 = vector.broadcast %29 : vector<8x1xf32> to vector<8x32xf32>
    %31 = arith.mulf %20, %30 : vector<8x32xf32>
    %32 = vector.broadcast %13 : vector<1x32xf32> to vector<8x32xf32>
    %33 = arith.mulf %32, %31 : vector<8x32xf32>
    %34 = vector.broadcast %14 : vector<1x32xf32> to vector<8x32xf32>
    %35 = arith.addf %33, %34 : vector<8x32xf32>
    %c0_21 = arith.constant 0 : index
    %c0_22 = arith.constant 0 : index
    %36 = vector.load %arg6[%c0_21, %c0_22] : memref<1x32xf32, #tpu.memory_space<vmem>>, vector<1x32xf32>
    %c0_23 = arith.constant 0 : index
    %c0_24 = arith.constant 0 : index
    %37 = vector.load %arg7[%c0_23, %c0_24] : memref<1x32xf32, #tpu.memory_space<vmem>>, vector<1x32xf32>
    %cst_25 = arith.constant dense<0.000000e+00> : vector<8xf32>
    %38 = vector.multi_reduction <add>, %6, %cst_25 [1] : vector<8x32xf32> to vector<8xf32>
    %39 = vector.shape_cast %38 : vector<8xf32> to vector<8x1xf32>
    %cst_26 = arith.constant 3.200000e+01 : f32
    %40 = vector.broadcast %cst_26 : f32 to vector<8x1xf32>
    %41 = arith.divf %39, %40 : vector<8x1xf32>
    %42 = vector.broadcast %41 : vector<8x1xf32> to vector<8x32xf32>
    %43 = arith.subf %6, %42 : vector<8x32xf32>
    %44 = arith.mulf %43, %43 : vector<8x32xf32>
    %cst_27 = arith.constant dense<0.000000e+00> : vector<8xf32>
    %45 = vector.multi_reduction <add>, %44, %cst_27 [1] : vector<8x32xf32> to vector<8xf32>
    %46 = vector.shape_cast %45 : vector<8xf32> to vector<8x1xf32>
    %cst_28 = arith.constant 3.100000e+01 : f32
    %47 = vector.broadcast %cst_28 : f32 to vector<8x1xf32>
    %48 = arith.divf %46, %47 : vector<8x1xf32>
    %49 = math.sqrt %48 : vector<8x1xf32>
    %cst_29 = arith.constant 9.99999997E-7 : f32
    %50 = vector.broadcast %cst_29 : f32 to vector<8x1xf32>
    %51 = arith.addf %49, %50 : vector<8x1xf32>
    %52 = tpu.reciprocal %51 : vector<8x1xf32> -> vector<8x1xf32>
    %53 = vector.broadcast %52 : vector<8x1xf32> to vector<8x32xf32>
    %54 = arith.mulf %43, %53 : vector<8x32xf32>
    %55 = vector.broadcast %36 : vector<1x32xf32> to vector<8x32xf32>
    %56 = arith.mulf %55, %54 : vector<8x32xf32>
    %57 = vector.broadcast %37 : vector<1x32xf32> to vector<8x32xf32>
    %58 = arith.addf %56, %57 : vector<8x32xf32>
    %cst_30 = arith.constant 0.000000e+00 : f32
    %59 = vector.broadcast %cst_30 : f32 to vector<8x32xf32>
    %c0_31 = arith.constant 0 : index
    %c0_32 = arith.constant 0 : index
    %c0_33 = arith.constant 0 : index
    %60 = vector.load %arg12[%c0_31, %c0_32, %c0_33] : memref<4x32x8xf32, #tpu.memory_space<vmem>>, vector<1x32x8xf32>
    %61 = vector.shape_cast %60 : vector<1x32x8xf32> to vector<32x8xf32>
    %cst_34 = arith.constant dense<0.000000e+00> : vector<8x8xf32>
    %62 = tpu.matmul %58, %61, %cst_34 {dimension_numbers = #tpu.dot_dimension_numbers<[1], [0], [0], [1], [0, 0, 1, 1], [], []>} : vector<8x32xf32>, vector<32x8xf32>, vector<8x8xf32> -> vector<8x8xf32>
    %c0_35 = arith.constant 0 : index
    %c0_36 = arith.constant 0 : index
    %c0_37 = arith.constant 0 : index
    %63 = vector.load %arg13[%c0_35, %c0_36, %c0_37] : memref<4x1x8xf32, #tpu.memory_space<vmem>>, vector<1x1x8xf32>
    %64 = vector.shape_cast %63 : vector<1x1x8xf32> to vector<1x8xf32>
    %65 = vector.broadcast %64 : vector<1x8xf32> to vector<8x8xf32>
    %66 = arith.addf %62, %65 : vector<8x8xf32>
    %c0_38 = arith.constant 0 : index
    %c0_39 = arith.constant 0 : index
    %c0_40 = arith.constant 0 : index
    %67 = vector.load %arg14[%c0_38, %c0_39, %c0_40] : memref<4x32x8xf32, #tpu.memory_space<vmem>>, vector<1x32x8xf32>
    %68 = vector.shape_cast %67 : vector<1x32x8xf32> to vector<32x8xf32>
    %cst_41 = arith.constant dense<0.000000e+00> : vector<8x8xf32>
    %69 = tpu.matmul %35, %68, %cst_41 {dimension_numbers = #tpu.dot_dimension_numbers<[1], [0], [0], [1], [0, 0, 1, 1], [], []>} : vector<8x32xf32>, vector<32x8xf32>, vector<8x8xf32> -> vector<8x8xf32>
    %c0_42 = arith.constant 0 : index
    %c0_43 = arith.constant 0 : index
    %c0_44 = arith.constant 0 : index
    %70 = vector.load %arg15[%c0_42, %c0_43, %c0_44] : memref<4x1x8xf32, #tpu.memory_space<vmem>>, vector<1x1x8xf32>
    %71 = vector.shape_cast %70 : vector<1x1x8xf32> to vector<1x8xf32>
    %72 = vector.broadcast %71 : vector<1x8xf32> to vector<8x8xf32>
    %73 = arith.addf %69, %72 : vector<8x8xf32>
    %c0_45 = arith.constant 0 : index
    %c0_46 = arith.constant 0 : index
    %c0_47 = arith.constant 0 : index
    %74 = vector.load %arg16[%c0_45, %c0_46, %c0_47] : memref<4x32x8xf32, #tpu.memory_space<vmem>>, vector<1x32x8xf32>
    %75 = vector.shape_cast %74 : vector<1x32x8xf32> to vector<32x8xf32>
    %cst_48 = arith.constant dense<0.000000e+00> : vector<8x8xf32>
    %76 = tpu.matmul %35, %75, %cst_48 {dimension_numbers = #tpu.dot_dimension_numbers<[1], [0], [0], [1], [0, 0, 1, 1], [], []>} : vector<8x32xf32>, vector<32x8xf32>, vector<8x8xf32> -> vector<8x8xf32>
    %c0_49 = arith.constant 0 : index
    %c0_50 = arith.constant 0 : index
    %c0_51 = arith.constant 0 : index
    %77 = vector.load %arg17[%c0_49, %c0_50, %c0_51] : memref<4x1x8xf32, #tpu.memory_space<vmem>>, vector<1x1x8xf32>
    %78 = vector.shape_cast %77 : vector<1x1x8xf32> to vector<1x8xf32>
    %79 = vector.broadcast %78 : vector<1x8xf32> to vector<8x8xf32>
    %80 = arith.addf %76, %79 : vector<8x8xf32>
    %cst_52 = arith.constant dense<0.000000e+00> : vector<8x8xf32>
    %81 = tpu.matmul %66, %73, %cst_52 {dimension_numbers = #tpu.dot_dimension_numbers<[1], [1], [0], [0], [0, 0, 1, 0], [], []>} : vector<8x8xf32>, vector<8x8xf32>, vector<8x8xf32> -> vector<8x8xf32>
    %cst_53 = arith.constant 0.353553385 : f32
    %82 = vector.broadcast %cst_53 : f32 to vector<8x8xf32>
    %83 = arith.mulf %81, %82 : vector<8x8xf32>
    %84 = arith.addf %83, %10 : vector<8x8xf32>
    %cst_54 = arith.constant dense<0xFF800000> : vector<8xf32>
    %85 = vector.multi_reduction <maximumf>, %84, %cst_54 [1] : vector<8x8xf32> to vector<8xf32>
    %86 = vector.shape_cast %85 : vector<8xf32> to vector<8x1xf32>
    %87 = vector.broadcast %86 : vector<8x1xf32> to vector<8x8xf32>
    %88 = arith.subf %84, %87 : vector<8x8xf32>
    %89 = math.exp %88 : vector<8x8xf32>
    %cst_55 = arith.constant dense<0.000000e+00> : vector<8xf32>
    %90 = vector.multi_reduction <add>, %89, %cst_55 [1] : vector<8x8xf32> to vector<8xf32>
    %91 = vector.shape_cast %90 : vector<8xf32> to vector<8x1xf32>
    %92 = tpu.reciprocal %91 : vector<8x1xf32> -> vector<8x1xf32>
    %93 = vector.broadcast %92 : vector<8x1xf32> to vector<8x8xf32>
    %94 = arith.mulf %89, %93 : vector<8x8xf32>
    %cst_56 = arith.constant dense<0.000000e+00> : vector<8x8xf32>
    %95 = tpu.matmul %94, %80, %cst_56 {dimension_numbers = #tpu.dot_dimension_numbers<[1], [0], [0], [1], [0, 0, 1, 1], [], []>} : vector<8x8xf32>, vector<8x8xf32>, vector<8x8xf32> -> vector<8x8xf32>
    %c0_57 = arith.constant 0 : index
    %c0_58 = arith.constant 0 : index
    %c0_59 = arith.constant 0 : index
    %96 = vector.load %arg18[%c0_57, %c0_58, %c0_59] : memref<4x8x32xf32, #tpu.memory_space<vmem>>, vector<1x8x32xf32>
    %97 = vector.shape_cast %96 : vector<1x8x32xf32> to vector<8x32xf32>
    %cst_60 = arith.constant dense<0.000000e+00> : vector<8x32xf32>
    %98 = tpu.matmul %95, %97, %cst_60 {dimension_numbers = #tpu.dot_dimension_numbers<[1], [0], [0], [1], [0, 0, 1, 1], [], []>} : vector<8x8xf32>, vector<8x32xf32>, vector<8x32xf32> -> vector<8x32xf32>
    %99 = arith.addf %59, %98 : vector<8x32xf32>
    %c1 = arith.constant 1 : index
    %c0_61 = arith.constant 0 : index
    %c0_62 = arith.constant 0 : index
    %100 = vector.load %arg12[%c1, %c0_61, %c0_62] : memref<4x32x8xf32, #tpu.memory_space<vmem>>, vector<1x32x8xf32>
    %101 = vector.shape_cast %100 : vector<1x32x8xf32> to vector<32x8xf32>
    %cst_63 = arith.constant dense<0.000000e+00> : vector<8x8xf32>
    %102 = tpu.matmul %58, %101, %cst_63 {dimension_numbers = #tpu.dot_dimension_numbers<[1], [0], [0], [1], [0, 0, 1, 1], [], []>} : vector<8x32xf32>, vector<32x8xf32>, vector<8x8xf32> -> vector<8x8xf32>
    %c1_64 = arith.constant 1 : index
    %c0_65 = arith.constant 0 : index
    %c0_66 = arith.constant 0 : index
    %103 = vector.load %arg13[%c1_64, %c0_65, %c0_66] : memref<4x1x8xf32, #tpu.memory_space<vmem>>, vector<1x1x8xf32>
    %104 = vector.shape_cast %103 : vector<1x1x8xf32> to vector<1x8xf32>
    %105 = vector.broadcast %104 : vector<1x8xf32> to vector<8x8xf32>
    %106 = arith.addf %102, %105 : vector<8x8xf32>
    %c1_67 = arith.constant 1 : index
    %c0_68 = arith.constant 0 : index
    %c0_69 = arith.constant 0 : index
    %107 = vector.load %arg14[%c1_67, %c0_68, %c0_69] : memref<4x32x8xf32, #tpu.memory_space<vmem>>, vector<1x32x8xf32>
    %108 = vector.shape_cast %107 : vector<1x32x8xf32> to vector<32x8xf32>
    %cst_70 = arith.constant dense<0.000000e+00> : vector<8x8xf32>
    %109 = tpu.matmul %35, %108, %cst_70 {dimension_numbers = #tpu.dot_dimension_numbers<[1], [0], [0], [1], [0, 0, 1, 1], [], []>} : vector<8x32xf32>, vector<32x8xf32>, vector<8x8xf32> -> vector<8x8xf32>
    %c1_71 = arith.constant 1 : index
    %c0_72 = arith.constant 0 : index
    %c0_73 = arith.constant 0 : index
    %110 = vector.load %arg15[%c1_71, %c0_72, %c0_73] : memref<4x1x8xf32, #tpu.memory_space<vmem>>, vector<1x1x8xf32>
    %111 = vector.shape_cast %110 : vector<1x1x8xf32> to vector<1x8xf32>
    %112 = vector.broadcast %111 : vector<1x8xf32> to vector<8x8xf32>
    %113 = arith.addf %109, %112 : vector<8x8xf32>
    %c1_74 = arith.constant 1 : index
    %c0_75 = arith.constant 0 : index
    %c0_76 = arith.constant 0 : index
    %114 = vector.load %arg16[%c1_74, %c0_75, %c0_76] : memref<4x32x8xf32, #tpu.memory_space<vmem>>, vector<1x32x8xf32>
    %115 = vector.shape_cast %114 : vector<1x32x8xf32> to vector<32x8xf32>
    %cst_77 = arith.constant dense<0.000000e+00> : vector<8x8xf32>
    %116 = tpu.matmul %35, %115, %cst_77 {dimension_numbers = #tpu.dot_dimension_numbers<[1], [0], [0], [1], [0, 0, 1, 1], [], []>} : vector<8x32xf32>, vector<32x8xf32>, vector<8x8xf32> -> vector<8x8xf32>
    %c1_78 = arith.constant 1 : index
    %c0_79 = arith.constant 0 : index
    %c0_80 = arith.constant 0 : index
    %117 = vector.load %arg17[%c1_78, %c0_79, %c0_80] : memref<4x1x8xf32, #tpu.memory_space<vmem>>, vector<1x1x8xf32>
    %118 = vector.shape_cast %117 : vector<1x1x8xf32> to vector<1x8xf32>
    %119 = vector.broadcast %118 : vector<1x8xf32> to vector<8x8xf32>
    %120 = arith.addf %116, %119 : vector<8x8xf32>
    %cst_81 = arith.constant dense<0.000000e+00> : vector<8x8xf32>
    %121 = tpu.matmul %106, %113, %cst_81 {dimension_numbers = #tpu.dot_dimension_numbers<[1], [1], [0], [0], [0, 0, 1, 0], [], []>} : vector<8x8xf32>, vector<8x8xf32>, vector<8x8xf32> -> vector<8x8xf32>
    %cst_82 = arith.constant 0.353553385 : f32
    %122 = vector.broadcast %cst_82 : f32 to vector<8x8xf32>
    %123 = arith.mulf %121, %122 : vector<8x8xf32>
    %124 = arith.addf %123, %10 : vector<8x8xf32>
    %cst_83 = arith.constant dense<0xFF800000> : vector<8xf32>
    %125 = vector.multi_reduction <maximumf>, %124, %cst_83 [1] : vector<8x8xf32> to vector<8xf32>
    %126 = vector.shape_cast %125 : vector<8xf32> to vector<8x1xf32>
    %127 = vector.broadcast %126 : vector<8x1xf32> to vector<8x8xf32>
    %128 = arith.subf %124, %127 : vector<8x8xf32>
    %129 = math.exp %128 : vector<8x8xf32>
    %cst_84 = arith.constant dense<0.000000e+00> : vector<8xf32>
    %130 = vector.multi_reduction <add>, %129, %cst_84 [1] : vector<8x8xf32> to vector<8xf32>
    %131 = vector.shape_cast %130 : vector<8xf32> to vector<8x1xf32>
    %132 = tpu.reciprocal %131 : vector<8x1xf32> -> vector<8x1xf32>
    %133 = vector.broadcast %132 : vector<8x1xf32> to vector<8x8xf32>
    %134 = arith.mulf %129, %133 : vector<8x8xf32>
    %cst_85 = arith.constant dense<0.000000e+00> : vector<8x8xf32>
    %135 = tpu.matmul %134, %120, %cst_85 {dimension_numbers = #tpu.dot_dimension_numbers<[1], [0], [0], [1], [0, 0, 1, 1], [], []>} : vector<8x8xf32>, vector<8x8xf32>, vector<8x8xf32> -> vector<8x8xf32>
    %c1_86 = arith.constant 1 : index
    %c0_87 = arith.constant 0 : index
    %c0_88 = arith.constant 0 : index
    %136 = vector.load %arg18[%c1_86, %c0_87, %c0_88] : memref<4x8x32xf32, #tpu.memory_space<vmem>>, vector<1x8x32xf32>
    %137 = vector.shape_cast %136 : vector<1x8x32xf32> to vector<8x32xf32>
    %cst_89 = arith.constant dense<0.000000e+00> : vector<8x32xf32>
    %138 = tpu.matmul %135, %137, %cst_89 {dimension_numbers = #tpu.dot_dimension_numbers<[1], [0], [0], [1], [0, 0, 1, 1], [], []>} : vector<8x8xf32>, vector<8x32xf32>, vector<8x32xf32> -> vector<8x32xf32>
    %139 = arith.addf %99, %138 : vector<8x32xf32>
    %c2 = arith.constant 2 : index
    %c0_90 = arith.constant 0 : index
    %c0_91 = arith.constant 0 : index
    %140 = vector.load %arg12[%c2, %c0_90, %c0_91] : memref<4x32x8xf32, #tpu.memory_space<vmem>>, vector<1x32x8xf32>
    %141 = vector.shape_cast %140 : vector<1x32x8xf32> to vector<32x8xf32>
    %cst_92 = arith.constant dense<0.000000e+00> : vector<8x8xf32>
    %142 = tpu.matmul %58, %141, %cst_92 {dimension_numbers = #tpu.dot_dimension_numbers<[1], [0], [0], [1], [0, 0, 1, 1], [], []>} : vector<8x32xf32>, vector<32x8xf32>, vector<8x8xf32> -> vector<8x8xf32>
    %c2_93 = arith.constant 2 : index
    %c0_94 = arith.constant 0 : index
    %c0_95 = arith.constant 0 : index
    %143 = vector.load %arg13[%c2_93, %c0_94, %c0_95] : memref<4x1x8xf32, #tpu.memory_space<vmem>>, vector<1x1x8xf32>
    %144 = vector.shape_cast %143 : vector<1x1x8xf32> to vector<1x8xf32>
    %145 = vector.broadcast %144 : vector<1x8xf32> to vector<8x8xf32>
    %146 = arith.addf %142, %145 : vector<8x8xf32>
    %c2_96 = arith.constant 2 : index
    %c0_97 = arith.constant 0 : index
    %c0_98 = arith.constant 0 : index
    %147 = vector.load %arg14[%c2_96, %c0_97, %c0_98] : memref<4x32x8xf32, #tpu.memory_space<vmem>>, vector<1x32x8xf32>
    %148 = vector.shape_cast %147 : vector<1x32x8xf32> to vector<32x8xf32>
    %cst_99 = arith.constant dense<0.000000e+00> : vector<8x8xf32>
    %149 = tpu.matmul %35, %148, %cst_99 {dimension_numbers = #tpu.dot_dimension_numbers<[1], [0], [0], [1], [0, 0, 1, 1], [], []>} : vector<8x32xf32>, vector<32x8xf32>, vector<8x8xf32> -> vector<8x8xf32>
    %c2_100 = arith.constant 2 : index
    %c0_101 = arith.constant 0 : index
    %c0_102 = arith.constant 0 : index
    %150 = vector.load %arg15[%c2_100, %c0_101, %c0_102] : memref<4x1x8xf32, #tpu.memory_space<vmem>>, vector<1x1x8xf32>
    %151 = vector.shape_cast %150 : vector<1x1x8xf32> to vector<1x8xf32>
    %152 = vector.broadcast %151 : vector<1x8xf32> to vector<8x8xf32>
    %153 = arith.addf %149, %152 : vector<8x8xf32>
    %c2_103 = arith.constant 2 : index
    %c0_104 = arith.constant 0 : index
    %c0_105 = arith.constant 0 : index
    %154 = vector.load %arg16[%c2_103, %c0_104, %c0_105] : memref<4x32x8xf32, #tpu.memory_space<vmem>>, vector<1x32x8xf32>
    %155 = vector.shape_cast %154 : vector<1x32x8xf32> to vector<32x8xf32>
    %cst_106 = arith.constant dense<0.000000e+00> : vector<8x8xf32>
    %156 = tpu.matmul %35, %155, %cst_106 {dimension_numbers = #tpu.dot_dimension_numbers<[1], [0], [0], [1], [0, 0, 1, 1], [], []>} : vector<8x32xf32>, vector<32x8xf32>, vector<8x8xf32> -> vector<8x8xf32>
    %c2_107 = arith.constant 2 : index
    %c0_108 = arith.constant 0 : index
    %c0_109 = arith.constant 0 : index
    %157 = vector.load %arg17[%c2_107, %c0_108, %c0_109] : memref<4x1x8xf32, #tpu.memory_space<vmem>>, vector<1x1x8xf32>
    %158 = vector.shape_cast %157 : vector<1x1x8xf32> to vector<1x8xf32>
    %159 = vector.broadcast %158 : vector<1x8xf32> to vector<8x8xf32>
    %160 = arith.addf %156, %159 : vector<8x8xf32>
    %cst_110 = arith.constant dense<0.000000e+00> : vector<8x8xf32>
    %161 = tpu.matmul %146, %153, %cst_110 {dimension_numbers = #tpu.dot_dimension_numbers<[1], [1], [0], [0], [0, 0, 1, 0], [], []>} : vector<8x8xf32>, vector<8x8xf32>, vector<8x8xf32> -> vector<8x8xf32>
    %cst_111 = arith.constant 0.353553385 : f32
    %162 = vector.broadcast %cst_111 : f32 to vector<8x8xf32>
    %163 = arith.mulf %161, %162 : vector<8x8xf32>
    %164 = arith.addf %163, %10 : vector<8x8xf32>
    %cst_112 = arith.constant dense<0xFF800000> : vector<8xf32>
    %165 = vector.multi_reduction <maximumf>, %164, %cst_112 [1] : vector<8x8xf32> to vector<8xf32>
    %166 = vector.shape_cast %165 : vector<8xf32> to vector<8x1xf32>
    %167 = vector.broadcast %166 : vector<8x1xf32> to vector<8x8xf32>
    %168 = arith.subf %164, %167 : vector<8x8xf32>
    %169 = math.exp %168 : vector<8x8xf32>
    %cst_113 = arith.constant dense<0.000000e+00> : vector<8xf32>
    %170 = vector.multi_reduction <add>, %169, %cst_113 [1] : vector<8x8xf32> to vector<8xf32>
    %171 = vector.shape_cast %170 : vector<8xf32> to vector<8x1xf32>
    %172 = tpu.reciprocal %171 : vector<8x1xf32> -> vector<8x1xf32>
    %173 = vector.broadcast %172 : vector<8x1xf32> to vector<8x8xf32>
    %174 = arith.mulf %169, %173 : vector<8x8xf32>
    %cst_114 = arith.constant dense<0.000000e+00> : vector<8x8xf32>
    %175 = tpu.matmul %174, %160, %cst_114 {dimension_numbers = #tpu.dot_dimension_numbers<[1], [0], [0], [1], [0, 0, 1, 1], [], []>} : vector<8x8xf32>, vector<8x8xf32>, vector<8x8xf32> -> vector<8x8xf32>
    %c2_115 = arith.constant 2 : index
    %c0_116 = arith.constant 0 : index
    %c0_117 = arith.constant 0 : index
    %176 = vector.load %arg18[%c2_115, %c0_116, %c0_117] : memref<4x8x32xf32, #tpu.memory_space<vmem>>, vector<1x8x32xf32>
    %177 = vector.shape_cast %176 : vector<1x8x32xf32> to vector<8x32xf32>
    %cst_118 = arith.constant dense<0.000000e+00> : vector<8x32xf32>
    %178 = tpu.matmul %175, %177, %cst_118 {dimension_numbers = #tpu.dot_dimension_numbers<[1], [0], [0], [1], [0, 0, 1, 1], [], []>} : vector<8x8xf32>, vector<8x32xf32>, vector<8x32xf32> -> vector<8x32xf32>
    %179 = arith.addf %139, %178 : vector<8x32xf32>
    %c3 = arith.constant 3 : index
    %c0_119 = arith.constant 0 : index
    %c0_120 = arith.constant 0 : index
    %180 = vector.load %arg12[%c3, %c0_119, %c0_120] : memref<4x32x8xf32, #tpu.memory_space<vmem>>, vector<1x32x8xf32>
    %181 = vector.shape_cast %180 : vector<1x32x8xf32> to vector<32x8xf32>
    %cst_121 = arith.constant dense<0.000000e+00> : vector<8x8xf32>
    %182 = tpu.matmul %58, %181, %cst_121 {dimension_numbers = #tpu.dot_dimension_numbers<[1], [0], [0], [1], [0, 0, 1, 1], [], []>} : vector<8x32xf32>, vector<32x8xf32>, vector<8x8xf32> -> vector<8x8xf32>
    %c3_122 = arith.constant 3 : index
    %c0_123 = arith.constant 0 : index
    %c0_124 = arith.constant 0 : index
    %183 = vector.load %arg13[%c3_122, %c0_123, %c0_124] : memref<4x1x8xf32, #tpu.memory_space<vmem>>, vector<1x1x8xf32>
    %184 = vector.shape_cast %183 : vector<1x1x8xf32> to vector<1x8xf32>
    %185 = vector.broadcast %184 : vector<1x8xf32> to vector<8x8xf32>
    %186 = arith.addf %182, %185 : vector<8x8xf32>
    %c3_125 = arith.constant 3 : index
    %c0_126 = arith.constant 0 : index
    %c0_127 = arith.constant 0 : index
    %187 = vector.load %arg14[%c3_125, %c0_126, %c0_127] : memref<4x32x8xf32, #tpu.memory_space<vmem>>, vector<1x32x8xf32>
    %188 = vector.shape_cast %187 : vector<1x32x8xf32> to vector<32x8xf32>
    %cst_128 = arith.constant dense<0.000000e+00> : vector<8x8xf32>
    %189 = tpu.matmul %35, %188, %cst_128 {dimension_numbers = #tpu.dot_dimension_numbers<[1], [0], [0], [1], [0, 0, 1, 1], [], []>} : vector<8x32xf32>, vector<32x8xf32>, vector<8x8xf32> -> vector<8x8xf32>
    %c3_129 = arith.constant 3 : index
    %c0_130 = arith.constant 0 : index
    %c0_131 = arith.constant 0 : index
    %190 = vector.load %arg15[%c3_129, %c0_130, %c0_131] : memref<4x1x8xf32, #tpu.memory_space<vmem>>, vector<1x1x8xf32>
    %191 = vector.shape_cast %190 : vector<1x1x8xf32> to vector<1x8xf32>
    %192 = vector.broadcast %191 : vector<1x8xf32> to vector<8x8xf32>
    %193 = arith.addf %189, %192 : vector<8x8xf32>
    %c3_132 = arith.constant 3 : index
    %c0_133 = arith.constant 0 : index
    %c0_134 = arith.constant 0 : index
    %194 = vector.load %arg16[%c3_132, %c0_133, %c0_134] : memref<4x32x8xf32, #tpu.memory_space<vmem>>, vector<1x32x8xf32>
    %195 = vector.shape_cast %194 : vector<1x32x8xf32> to vector<32x8xf32>
    %cst_135 = arith.constant dense<0.000000e+00> : vector<8x8xf32>
    %196 = tpu.matmul %35, %195, %cst_135 {dimension_numbers = #tpu.dot_dimension_numbers<[1], [0], [0], [1], [0, 0, 1, 1], [], []>} : vector<8x32xf32>, vector<32x8xf32>, vector<8x8xf32> -> vector<8x8xf32>
    %c3_136 = arith.constant 3 : index
    %c0_137 = arith.constant 0 : index
    %c0_138 = arith.constant 0 : index
    %197 = vector.load %arg17[%c3_136, %c0_137, %c0_138] : memref<4x1x8xf32, #tpu.memory_space<vmem>>, vector<1x1x8xf32>
    %198 = vector.shape_cast %197 : vector<1x1x8xf32> to vector<1x8xf32>
    %199 = vector.broadcast %198 : vector<1x8xf32> to vector<8x8xf32>
    %200 = arith.addf %196, %199 : vector<8x8xf32>
    %cst_139 = arith.constant dense<0.000000e+00> : vector<8x8xf32>
    %201 = tpu.matmul %186, %193, %cst_139 {dimension_numbers = #tpu.dot_dimension_numbers<[1], [1], [0], [0], [0, 0, 1, 0], [], []>} : vector<8x8xf32>, vector<8x8xf32>, vector<8x8xf32> -> vector<8x8xf32>
    %cst_140 = arith.constant 0.353553385 : f32
    %202 = vector.broadcast %cst_140 : f32 to vector<8x8xf32>
    %203 = arith.mulf %201, %202 : vector<8x8xf32>
    %204 = arith.addf %203, %10 : vector<8x8xf32>
    %cst_141 = arith.constant dense<0xFF800000> : vector<8xf32>
    %205 = vector.multi_reduction <maximumf>, %204, %cst_141 [1] : vector<8x8xf32> to vector<8xf32>
    %206 = vector.shape_cast %205 : vector<8xf32> to vector<8x1xf32>
    %207 = vector.broadcast %206 : vector<8x1xf32> to vector<8x8xf32>
    %208 = arith.subf %204, %207 : vector<8x8xf32>
    %209 = math.exp %208 : vector<8x8xf32>
    %cst_142 = arith.constant dense<0.000000e+00> : vector<8xf32>
    %210 = vector.multi_reduction <add>, %209, %cst_142 [1] : vector<8x8xf32> to vector<8xf32>
    %211 = vector.shape_cast %210 : vector<8xf32> to vector<8x1xf32>
    %212 = tpu.reciprocal %211 : vector<8x1xf32> -> vector<8x1xf32>
    %213 = vector.broadcast %212 : vector<8x1xf32> to vector<8x8xf32>
    %214 = arith.mulf %209, %213 : vector<8x8xf32>
    %cst_143 = arith.constant dense<0.000000e+00> : vector<8x8xf32>
    %215 = tpu.matmul %214, %200, %cst_143 {dimension_numbers = #tpu.dot_dimension_numbers<[1], [0], [0], [1], [0, 0, 1, 1], [], []>} : vector<8x8xf32>, vector<8x8xf32>, vector<8x8xf32> -> vector<8x8xf32>
    %c3_144 = arith.constant 3 : index
    %c0_145 = arith.constant 0 : index
    %c0_146 = arith.constant 0 : index
    %216 = vector.load %arg18[%c3_144, %c0_145, %c0_146] : memref<4x8x32xf32, #tpu.memory_space<vmem>>, vector<1x8x32xf32>
    %217 = vector.shape_cast %216 : vector<1x8x32xf32> to vector<8x32xf32>
    %cst_147 = arith.constant dense<0.000000e+00> : vector<8x32xf32>
    %218 = tpu.matmul %215, %217, %cst_147 {dimension_numbers = #tpu.dot_dimension_numbers<[1], [0], [0], [1], [0, 0, 1, 1], [], []>} : vector<8x8xf32>, vector<8x32xf32>, vector<8x32xf32> -> vector<8x32xf32>
    %219 = arith.addf %179, %218 : vector<8x32xf32>
    %c0_148 = arith.constant 0 : index
    %c0_149 = arith.constant 0 : index
    %220 = vector.load %arg19[%c0_148, %c0_149] : memref<1x32xf32, #tpu.memory_space<vmem>>, vector<1x32xf32>
    %221 = vector.broadcast %220 : vector<1x32xf32> to vector<8x32xf32>
    %222 = arith.addf %219, %221 : vector<8x32xf32>
    %223 = arith.addf %6, %222 : vector<8x32xf32>
    %c0_150 = arith.constant 0 : index
    %c0_151 = arith.constant 0 : index
    %224 = vector.load %arg8[%c0_150, %c0_151] : memref<1x32xf32, #tpu.memory_space<vmem>>, vector<1x32xf32>
    %c0_152 = arith.constant 0 : index
    %c0_153 = arith.constant 0 : index
    %225 = vector.load %arg9[%c0_152, %c0_153] : memref<1x32xf32, #tpu.memory_space<vmem>>, vector<1x32xf32>
    %cst_154 = arith.constant dense<0.000000e+00> : vector<8xf32>
    %226 = vector.multi_reduction <add>, %223, %cst_154 [1] : vector<8x32xf32> to vector<8xf32>
    %227 = vector.shape_cast %226 : vector<8xf32> to vector<8x1xf32>
    %cst_155 = arith.constant 3.200000e+01 : f32
    %228 = vector.broadcast %cst_155 : f32 to vector<8x1xf32>
    %229 = arith.divf %227, %228 : vector<8x1xf32>
    %230 = vector.broadcast %229 : vector<8x1xf32> to vector<8x32xf32>
    %231 = arith.subf %223, %230 : vector<8x32xf32>
    %232 = arith.mulf %231, %231 : vector<8x32xf32>
    %cst_156 = arith.constant dense<0.000000e+00> : vector<8xf32>
    %233 = vector.multi_reduction <add>, %232, %cst_156 [1] : vector<8x32xf32> to vector<8xf32>
    %234 = vector.shape_cast %233 : vector<8xf32> to vector<8x1xf32>
    %cst_157 = arith.constant 3.100000e+01 : f32
    %235 = vector.broadcast %cst_157 : f32 to vector<8x1xf32>
    %236 = arith.divf %234, %235 : vector<8x1xf32>
    %237 = math.sqrt %236 : vector<8x1xf32>
    %cst_158 = arith.constant 9.99999997E-7 : f32
    %238 = vector.broadcast %cst_158 : f32 to vector<8x1xf32>
    %239 = arith.addf %237, %238 : vector<8x1xf32>
    %240 = tpu.reciprocal %239 : vector<8x1xf32> -> vector<8x1xf32>
    %241 = vector.broadcast %240 : vector<8x1xf32> to vector<8x32xf32>
    %242 = arith.mulf %231, %241 : vector<8x32xf32>
    %243 = vector.broadcast %224 : vector<1x32xf32> to vector<8x32xf32>
    %244 = arith.mulf %243, %242 : vector<8x32xf32>
    %245 = vector.broadcast %225 : vector<1x32xf32> to vector<8x32xf32>
    %246 = arith.addf %244, %245 : vector<8x32xf32>
    %cst_159 = arith.constant 0.000000e+00 : f32
    %247 = vector.broadcast %cst_159 : f32 to vector<8x32xf32>
    %c0_160 = arith.constant 0 : index
    %c0_161 = arith.constant 0 : index
    %c0_162 = arith.constant 0 : index
    %248 = vector.load %arg20[%c0_160, %c0_161, %c0_162] : memref<4x32x8xf32, #tpu.memory_space<vmem>>, vector<1x32x8xf32>
    %249 = vector.shape_cast %248 : vector<1x32x8xf32> to vector<32x8xf32>
    %cst_163 = arith.constant dense<0.000000e+00> : vector<8x8xf32>
    %250 = tpu.matmul %246, %249, %cst_163 {dimension_numbers = #tpu.dot_dimension_numbers<[1], [0], [0], [1], [0, 0, 1, 1], [], []>} : vector<8x32xf32>, vector<32x8xf32>, vector<8x8xf32> -> vector<8x8xf32>
    %c0_164 = arith.constant 0 : index
    %c0_165 = arith.constant 0 : index
    %c0_166 = arith.constant 0 : index
    %251 = vector.load %arg21[%c0_164, %c0_165, %c0_166] : memref<4x1x8xf32, #tpu.memory_space<vmem>>, vector<1x1x8xf32>
    %252 = vector.shape_cast %251 : vector<1x1x8xf32> to vector<1x8xf32>
    %253 = vector.broadcast %252 : vector<1x8xf32> to vector<8x8xf32>
    %254 = arith.addf %250, %253 : vector<8x8xf32>
    %c0_167 = arith.constant 0 : index
    %c0_168 = arith.constant 0 : index
    %c0_169 = arith.constant 0 : index
    %255 = vector.load %arg22[%c0_167, %c0_168, %c0_169] : memref<4x32x8xf32, #tpu.memory_space<vmem>>, vector<1x32x8xf32>
    %256 = vector.shape_cast %255 : vector<1x32x8xf32> to vector<32x8xf32>
    %cst_170 = arith.constant dense<0.000000e+00> : vector<16x8xf32>
    %257 = tpu.matmul %8, %256, %cst_170 {dimension_numbers = #tpu.dot_dimension_numbers<[1], [0], [0], [1], [0, 0, 1, 1], [], []>} : vector<16x32xf32>, vector<32x8xf32>, vector<16x8xf32> -> vector<16x8xf32>
    %c0_171 = arith.constant 0 : index
    %c0_172 = arith.constant 0 : index
    %c0_173 = arith.constant 0 : index
    %258 = vector.load %arg23[%c0_171, %c0_172, %c0_173] : memref<4x1x8xf32, #tpu.memory_space<vmem>>, vector<1x1x8xf32>
    %259 = vector.shape_cast %258 : vector<1x1x8xf32> to vector<1x8xf32>
    %260 = vector.broadcast %259 : vector<1x8xf32> to vector<16x8xf32>
    %261 = arith.addf %257, %260 : vector<16x8xf32>
    %c0_174 = arith.constant 0 : index
    %c0_175 = arith.constant 0 : index
    %c0_176 = arith.constant 0 : index
    %262 = vector.load %arg24[%c0_174, %c0_175, %c0_176] : memref<4x32x8xf32, #tpu.memory_space<vmem>>, vector<1x32x8xf32>
    %263 = vector.shape_cast %262 : vector<1x32x8xf32> to vector<32x8xf32>
    %cst_177 = arith.constant dense<0.000000e+00> : vector<16x8xf32>
    %264 = tpu.matmul %8, %263, %cst_177 {dimension_numbers = #tpu.dot_dimension_numbers<[1], [0], [0], [1], [0, 0, 1, 1], [], []>} : vector<16x32xf32>, vector<32x8xf32>, vector<16x8xf32> -> vector<16x8xf32>
    %c0_178 = arith.constant 0 : index
    %c0_179 = arith.constant 0 : index
    %c0_180 = arith.constant 0 : index
    %265 = vector.load %arg25[%c0_178, %c0_179, %c0_180] : memref<4x1x8xf32, #tpu.memory_space<vmem>>, vector<1x1x8xf32>
    %266 = vector.shape_cast %265 : vector<1x1x8xf32> to vector<1x8xf32>
    %267 = vector.broadcast %266 : vector<1x8xf32> to vector<16x8xf32>
    %268 = arith.addf %264, %267 : vector<16x8xf32>
    %cst_181 = arith.constant dense<0.000000e+00> : vector<8x16xf32>
    %269 = tpu.matmul %254, %261, %cst_181 {dimension_numbers = #tpu.dot_dimension_numbers<[1], [1], [0], [0], [0, 0, 1, 0], [], []>} : vector<8x8xf32>, vector<16x8xf32>, vector<8x16xf32> -> vector<8x16xf32>
    %cst_182 = arith.constant 0.353553385 : f32
    %270 = vector.broadcast %cst_182 : f32 to vector<8x16xf32>
    %271 = arith.mulf %269, %270 : vector<8x16xf32>
    %272 = arith.addf %271, %12 : vector<8x16xf32>
    %cst_183 = arith.constant dense<0xFF800000> : vector<8xf32>
    %273 = vector.multi_reduction <maximumf>, %272, %cst_183 [1] : vector<8x16xf32> to vector<8xf32>
    %274 = vector.shape_cast %273 : vector<8xf32> to vector<8x1xf32>
    %275 = vector.broadcast %274 : vector<8x1xf32> to vector<8x16xf32>
    %276 = arith.subf %272, %275 : vector<8x16xf32>
    %277 = math.exp %276 : vector<8x16xf32>
    %cst_184 = arith.constant dense<0.000000e+00> : vector<8xf32>
    %278 = vector.multi_reduction <add>, %277, %cst_184 [1] : vector<8x16xf32> to vector<8xf32>
    %279 = vector.shape_cast %278 : vector<8xf32> to vector<8x1xf32>
    %280 = tpu.reciprocal %279 : vector<8x1xf32> -> vector<8x1xf32>
    %281 = vector.broadcast %280 : vector<8x1xf32> to vector<8x16xf32>
    %282 = arith.mulf %277, %281 : vector<8x16xf32>
    %cst_185 = arith.constant dense<0.000000e+00> : vector<8x8xf32>
    %283 = tpu.matmul %282, %268, %cst_185 {dimension_numbers = #tpu.dot_dimension_numbers<[1], [0], [0], [1], [0, 0, 1, 1], [], []>} : vector<8x16xf32>, vector<16x8xf32>, vector<8x8xf32> -> vector<8x8xf32>
    %c0_186 = arith.constant 0 : index
    %c0_187 = arith.constant 0 : index
    %c0_188 = arith.constant 0 : index
    %284 = vector.load %arg26[%c0_186, %c0_187, %c0_188] : memref<4x8x32xf32, #tpu.memory_space<vmem>>, vector<1x8x32xf32>
    %285 = vector.shape_cast %284 : vector<1x8x32xf32> to vector<8x32xf32>
    %cst_189 = arith.constant dense<0.000000e+00> : vector<8x32xf32>
    %286 = tpu.matmul %283, %285, %cst_189 {dimension_numbers = #tpu.dot_dimension_numbers<[1], [0], [0], [1], [0, 0, 1, 1], [], []>} : vector<8x8xf32>, vector<8x32xf32>, vector<8x32xf32> -> vector<8x32xf32>
    %287 = arith.addf %247, %286 : vector<8x32xf32>
    %c1_190 = arith.constant 1 : index
    %c0_191 = arith.constant 0 : index
    %c0_192 = arith.constant 0 : index
    %288 = vector.load %arg20[%c1_190, %c0_191, %c0_192] : memref<4x32x8xf32, #tpu.memory_space<vmem>>, vector<1x32x8xf32>
    %289 = vector.shape_cast %288 : vector<1x32x8xf32> to vector<32x8xf32>
    %cst_193 = arith.constant dense<0.000000e+00> : vector<8x8xf32>
    %290 = tpu.matmul %246, %289, %cst_193 {dimension_numbers = #tpu.dot_dimension_numbers<[1], [0], [0], [1], [0, 0, 1, 1], [], []>} : vector<8x32xf32>, vector<32x8xf32>, vector<8x8xf32> -> vector<8x8xf32>
    %c1_194 = arith.constant 1 : index
    %c0_195 = arith.constant 0 : index
    %c0_196 = arith.constant 0 : index
    %291 = vector.load %arg21[%c1_194, %c0_195, %c0_196] : memref<4x1x8xf32, #tpu.memory_space<vmem>>, vector<1x1x8xf32>
    %292 = vector.shape_cast %291 : vector<1x1x8xf32> to vector<1x8xf32>
    %293 = vector.broadcast %292 : vector<1x8xf32> to vector<8x8xf32>
    %294 = arith.addf %290, %293 : vector<8x8xf32>
    %c1_197 = arith.constant 1 : index
    %c0_198 = arith.constant 0 : index
    %c0_199 = arith.constant 0 : index
    %295 = vector.load %arg22[%c1_197, %c0_198, %c0_199] : memref<4x32x8xf32, #tpu.memory_space<vmem>>, vector<1x32x8xf32>
    %296 = vector.shape_cast %295 : vector<1x32x8xf32> to vector<32x8xf32>
    %cst_200 = arith.constant dense<0.000000e+00> : vector<16x8xf32>
    %297 = tpu.matmul %8, %296, %cst_200 {dimension_numbers = #tpu.dot_dimension_numbers<[1], [0], [0], [1], [0, 0, 1, 1], [], []>} : vector<16x32xf32>, vector<32x8xf32>, vector<16x8xf32> -> vector<16x8xf32>
    %c1_201 = arith.constant 1 : index
    %c0_202 = arith.constant 0 : index
    %c0_203 = arith.constant 0 : index
    %298 = vector.load %arg23[%c1_201, %c0_202, %c0_203] : memref<4x1x8xf32, #tpu.memory_space<vmem>>, vector<1x1x8xf32>
    %299 = vector.shape_cast %298 : vector<1x1x8xf32> to vector<1x8xf32>
    %300 = vector.broadcast %299 : vector<1x8xf32> to vector<16x8xf32>
    %301 = arith.addf %297, %300 : vector<16x8xf32>
    %c1_204 = arith.constant 1 : index
    %c0_205 = arith.constant 0 : index
    %c0_206 = arith.constant 0 : index
    %302 = vector.load %arg24[%c1_204, %c0_205, %c0_206] : memref<4x32x8xf32, #tpu.memory_space<vmem>>, vector<1x32x8xf32>
    %303 = vector.shape_cast %302 : vector<1x32x8xf32> to vector<32x8xf32>
    %cst_207 = arith.constant dense<0.000000e+00> : vector<16x8xf32>
    %304 = tpu.matmul %8, %303, %cst_207 {dimension_numbers = #tpu.dot_dimension_numbers<[1], [0], [0], [1], [0, 0, 1, 1], [], []>} : vector<16x32xf32>, vector<32x8xf32>, vector<16x8xf32> -> vector<16x8xf32>
    %c1_208 = arith.constant 1 : index
    %c0_209 = arith.constant 0 : index
    %c0_210 = arith.constant 0 : index
    %305 = vector.load %arg25[%c1_208, %c0_209, %c0_210] : memref<4x1x8xf32, #tpu.memory_space<vmem>>, vector<1x1x8xf32>
    %306 = vector.shape_cast %305 : vector<1x1x8xf32> to vector<1x8xf32>
    %307 = vector.broadcast %306 : vector<1x8xf32> to vector<16x8xf32>
    %308 = arith.addf %304, %307 : vector<16x8xf32>
    %cst_211 = arith.constant dense<0.000000e+00> : vector<8x16xf32>
    %309 = tpu.matmul %294, %301, %cst_211 {dimension_numbers = #tpu.dot_dimension_numbers<[1], [1], [0], [0], [0, 0, 1, 0], [], []>} : vector<8x8xf32>, vector<16x8xf32>, vector<8x16xf32> -> vector<8x16xf32>
    %cst_212 = arith.constant 0.353553385 : f32
    %310 = vector.broadcast %cst_212 : f32 to vector<8x16xf32>
    %311 = arith.mulf %309, %310 : vector<8x16xf32>
    %312 = arith.addf %311, %12 : vector<8x16xf32>
    %cst_213 = arith.constant dense<0xFF800000> : vector<8xf32>
    %313 = vector.multi_reduction <maximumf>, %312, %cst_213 [1] : vector<8x16xf32> to vector<8xf32>
    %314 = vector.shape_cast %313 : vector<8xf32> to vector<8x1xf32>
    %315 = vector.broadcast %314 : vector<8x1xf32> to vector<8x16xf32>
    %316 = arith.subf %312, %315 : vector<8x16xf32>
    %317 = math.exp %316 : vector<8x16xf32>
    %cst_214 = arith.constant dense<0.000000e+00> : vector<8xf32>
    %318 = vector.multi_reduction <add>, %317, %cst_214 [1] : vector<8x16xf32> to vector<8xf32>
    %319 = vector.shape_cast %318 : vector<8xf32> to vector<8x1xf32>
    %320 = tpu.reciprocal %319 : vector<8x1xf32> -> vector<8x1xf32>
    %321 = vector.broadcast %320 : vector<8x1xf32> to vector<8x16xf32>
    %322 = arith.mulf %317, %321 : vector<8x16xf32>
    %cst_215 = arith.constant dense<0.000000e+00> : vector<8x8xf32>
    %323 = tpu.matmul %322, %308, %cst_215 {dimension_numbers = #tpu.dot_dimension_numbers<[1], [0], [0], [1], [0, 0, 1, 1], [], []>} : vector<8x16xf32>, vector<16x8xf32>, vector<8x8xf32> -> vector<8x8xf32>
    %c1_216 = arith.constant 1 : index
    %c0_217 = arith.constant 0 : index
    %c0_218 = arith.constant 0 : index
    %324 = vector.load %arg26[%c1_216, %c0_217, %c0_218] : memref<4x8x32xf32, #tpu.memory_space<vmem>>, vector<1x8x32xf32>
    %325 = vector.shape_cast %324 : vector<1x8x32xf32> to vector<8x32xf32>
    %cst_219 = arith.constant dense<0.000000e+00> : vector<8x32xf32>
    %326 = tpu.matmul %323, %325, %cst_219 {dimension_numbers = #tpu.dot_dimension_numbers<[1], [0], [0], [1], [0, 0, 1, 1], [], []>} : vector<8x8xf32>, vector<8x32xf32>, vector<8x32xf32> -> vector<8x32xf32>
    %327 = arith.addf %287, %326 : vector<8x32xf32>
    %c2_220 = arith.constant 2 : index
    %c0_221 = arith.constant 0 : index
    %c0_222 = arith.constant 0 : index
    %328 = vector.load %arg20[%c2_220, %c0_221, %c0_222] : memref<4x32x8xf32, #tpu.memory_space<vmem>>, vector<1x32x8xf32>
    %329 = vector.shape_cast %328 : vector<1x32x8xf32> to vector<32x8xf32>
    %cst_223 = arith.constant dense<0.000000e+00> : vector<8x8xf32>
    %330 = tpu.matmul %246, %329, %cst_223 {dimension_numbers = #tpu.dot_dimension_numbers<[1], [0], [0], [1], [0, 0, 1, 1], [], []>} : vector<8x32xf32>, vector<32x8xf32>, vector<8x8xf32> -> vector<8x8xf32>
    %c2_224 = arith.constant 2 : index
    %c0_225 = arith.constant 0 : index
    %c0_226 = arith.constant 0 : index
    %331 = vector.load %arg21[%c2_224, %c0_225, %c0_226] : memref<4x1x8xf32, #tpu.memory_space<vmem>>, vector<1x1x8xf32>
    %332 = vector.shape_cast %331 : vector<1x1x8xf32> to vector<1x8xf32>
    %333 = vector.broadcast %332 : vector<1x8xf32> to vector<8x8xf32>
    %334 = arith.addf %330, %333 : vector<8x8xf32>
    %c2_227 = arith.constant 2 : index
    %c0_228 = arith.constant 0 : index
    %c0_229 = arith.constant 0 : index
    %335 = vector.load %arg22[%c2_227, %c0_228, %c0_229] : memref<4x32x8xf32, #tpu.memory_space<vmem>>, vector<1x32x8xf32>
    %336 = vector.shape_cast %335 : vector<1x32x8xf32> to vector<32x8xf32>
    %cst_230 = arith.constant dense<0.000000e+00> : vector<16x8xf32>
    %337 = tpu.matmul %8, %336, %cst_230 {dimension_numbers = #tpu.dot_dimension_numbers<[1], [0], [0], [1], [0, 0, 1, 1], [], []>} : vector<16x32xf32>, vector<32x8xf32>, vector<16x8xf32> -> vector<16x8xf32>
    %c2_231 = arith.constant 2 : index
    %c0_232 = arith.constant 0 : index
    %c0_233 = arith.constant 0 : index
    %338 = vector.load %arg23[%c2_231, %c0_232, %c0_233] : memref<4x1x8xf32, #tpu.memory_space<vmem>>, vector<1x1x8xf32>
    %339 = vector.shape_cast %338 : vector<1x1x8xf32> to vector<1x8xf32>
    %340 = vector.broadcast %339 : vector<1x8xf32> to vector<16x8xf32>
    %341 = arith.addf %337, %340 : vector<16x8xf32>
    %c2_234 = arith.constant 2 : index
    %c0_235 = arith.constant 0 : index
    %c0_236 = arith.constant 0 : index
    %342 = vector.load %arg24[%c2_234, %c0_235, %c0_236] : memref<4x32x8xf32, #tpu.memory_space<vmem>>, vector<1x32x8xf32>
    %343 = vector.shape_cast %342 : vector<1x32x8xf32> to vector<32x8xf32>
    %cst_237 = arith.constant dense<0.000000e+00> : vector<16x8xf32>
    %344 = tpu.matmul %8, %343, %cst_237 {dimension_numbers = #tpu.dot_dimension_numbers<[1], [0], [0], [1], [0, 0, 1, 1], [], []>} : vector<16x32xf32>, vector<32x8xf32>, vector<16x8xf32> -> vector<16x8xf32>
    %c2_238 = arith.constant 2 : index
    %c0_239 = arith.constant 0 : index
    %c0_240 = arith.constant 0 : index
    %345 = vector.load %arg25[%c2_238, %c0_239, %c0_240] : memref<4x1x8xf32, #tpu.memory_space<vmem>>, vector<1x1x8xf32>
    %346 = vector.shape_cast %345 : vector<1x1x8xf32> to vector<1x8xf32>
    %347 = vector.broadcast %346 : vector<1x8xf32> to vector<16x8xf32>
    %348 = arith.addf %344, %347 : vector<16x8xf32>
    %cst_241 = arith.constant dense<0.000000e+00> : vector<8x16xf32>
    %349 = tpu.matmul %334, %341, %cst_241 {dimension_numbers = #tpu.dot_dimension_numbers<[1], [1], [0], [0], [0, 0, 1, 0], [], []>} : vector<8x8xf32>, vector<16x8xf32>, vector<8x16xf32> -> vector<8x16xf32>
    %cst_242 = arith.constant 0.353553385 : f32
    %350 = vector.broadcast %cst_242 : f32 to vector<8x16xf32>
    %351 = arith.mulf %349, %350 : vector<8x16xf32>
    %352 = arith.addf %351, %12 : vector<8x16xf32>
    %cst_243 = arith.constant dense<0xFF800000> : vector<8xf32>
    %353 = vector.multi_reduction <maximumf>, %352, %cst_243 [1] : vector<8x16xf32> to vector<8xf32>
    %354 = vector.shape_cast %353 : vector<8xf32> to vector<8x1xf32>
    %355 = vector.broadcast %354 : vector<8x1xf32> to vector<8x16xf32>
    %356 = arith.subf %352, %355 : vector<8x16xf32>
    %357 = math.exp %356 : vector<8x16xf32>
    %cst_244 = arith.constant dense<0.000000e+00> : vector<8xf32>
    %358 = vector.multi_reduction <add>, %357, %cst_244 [1] : vector<8x16xf32> to vector<8xf32>
    %359 = vector.shape_cast %358 : vector<8xf32> to vector<8x1xf32>
    %360 = tpu.reciprocal %359 : vector<8x1xf32> -> vector<8x1xf32>
    %361 = vector.broadcast %360 : vector<8x1xf32> to vector<8x16xf32>
    %362 = arith.mulf %357, %361 : vector<8x16xf32>
    %cst_245 = arith.constant dense<0.000000e+00> : vector<8x8xf32>
    %363 = tpu.matmul %362, %348, %cst_245 {dimension_numbers = #tpu.dot_dimension_numbers<[1], [0], [0], [1], [0, 0, 1, 1], [], []>} : vector<8x16xf32>, vector<16x8xf32>, vector<8x8xf32> -> vector<8x8xf32>
    %c2_246 = arith.constant 2 : index
    %c0_247 = arith.constant 0 : index
    %c0_248 = arith.constant 0 : index
    %364 = vector.load %arg26[%c2_246, %c0_247, %c0_248] : memref<4x8x32xf32, #tpu.memory_space<vmem>>, vector<1x8x32xf32>
    %365 = vector.shape_cast %364 : vector<1x8x32xf32> to vector<8x32xf32>
    %cst_249 = arith.constant dense<0.000000e+00> : vector<8x32xf32>
    %366 = tpu.matmul %363, %365, %cst_249 {dimension_numbers = #tpu.dot_dimension_numbers<[1], [0], [0], [1], [0, 0, 1, 1], [], []>} : vector<8x8xf32>, vector<8x32xf32>, vector<8x32xf32> -> vector<8x32xf32>
    %367 = arith.addf %327, %366 : vector<8x32xf32>
    %c3_250 = arith.constant 3 : index
    %c0_251 = arith.constant 0 : index
    %c0_252 = arith.constant 0 : index
    %368 = vector.load %arg20[%c3_250, %c0_251, %c0_252] : memref<4x32x8xf32, #tpu.memory_space<vmem>>, vector<1x32x8xf32>
    %369 = vector.shape_cast %368 : vector<1x32x8xf32> to vector<32x8xf32>
    %cst_253 = arith.constant dense<0.000000e+00> : vector<8x8xf32>
    %370 = tpu.matmul %246, %369, %cst_253 {dimension_numbers = #tpu.dot_dimension_numbers<[1], [0], [0], [1], [0, 0, 1, 1], [], []>} : vector<8x32xf32>, vector<32x8xf32>, vector<8x8xf32> -> vector<8x8xf32>
    %c3_254 = arith.constant 3 : index
    %c0_255 = arith.constant 0 : index
    %c0_256 = arith.constant 0 : index
    %371 = vector.load %arg21[%c3_254, %c0_255, %c0_256] : memref<4x1x8xf32, #tpu.memory_space<vmem>>, vector<1x1x8xf32>
    %372 = vector.shape_cast %371 : vector<1x1x8xf32> to vector<1x8xf32>
    %373 = vector.broadcast %372 : vector<1x8xf32> to vector<8x8xf32>
    %374 = arith.addf %370, %373 : vector<8x8xf32>
    %c3_257 = arith.constant 3 : index
    %c0_258 = arith.constant 0 : index
    %c0_259 = arith.constant 0 : index
    %375 = vector.load %arg22[%c3_257, %c0_258, %c0_259] : memref<4x32x8xf32, #tpu.memory_space<vmem>>, vector<1x32x8xf32>
    %376 = vector.shape_cast %375 : vector<1x32x8xf32> to vector<32x8xf32>
    %cst_260 = arith.constant dense<0.000000e+00> : vector<16x8xf32>
    %377 = tpu.matmul %8, %376, %cst_260 {dimension_numbers = #tpu.dot_dimension_numbers<[1], [0], [0], [1], [0, 0, 1, 1], [], []>} : vector<16x32xf32>, vector<32x8xf32>, vector<16x8xf32> -> vector<16x8xf32>
    %c3_261 = arith.constant 3 : index
    %c0_262 = arith.constant 0 : index
    %c0_263 = arith.constant 0 : index
    %378 = vector.load %arg23[%c3_261, %c0_262, %c0_263] : memref<4x1x8xf32, #tpu.memory_space<vmem>>, vector<1x1x8xf32>
    %379 = vector.shape_cast %378 : vector<1x1x8xf32> to vector<1x8xf32>
    %380 = vector.broadcast %379 : vector<1x8xf32> to vector<16x8xf32>
    %381 = arith.addf %377, %380 : vector<16x8xf32>
    %c3_264 = arith.constant 3 : index
    %c0_265 = arith.constant 0 : index
    %c0_266 = arith.constant 0 : index
    %382 = vector.load %arg24[%c3_264, %c0_265, %c0_266] : memref<4x32x8xf32, #tpu.memory_space<vmem>>, vector<1x32x8xf32>
    %383 = vector.shape_cast %382 : vector<1x32x8xf32> to vector<32x8xf32>
    %cst_267 = arith.constant dense<0.000000e+00> : vector<16x8xf32>
    %384 = tpu.matmul %8, %383, %cst_267 {dimension_numbers = #tpu.dot_dimension_numbers<[1], [0], [0], [1], [0, 0, 1, 1], [], []>} : vector<16x32xf32>, vector<32x8xf32>, vector<16x8xf32> -> vector<16x8xf32>
    %c3_268 = arith.constant 3 : index
    %c0_269 = arith.constant 0 : index
    %c0_270 = arith.constant 0 : index
    %385 = vector.load %arg25[%c3_268, %c0_269, %c0_270] : memref<4x1x8xf32, #tpu.memory_space<vmem>>, vector<1x1x8xf32>
    %386 = vector.shape_cast %385 : vector<1x1x8xf32> to vector<1x8xf32>
    %387 = vector.broadcast %386 : vector<1x8xf32> to vector<16x8xf32>
    %388 = arith.addf %384, %387 : vector<16x8xf32>
    %cst_271 = arith.constant dense<0.000000e+00> : vector<8x16xf32>
    %389 = tpu.matmul %374, %381, %cst_271 {dimension_numbers = #tpu.dot_dimension_numbers<[1], [1], [0], [0], [0, 0, 1, 0], [], []>} : vector<8x8xf32>, vector<16x8xf32>, vector<8x16xf32> -> vector<8x16xf32>
    %cst_272 = arith.constant 0.353553385 : f32
    %390 = vector.broadcast %cst_272 : f32 to vector<8x16xf32>
    %391 = arith.mulf %389, %390 : vector<8x16xf32>
    %392 = arith.addf %391, %12 : vector<8x16xf32>
    %cst_273 = arith.constant dense<0xFF800000> : vector<8xf32>
    %393 = vector.multi_reduction <maximumf>, %392, %cst_273 [1] : vector<8x16xf32> to vector<8xf32>
    %394 = vector.shape_cast %393 : vector<8xf32> to vector<8x1xf32>
    %395 = vector.broadcast %394 : vector<8x1xf32> to vector<8x16xf32>
    %396 = arith.subf %392, %395 : vector<8x16xf32>
    %397 = math.exp %396 : vector<8x16xf32>
    %cst_274 = arith.constant dense<0.000000e+00> : vector<8xf32>
    %398 = vector.multi_reduction <add>, %397, %cst_274 [1] : vector<8x16xf32> to vector<8xf32>
    %399 = vector.shape_cast %398 : vector<8xf32> to vector<8x1xf32>
    %400 = tpu.reciprocal %399 : vector<8x1xf32> -> vector<8x1xf32>
    %401 = vector.broadcast %400 : vector<8x1xf32> to vector<8x16xf32>
    %402 = arith.mulf %397, %401 : vector<8x16xf32>
    %cst_275 = arith.constant dense<0.000000e+00> : vector<8x8xf32>
    %403 = tpu.matmul %402, %388, %cst_275 {dimension_numbers = #tpu.dot_dimension_numbers<[1], [0], [0], [1], [0, 0, 1, 1], [], []>} : vector<8x16xf32>, vector<16x8xf32>, vector<8x8xf32> -> vector<8x8xf32>
    %c3_276 = arith.constant 3 : index
    %c0_277 = arith.constant 0 : index
    %c0_278 = arith.constant 0 : index
    %404 = vector.load %arg26[%c3_276, %c0_277, %c0_278] : memref<4x8x32xf32, #tpu.memory_space<vmem>>, vector<1x8x32xf32>
    %405 = vector.shape_cast %404 : vector<1x8x32xf32> to vector<8x32xf32>
    %cst_279 = arith.constant dense<0.000000e+00> : vector<8x32xf32>
    %406 = tpu.matmul %403, %405, %cst_279 {dimension_numbers = #tpu.dot_dimension_numbers<[1], [0], [0], [1], [0, 0, 1, 1], [], []>} : vector<8x8xf32>, vector<8x32xf32>, vector<8x32xf32> -> vector<8x32xf32>
    %407 = arith.addf %367, %406 : vector<8x32xf32>
    %c0_280 = arith.constant 0 : index
    %c0_281 = arith.constant 0 : index
    %408 = vector.load %arg27[%c0_280, %c0_281] : memref<1x32xf32, #tpu.memory_space<vmem>>, vector<1x32xf32>
    %409 = vector.broadcast %408 : vector<1x32xf32> to vector<8x32xf32>
    %410 = arith.addf %407, %409 : vector<8x32xf32>
    %411 = arith.addf %223, %410 : vector<8x32xf32>
    %c0_282 = arith.constant 0 : index
    %c0_283 = arith.constant 0 : index
    %412 = vector.load %arg10[%c0_282, %c0_283] : memref<1x32xf32, #tpu.memory_space<vmem>>, vector<1x32xf32>
    %c0_284 = arith.constant 0 : index
    %c0_285 = arith.constant 0 : index
    %413 = vector.load %arg11[%c0_284, %c0_285] : memref<1x32xf32, #tpu.memory_space<vmem>>, vector<1x32xf32>
    %cst_286 = arith.constant dense<0.000000e+00> : vector<8xf32>
    %414 = vector.multi_reduction <add>, %411, %cst_286 [1] : vector<8x32xf32> to vector<8xf32>
    %415 = vector.shape_cast %414 : vector<8xf32> to vector<8x1xf32>
    %cst_287 = arith.constant 3.200000e+01 : f32
    %416 = vector.broadcast %cst_287 : f32 to vector<8x1xf32>
    %417 = arith.divf %415, %416 : vector<8x1xf32>
    %418 = vector.broadcast %417 : vector<8x1xf32> to vector<8x32xf32>
    %419 = arith.subf %411, %418 : vector<8x32xf32>
    %420 = arith.mulf %419, %419 : vector<8x32xf32>
    %cst_288 = arith.constant dense<0.000000e+00> : vector<8xf32>
    %421 = vector.multi_reduction <add>, %420, %cst_288 [1] : vector<8x32xf32> to vector<8xf32>
    %422 = vector.shape_cast %421 : vector<8xf32> to vector<8x1xf32>
    %cst_289 = arith.constant 3.100000e+01 : f32
    %423 = vector.broadcast %cst_289 : f32 to vector<8x1xf32>
    %424 = arith.divf %422, %423 : vector<8x1xf32>
    %425 = math.sqrt %424 : vector<8x1xf32>
    %cst_290 = arith.constant 9.99999997E-7 : f32
    %426 = vector.broadcast %cst_290 : f32 to vector<8x1xf32>
    %427 = arith.addf %425, %426 : vector<8x1xf32>
    %428 = tpu.reciprocal %427 : vector<8x1xf32> -> vector<8x1xf32>
    %429 = vector.broadcast %428 : vector<8x1xf32> to vector<8x32xf32>
    %430 = arith.mulf %419, %429 : vector<8x32xf32>
    %431 = vector.broadcast %412 : vector<1x32xf32> to vector<8x32xf32>
    %432 = arith.mulf %431, %430 : vector<8x32xf32>
    %433 = vector.broadcast %413 : vector<1x32xf32> to vector<8x32xf32>
    %434 = arith.addf %432, %433 : vector<8x32xf32>
    %c0_291 = arith.constant 0 : index
    %c0_292 = arith.constant 0 : index
    %435 = vector.load %arg28[%c0_291, %c0_292] : memref<32x64xf32, #tpu.memory_space<vmem>>, vector<32x64xf32>
    %cst_293 = arith.constant dense<0.000000e+00> : vector<8x64xf32>
    %436 = tpu.matmul %434, %435, %cst_293 {dimension_numbers = #tpu.dot_dimension_numbers<[1], [0], [0], [1], [0, 0, 1, 1], [], []>} : vector<8x32xf32>, vector<32x64xf32>, vector<8x64xf32> -> vector<8x64xf32>
    %c0_294 = arith.constant 0 : index
    %c0_295 = arith.constant 0 : index
    %437 = vector.load %arg29[%c0_294, %c0_295] : memref<1x64xf32, #tpu.memory_space<vmem>>, vector<1x64xf32>
    %438 = vector.broadcast %437 : vector<1x64xf32> to vector<8x64xf32>
    %439 = arith.addf %436, %438 : vector<8x64xf32>
    %cst_296 = arith.constant 0.000000e+00 : f32
    %440 = vector.broadcast %cst_296 : f32 to vector<8x64xf32>
    %441 = arith.maximumf %439, %440 : vector<8x64xf32>
    %c0_297 = arith.constant 0 : index
    %c0_298 = arith.constant 0 : index
    %442 = vector.load %arg30[%c0_297, %c0_298] : memref<64x32xf32, #tpu.memory_space<vmem>>, vector<64x32xf32>
    %cst_299 = arith.constant dense<0.000000e+00> : vector<8x32xf32>
    %443 = tpu.matmul %441, %442, %cst_299 {dimension_numbers = #tpu.dot_dimension_numbers<[1], [0], [0], [1], [0, 0, 1, 1], [], []>} : vector<8x64xf32>, vector<64x32xf32>, vector<8x32xf32> -> vector<8x32xf32>
    %c0_300 = arith.constant 0 : index
    %c0_301 = arith.constant 0 : index
    %444 = vector.load %arg31[%c0_300, %c0_301] : memref<1x32xf32, #tpu.memory_space<vmem>>, vector<1x32xf32>
    %445 = vector.broadcast %444 : vector<1x32xf32> to vector<8x32xf32>
    %446 = arith.addf %443, %445 : vector<8x32xf32>
    %447 = arith.addf %411, %446 : vector<8x32xf32>
    %c0_302 = arith.constant 0 : index
    %c0_303 = arith.constant 0 : index
    %c0_304 = arith.constant 0 : index
    %448 = vector.load %arg32[%c0_302, %c0_303, %c0_304] : memref<1x8x32xf32, #tpu.memory_space<vmem>>, vector<1x8x32xf32>
    %449 = vector.shape_cast %448 : vector<1x8x32xf32> to vector<8x32xf32>
    %450 = vector.shape_cast %447 : vector<8x32xf32> to vector<1x8x32xf32>
    tpu.vector_store %arg32[%c0_302, %c0_303, %c0_304], %450 {strides = array<i32>} : memref<1x8x32xf32, #tpu.memory_space<vmem>>, vector<1x8x32xf32>,
    return
  }
  func.func @transform_0(%arg0: i32, %arg1: i32) -> (i32, i32, i32) {
    %c0_i32 = arith.constant 0 : i32
    %c0_i32_0 = arith.constant 0 : i32
    %c0_i32_1 = arith.constant 0 : i32
    return %arg0, %c0_i32, %c0_i32_0 : i32, i32, i32
  }
  func.func @transform_1(%arg0: i32, %arg1: i32) -> (i32, i32, i32) {
    %c0_i32 = arith.constant 0 : i32
    %c0_i32_0 = arith.constant 0 : i32
    %c0_i32_1 = arith.constant 0 : i32
    return %arg0, %c0_i32, %c0_i32_0 : i32, i32, i32
  }
  func.func @transform_2(%arg0: i32, %arg1: i32) -> (i32, i32, i32) {
    %c0_i32 = arith.constant 0 : i32
    %c0_i32_0 = arith.constant 0 : i32
    return %arg0, %arg1, %c0_i32 : i32, i32, i32
  }
  func.func @transform_3(%arg0: i32, %arg1: i32) -> (i32, i32, i32) {
    %c0_i32 = arith.constant 0 : i32
    %c0_i32_0 = arith.constant 0 : i32
    return %arg0, %arg1, %c0_i32 : i32, i32, i32
  }
  func.func @transform_4(%arg0: i32, %arg1: i32) -> (i32, i32) {
    %c0_i32 = arith.constant 0 : i32
    %c0_i32_0 = arith.constant 0 : i32
    %c0_i32_1 = arith.constant 0 : i32
    return %c0_i32, %c0_i32_0 : i32, i32
  }
  func.func @transform_5(%arg0: i32, %arg1: i32) -> (i32, i32) {
    %c0_i32 = arith.constant 0 : i32
    %c0_i32_0 = arith.constant 0 : i32
    %c0_i32_1 = arith.constant 0 : i32
    return %c0_i32, %c0_i32_0 : i32, i32
  }
  func.func @transform_6(%arg0: i32, %arg1: i32) -> (i32, i32) {
    %c0_i32 = arith.constant 0 : i32
    %c0_i32_0 = arith.constant 0 : i32
    %c0_i32_1 = arith.constant 0 : i32
    return %c0_i32, %c0_i32_0 : i32, i32
  }
  func.func @transform_7(%arg0: i32, %arg1: i32) -> (i32, i32) {
    %c0_i32 = arith.constant 0 : i32
    %c0_i32_0 = arith.constant 0 : i32
    %c0_i32_1 = arith.constant 0 : i32
    return %c0_i32, %c0_i32_0 : i32, i32
  }
  func.func @transform_8(%arg0: i32, %arg1: i32) -> (i32, i32) {
    %c0_i32 = arith.constant 0 : i32
    %c0_i32_0 = arith.constant 0 : i32
    %c0_i32_1 = arith.constant 0 : i32
    return %c0_i32, %c0_i32_0 : i32, i32
  }
  func.func @transform_9(%arg0: i32, %arg1: i32) -> (i32, i32) {
    %c0_i32 = arith.constant 0 : i32
    %c0_i32_0 = arith.constant 0 : i32
    %c0_i32_1 = arith.constant 0 : i32
    return %c0_i32, %c0_i32_0 : i32, i32
  }
  func.func @transform_10(%arg0: i32, %arg1: i32) -> (i32, i32, i32) {
    %c0_i32 = arith.constant 0 : i32
    %c0_i32_0 = arith.constant 0 : i32
    %c0_i32_1 = arith.constant 0 : i32
    %c0_i32_2 = arith.constant 0 : i32
    return %c0_i32, %c0_i32_0, %c0_i32_1 : i32, i32, i32
  }
  func.func @transform_11(%arg0: i32, %arg1: i32) -> (i32, i32, i32) {
    %c0_i32 = arith.constant 0 : i32
    %c0_i32_0 = arith.constant 0 : i32
    %c0_i32_1 = arith.constant 0 : i32
    %c0_i32_2 = arith.constant 0 : i32
    return %c0_i32, %c0_i32_0, %c0_i32_1 : i32, i32, i32
  }
  func.func @transform_12(%arg0: i32, %arg1: i32) -> (i32, i32, i32) {
    %c0_i32 = arith.constant 0 : i32
    %c0_i32_0 = arith.constant 0 : i32
    %c0_i32_1 = arith.constant 0 : i32
    %c0_i32_2 = arith.constant 0 : i32
    return %c0_i32, %c0_i32_0, %c0_i32_1 : i32, i32, i32
  }
  func.func @transform_13(%arg0: i32, %arg1: i32) -> (i32, i32, i32) {
    %c0_i32 = arith.constant 0 : i32
    %c0_i32_0 = arith.constant 0 : i32
    %c0_i32_1 = arith.constant 0 : i32
    %c0_i32_2 = arith.constant 0 : i32
    return %c0_i32, %c0_i32_0, %c0_i32_1 : i32, i32, i32
  }
  func.func @transform_14(%arg0: i32, %arg1: i32) -> (i32, i32, i32) {
    %c0_i32 = arith.constant 0 : i32
    %c0_i32_0 = arith.constant 0 : i32
    %c0_i32_1 = arith.constant 0 : i32
    %c0_i32_2 = arith.constant 0 : i32
    return %c0_i32, %c0_i32_0, %c0_i32_1 : i32, i32, i32
  }
  func.func @transform_15(%arg0: i32, %arg1: i32) -> (i32, i32, i32) {
    %c0_i32 = arith.constant 0 : i32
    %c0_i32_0 = arith.constant 0 : i32
    %c0_i32_1 = arith.constant 0 : i32
    %c0_i32_2 = arith.constant 0 : i32
    return %c0_i32, %c0_i32_0, %c0_i32_1 : i32, i32, i32
  }
  func.func @transform_16(%arg0: i32, %arg1: i32) -> (i32, i32, i32) {
    %c0_i32 = arith.constant 0 : i32
    %c0_i32_0 = arith.constant 0 : i32
    %c0_i32_1 = arith.constant 0 : i32
    %c0_i32_2 = arith.constant 0 : i32
    return %c0_i32, %c0_i32_0, %c0_i32_1 : i32, i32, i32
  }
  func.func @transform_17(%arg0: i32, %arg1: i32) -> (i32, i32) {
    %c0_i32 = arith.constant 0 : i32
    %c0_i32_0 = arith.constant 0 : i32
    %c0_i32_1 = arith.constant 0 : i32
    return %c0_i32, %c0_i32_0 : i32, i32
  }
  func.func @transform_18(%arg0: i32, %arg1: i32) -> (i32, i32, i32) {
    %c0_i32 = arith.constant 0 : i32
    %c0_i32_0 = arith.constant 0 : i32
    %c0_i32_1 = arith.constant 0 : i32
    %c0_i32_2 = arith.constant 0 : i32
    return %c0_i32, %c0_i32_0, %c0_i32_1 : i32, i32, i32
  }
  func.func @transform_19(%arg0: i32, %arg1: i32) -> (i32, i32, i32) {
    %c0_i32 = arith.constant 0 : i32
    %c0_i32_0 = arith.constant 0 : i32
    %c0_i32_1 = arith.constant 0 : i32
    %c0_i32_2 = arith.constant 0 : i32
    return %c0_i32, %c0_i32_0, %c0_i32_1 : i32, i32, i32
  }
  func.func @transform_20(%arg0: i32, %arg1: i32) -> (i32, i32, i32) {
    %c0_i32 = arith.constant 0 : i32
    %c0_i32_0 = arith.constant 0 : i32
    %c0_i32_1 = arith.constant 0 : i32
    %c0_i32_2 = arith.constant 0 : i32
    return %c0_i32, %c0_i32_0, %c0_i32_1 : i32, i32, i32
  }
  func.func @transform_21(%arg0: i32, %arg1: i32) -> (i32, i32, i32) {
    %c0_i32 = arith.constant 0 : i32
    %c0_i32_0 = arith.constant 0 : i32
    %c0_i32_1 = arith.constant 0 : i32
    %c0_i32_2 = arith.constant 0 : i32
    return %c0_i32, %c0_i32_0, %c0_i32_1 : i32, i32, i32
  }
  func.func @transform_22(%arg0: i32, %arg1: i32) -> (i32, i32, i32) {
    %c0_i32 = arith.constant 0 : i32
    %c0_i32_0 = arith.constant 0 : i32
    %c0_i32_1 = arith.constant 0 : i32
    %c0_i32_2 = arith.constant 0 : i32
    return %c0_i32, %c0_i32_0, %c0_i32_1 : i32, i32, i32
  }
  func.func @transform_23(%arg0: i32, %arg1: i32) -> (i32, i32, i32) {
    %c0_i32 = arith.constant 0 : i32
    %c0_i32_0 = arith.constant 0 : i32
    %c0_i32_1 = arith.constant 0 : i32
    %c0_i32_2 = arith.constant 0 : i32
    return %c0_i32, %c0_i32_0, %c0_i32_1 : i32, i32, i32
  }
  func.func @transform_24(%arg0: i32, %arg1: i32) -> (i32, i32, i32) {
    %c0_i32 = arith.constant 0 : i32
    %c0_i32_0 = arith.constant 0 : i32
    %c0_i32_1 = arith.constant 0 : i32
    %c0_i32_2 = arith.constant 0 : i32
    return %c0_i32, %c0_i32_0, %c0_i32_1 : i32, i32, i32
  }
  func.func @transform_25(%arg0: i32, %arg1: i32) -> (i32, i32) {
    %c0_i32 = arith.constant 0 : i32
    %c0_i32_0 = arith.constant 0 : i32
    %c0_i32_1 = arith.constant 0 : i32
    return %c0_i32, %c0_i32_0 : i32, i32
  }
  func.func @transform_26(%arg0: i32, %arg1: i32) -> (i32, i32) {
    %c0_i32 = arith.constant 0 : i32
    %c0_i32_0 = arith.constant 0 : i32
    %c0_i32_1 = arith.constant 0 : i32
    return %c0_i32, %c0_i32_0 : i32, i32
  }
  func.func @transform_27(%arg0: i32, %arg1: i32) -> (i32, i32) {
    %c0_i32 = arith.constant 0 : i32
    %c0_i32_0 = arith.constant 0 : i32
    %c0_i32_1 = arith.constant 0 : i32
    return %c0_i32, %c0_i32_0 : i32, i32
  }
  func.func @transform_28(%arg0: i32, %arg1: i32) -> (i32, i32) {
    %c0_i32 = arith.constant 0 : i32
    %c0_i32_0 = arith.constant 0 : i32
    %c0_i32_1 = arith.constant 0 : i32
    return %c0_i32, %c0_i32_0 : i32, i32
  }
  func.func @transform_29(%arg0: i32, %arg1: i32) -> (i32, i32) {
    %c0_i32 = arith.constant 0 : i32
    %c0_i32_0 = arith.constant 0 : i32
    %c0_i32_1 = arith.constant 0 : i32
    return %c0_i32, %c0_i32_0 : i32, i32
  }
  func.func @transform_30(%arg0: i32, %arg1: i32) -> (i32, i32, i32) {
    %c0_i32 = arith.constant 0 : i32
    %c0_i32_0 = arith.constant 0 : i32
    return %arg0, %arg1, %c0_i32 : i32, i32, i32
  }
}

</mosaic_0001>

<bundles_post_ra>
// kernel: tpu_custom_call.1
= control target key start
LH: loop header
LB: loop body
LE: loop exit
PB: predicated region body
PF: predicated region fallthrough
CT: control target
= control target key end

     0   :  { %s6721_s6 = smov 1   ;;  %s6722_s10 = smov 2   ;;  %s7522_s0 = inlined_call_operand.smem [shape: u32[31], index: -1, kind: input, shape index: {}] }
   0x1   :  { %s6763_s5 = sld [smem:[%s7522_s0]]   ;;  %s6723_s14 = smov 3  }
   0x2   :  { %s6768_s9 = sld [smem:[%s7522_s0 + %s6721_s6]]   ;;  %s6724_s18 = smov 4  }
   0x3   :  { %s6773_s13 = sld [smem:[%s7522_s0 + %s6722_s10]]   ;;  %s6725_s22 = smov 5  }
   0x4   :  { %s6778_s17 = sld [smem:[%s7522_s0 + %s6723_s14]]   ;;  %s6726_s26 = smov 6  }
   0x5   :  { %s6783_s21 = sld [smem:[%s7522_s0 + %s6724_s18]]   ;;  %s6727_s30 = smov 7  }
   0x6   :  { %s6788_s25 = sld [smem:[%s7522_s0 + %s6725_s22]]   ;;  %s6728_s4 = smov 8  }
   0x7   :  { %7539 = sst [smem:[#allocation5_spill]] %s6763_s5  ;;  %s6729_s10 = smov 9  }
   0x8   :  { %7540 = sst [smem:[#allocation6_spill]] %s6768_s9  ;;  %s6730_s15 = smov 10  }
   0x9   :  { %s6793_s29 = sld [smem:[%s7522_s0 + %s6726_s26]]   ;;  %s6731_s20 = smov 11  }
   0xa   :  { %7541 = sst [smem:[#allocation7_spill]] %s6778_s17  ;;  %s6732_s26 = smov 12  }
   0xb   :  { %s6798_s3 = sld [smem:[%s7522_s0 + %s6727_s30]]   ;;  %s6733_s1 = smov 13  }
   0xc   :  { %s6803_s8 = sld [smem:[%s7522_s0 + %s6728_s4]]   ;;  %s6734_s7 = smov 14  }
   0xd   :  { %s6808_s14 = sld [smem:[%s7522_s0 + %s6729_s10]]   ;;  %s6736_s22 = smov 16  }
   0xe   :  { %s6813_s19 = sld [smem:[%s7522_s0 + %s6730_s15]]   ;;  %s6735_s15 = smov 15  }
   0xf   :  { %7542 = sst [smem:[#allocation8_spill]] %s6793_s29  ;;  %s6737_s28 = smov 17  }
  0x10   :  { %s6818_s24 = sld [smem:[%s7522_s0 + %s6731_s20]]  }
  0x11   :  { %7543 = sst [smem:[#allocation9_spill]] %s6798_s3 }
  0x12   :  { %7544 = sst [smem:[#allocation10_spill]] %s6803_s8 }
  0x13   :  { %7545 = sst [smem:[#allocation11_spill]] %s6808_s14 }
  0x14   :  { %s6823_s30 = sld [smem:[%s7522_s0 + %s6732_s26]]  }
  0x15   :  { %s6828_s6 = sld [smem:[%s7522_s0 + %s6733_s1]]  }
  0x16   :  { %s6833_s12 = sld [smem:[%s7522_s0 + %s6734_s7]]   ;;  %s6738_s7 = smov 18  }
  0x17   :  { %s6838_s20 = sld [smem:[%s7522_s0 + %s6735_s15]]   ;;  %s6739_s15 = smov 19  }
  0x18   :  { %s6843_s27 = sld [smem:[%s7522_s0 + %s6736_s22]]   ;;  %s6740_s22 = smov 20  }
  0x19   :  { %s6848_s4 = sld [smem:[%s7522_s0 + %s6737_s28]]   ;;  %s6741_s28 = smov 21  }
  0x1a   :  { %s6853_s14 = sld [smem:[%s7522_s0 + %s6738_s7]]   ;;  %s6742_s7 = smov 22  }
  0x1b   :  { %7546 = sst [smem:[#allocation12_spill]] %s6828_s6 }
  0x1c   :  { %s6858_s8 = sld [smem:[%s7522_s0 + %s6739_s15]]   ;;  %s6743_s15 = smov 23  }
  0x1d   :  { %s6863_s17 = sld [smem:[%s7522_s0 + %s6740_s22]]   ;;  %s6744_s22 = smov 24  }
  0x1e   :  { %s6868_s3 = sld [smem:[%s7522_s0 + %s6741_s28]]   ;;  %s6745_s28 = smov 25  }
  0x1f   :  { %7547 = sst [smem:[#allocation13_spill]] %s6848_s4 }
  0x20   :  { %7548 = sst [smem:[#allocation14_spill]] %s6853_s14 }
  0x21   :  { %s6873_s29 = sld [smem:[%s7522_s0 + %s6742_s7]]   ;;  %s6746_s7 = smov 26  }
  0x22   :  { %7549 = sst [smem:[#allocation15_spill]] %s6858_s8 }
  0x23   :  { %s6878_s8 = sld [smem:[%s7522_s0 + %s6743_s15]]   ;;  %s6747_s15 = smov 27  }
  0x24   :  { %7550 = sst [smem:[#allocation16_spill]] %s6868_s3 }
  0x25   :  { %s6883_s14 = sld [smem:[%s7522_s0 + %s6744_s22]]   ;;  %s6748_s22 = smov 28  }
  0x26   :  { %s6888_s3 = sld [smem:[%s7522_s0 + %s6745_s28]]   ;;  %s6749_s28 = smov 29  }
  0x27   :  { %7551 = sst [smem:[#allocation17_spill]] %s6873_s29 }
  0x28   :  { %s6893_s29 = sld [smem:[%s7522_s0 + %s6746_s7]]   ;;  %s6750_s7 = smov 30  }
  0x29   :  { %7552 = sst [smem:[#allocation18_spill]] %s6878_s8 }
  0x2a   :  { %s6898_s8 = sld [smem:[%s7522_s0 + %s6747_s15]]  }
  0x2b   :  { %7553 = sst [smem:[#allocation19_spill]] %s6883_s14 }
  0x2c   :  { %7554 = sst [smem:[#allocation20_spill]] %s6888_s3 }
  0x2d   :  { %s6903_s14 = sld [smem:[%s7522_s0 + %s6748_s22]]  }
  0x2e   :  { %7555 = sst [smem:[#allocation21_spill]] %s6893_s29 }
  0x2f   :  { %s6908_s3 = sld [smem:[%s7522_s0 + %s6749_s28]]  }
  0x30   :  { %7556 = sst [smem:[#allocation22_spill]] %s6898_s8 }
  0x31   :  { %s6913_s29 = sld [smem:[%s7522_s0 + %s6750_s7]]  }
  0x35   :  { %7557 = sst [smem:[#allocation23_spill]] %s6908_s3 }
  0x37   :  { %7558 = sst [smem:[#allocation24_spill]] %s6913_s29 }
  0x38   :  { %66 = vsyncpa [#allocation3], 0 }
  0x39   :  { %68 = vsyncpa [#allocation3 + $0x1], 0  ;;  %s6915_s15 = smov 0   ;;  %s6917_s16 = smov 0  }
  0x3a   :  { %s6919_s18 = smov 0   ;;  %s6921_s22 = smov 0  }
  0x3b   :  { %s6923_s23 = smov 0   ;;  %s6925_s26 = smov 0  }
  0x3c LB: > { %s7559_s6 = sld [smem:[#allocation12_spill]]  ;;  %s5455_s0 = sadd.s32 4294967295, %s6719_s26   ;;  %s6699_s15 = sphi %s6915_s15, %s7583_s15   ;;  %s6719_s26 = sphi %s6925_s26, %s74_s26   ;;  %s6715_s23 = sphi %s6923_s23, %s7587_s23   ;;  %s6711_s22 = sphi %s6921_s22, %s7586_s22   ;;  %s6707_s18 = sphi %s6919_s18, %s7585_s18   ;;  %s6703_s16 = sphi %s6917_s16, %s7584_s16  }
  0x3d   : > { %s5456_s28 = sadd.s32 4294967294, %s6719_s26   ;;  %s86_s1 = sadd.s32 1, %s6715_s23 }
  0x3e   : > { %s749_s2 = sadd.s32 1, %s6707_s18  ;;  %p88_p0 = scmp.ge.s32.totalorder %s86_s1, 2 }
  0x3f   : > { %p759_p1 = scmp.ne.s32.totalorder %s6707_s18, %s6703_s16  ;;  %p760_p2 = scmp.eq.s32.totalorder %s5455_s0, 1 }
  0x40   : > { %p765_p3 = scmp.ne.s32.totalorder %s6703_s16, %s6699_s15  ;;  %s7589_s1 = smov (%p88_p0, %s86_s1), 0 }
  0x41   : > { %p6955_p4 = por %p760_p2, %p759_p1  ;;  %p766_p5 = scmp.eq.s32.totalorder %s5456_s28, 1 }
  0x42   : > { %s744_s10 = ssub.s32 %s6715_s23, %s7589_s1  ;;  %p5459_p6 = scmp.ge.s32.totalorder %s6719_s26, 1 }
  0x43   : > { %p747_p7 = scmp.eq.s32.totalorder %s744_s10, 0  ;;  %p6962_p8 = por %p766_p5, %p765_p3 }
  0x44   : > { %p897_p9 = scmp.lt.s32.totalorder %s6719_s26, 3 }
  0x45   : > { %s6968_s29 = scalar_select %p747_p7, %s6707_s18, %s749_s2  }
  0x46   : > { %p898_p10 = pnand %p5459_p6, %p897_p9 }
  0x47   : > { %s7562_s5 = sld [smem:[#allocation5_spill]] (!%p898_p10)  ;;  %p993_p11 = scmp.lt.s32.totalorder (!%p898_p10), %s6711_s22, 1  ;;  %vm1026_vm0 = vcmask (!%p898_p10), 261120   ;;  %v1169_v12 = vld [vmem:[%s6823_s30] sm:$0xff] (!%p898_p10)  ;;  %v1170_v13 = vld [vmem:[%s6823_s30 + $0x8] sm:$0xff] (!%p898_p10)  ;;  %v6751_v15 = vmov (!%p898_p10), 0.0|0.0  }
  0x48   : > { %901 = sbr.rel (%p898_p10) target bundleno = 9252 (0x2424), region = 140  ;;  %v6306_v14 = vpack.c.bf16 (!%p898_p10), %v1170_v13, %v1169_v12  ;;  %6305 = vmatprep.subr.bf16.mxu1 (!%p898_p10), %v6751_v15  ;;  %6299 = vmatprep.subr.bf16.mxu0 (!%p898_p10), %v6751_v15  ;;  %v1085_v16 = vld [vmem:[%s6813_s19] sm:$0xff] (!%p898_p10)  ;;  %v1086_v17 = vld [vmem:[%s6813_s19 + $0x8] sm:$0xff] (!%p898_p10)  ;;  %v1171_v19 = vld [vmem:[%s6823_s30 + $0x10] sm:$0xff] (!%p898_p10)  ;;  %vm6752_vm1 = vmmov (!%p898_p10), 0   ;;  %v6753_v23 = vmov (!%p898_p10), 0.0  }
  0x49   : > { %v6300_v18 = vpack.c.bf16 (!%p898_p10), %v1086_v17, %v1085_v16  ;;  %v1172_v20 = vld [vmem:[%s6823_s30 + $0x18] sm:$0xff] (!%p898_p10)  ;;  %v1087_v21 = vld [vmem:[%s6813_s19 + $0x10] sm:$0xff] (!%p898_p10)  ;;  %5888 = vmatprep.mubr.msk.f32.mxu1 (!%p898_p10), %vm6752_vm1, %v6753_v23  ;;  %5877 = vmatprep.mubr.msk.f32.mxu0 (!%p898_p10), %vm6752_vm1, %v6753_v23  ;;  %v5466_v43 = vld [vmem:[%s6783_s21] ss:$0 sm:$0xff] (!%p898_p10)  ;;  %vm1334_vm6 = vcmask (!%p898_p10), 64512   ;;  %s7563_s9 = sld [smem:[#allocation6_spill]] (!%p898_p10) }
  0x4a   : > { %6307 = vmatpush3.bf16.msra.mxu1 (!%p898_p10), %v6306_v14  ;;  %v6309_v22 = vpack.c.bf16 (!%p898_p10), %v1172_v20, %v1171_v19  ;;  %v1088_v24 = vld [vmem:[%s6813_s19 + $0x18] sm:$0xff] (!%p898_p10)  ;;  %v5467_v45 = vld [vmem:[%s6788_s25] ss:$0 sm:$0xff] (!%p898_p10)  ;;  %v1254_v51 = vld [vmem:[%s6833_s12 + $0x8] sm:$0xff] (!%p898_p10)  ;;  %s7564_s4 = sld [smem:[#allocation13_spill]] (!%p898_p10)  ;;  %vm3419_vm10 = vcmask (!%p898_p10), 130048  }
  0x4b   : > { %6308 = vmatprep.subr.bf16.mxu1 (!%p898_p10), %v6751_v15  ;;  %6301 = vmatpush3.bf16.msra.mxu0 (!%p898_p10), %v6300_v18  ;;  %v6303_v25 = vpack.c.bf16 (!%p898_p10), %v1088_v24, %v1087_v21  ;;  %v1253_v50 = vld [vmem:[%s6833_s12] sm:$0xff] (!%p898_p10)  ;;  %v1255_v55 = vld [vmem:[%s6833_s12 + $0x10] sm:$0xff] (!%p898_p10)  ;;  %v1256_v56 = vld [vmem:[%s6833_s12 + $0x18] sm:$0xff] (!%p898_p10)  ;;  %s7580_s8 = sld [smem:[#allocation22_spill]] (!%p898_p10)  ;;  %s7581_s3 = sld [smem:[#allocation23_spill]] (!%p898_p10)  ;;  %vm5222_vm13 = vcmask (!%p898_p10), 523264  }
  0x4c   : > { %6302 = vmatprep.subr.bf16.mxu0 (!%p898_p10), %v6751_v15  ;;  %v6312_v53 = vpack.c.bf16 (!%p898_p10), %v1254_v51, %v1253_v50  ;;  %v6315_v57 = vpack.c.bf16 (!%p898_p10), %v1256_v56, %v1255_v55  ;;  %v5470_v58 = vld [vmem:[%s7559_s6] ss:$0 sm:$0xff] (!%p898_p10)  ;;  %v5478_v63 = vld [vmem:[%s6813_s19 + $0x28] sm:$0xff] (!%p898_p10)  ;;  %v5493_v17 = vld [vmem:[%s6833_s12 + $0x30] sm:$0xff] (!%p898_p10) }
  0x4d   : > { %v5477_v62 = vld [vmem:[%s6813_s19 + $0x20] sm:$0xff] (!%p898_p10)  ;;  %v5494_v18 = vld [vmem:[%s6833_s12 + $0x38] sm:$0xff] (!%p898_p10)  ;;  %vm7258_vm9 = vmpackc.low (!%p898_p10), %vm1334_vm6, %vm1334_vm6 }
  0x4e   : > { %6310 = vmatpush3.bf16.msra.mxu1 (!%p898_p10), %v6309_v22  ;;  %v6333_v19 = vpack.c.bf16 (!%p898_p10), %v5494_v18, %v5493_v17  ;;  %v5482_v50 = vld [vmem:[%s6818_s24 + $0x1] ss:$0 sm:$0xff] (!%p898_p10)  ;;  %v5505_v17 = vld [vmem:[%s6813_s19 + $0x48] sm:$0xff] (!%p898_p10) }
  0x4f   : > { %s6972_s0 = scalar_select %p993_p11, %s6711_s22, 1  ;;  %5907 = vmatprep.subr.mxu1 %v6753_v23  ;;  %6304 = vmatpush3.bf16.msra.mxu0 %v6303_v25 }
  0x50   : > { %6311 = vmatprep.subr.bf16.mxu0 %v6751_v15 }
  0x51   : > { %s6975_s28 = sshll.u32 %s6972_s0, 3 }
  0x52   : > { %s996_s10 = scalar_lea.vmem %s7562_s5, %s6975_s28  ;;  %s1008_s2 = scalar_lea.vmem %s6773_s13, %s6975_s28 }
  0x53   : > { %v6979_v0 = vld [vmem:[%s996_s10] sm:$0xff]  ;;  %s5670_s10 = sshll.u32 %s6972_s0, 4  ;;  %s7565_s0 = sld [smem:[#allocation14_spill]] }
  0x54   : > { %v1027_v1 = vsel %vm1026_vm0, %v6979_v0, 0.0  ;;  %v7070_v21 = vld [vmem:[%s1008_s2] sm:$0xff]  ;;  %s7214_s2 = scalar_lea.vmem %s7563_s9, %s5670_s10  ;;  %s7566_s10 = sld [smem:[#allocation8_spill]] }
  0x55   : > { %1028 = vadd.xlane.f32.xlu0 %v1027_v1  ;;  %s7569_s5 = sld [smem:[#allocation15_spill]]  ;;  %s7574_s9 = sld [smem:[#allocation18_spill]] }
  0x59   : > { %1064 = vadd.xlane.f32.xlu0 %v1027_v1  ;;  %v5468_v1 = vld [vmem:[%s6818_s24] ss:$0 sm:$0xff] }
  0xe2   : > { %v1029_v2 = vpop.xlane.xlu0 %1028 }
  0xe3   : > { %v1031_v3 = vmul.f32 0.03125, %v1029_v2 }
  0xe5   : > { %v6984_v4 = vsub.f32 %v6979_v0, %v1031_v3  ;;  %v6318_v3 = vpack.c.bf16 %v5478_v63, %v5477_v62 }
  0xe6   : > { %v1065_v5 = vpop.xlane.xlu0 %1064 }
  0xe7   : > { %v1066_v6 = vmul.f32 0.03125, %v1065_v5  ;;  %v1033_v7 = vmul.f32 %v6984_v4, %v6984_v4 }
  0xe9   : > { %v6989_v8 = vsub.f32 %v6979_v0, %v1066_v6  ;;  %v1034_v9 = vsel %vm1026_vm0, %v1033_v7, 0.0  ;;  %v5479_v6 = vld [vmem:[%s6813_s19 + $0x30] sm:$0xff]  ;;  %v5480_v7 = vld [vmem:[%s6813_s19 + $0x38] sm:$0xff] }
  0xea   : > { %1035 = vadd.xlane.f32.xlu1 %v1034_v9  ;;  %v5491_v9 = vld [vmem:[%s6833_s12 + $0x20] sm:$0xff] }
  0xeb   : > { %v1068_v10 = vmul.f32 %v6989_v8, %v6989_v8 }
  0xed   : > { %v1069_v11 = vsel %vm1026_vm0, %v1068_v10, 0.0  ;;  %v5492_v10 = vld [vmem:[%s6833_s12 + $0x28] sm:$0xff] }
  0xee   : > { %1070 = vadd.xlane.f32.xlu1 %v1069_v11  ;;  %v5472_v11 = vld [vmem:[%s6838_s20] ss:$0 sm:$0xff]  ;;  %v6330_v13 = vpack.c.bf16 %v5492_v10, %v5491_v9  ;;  %v5512_v10 = vld [vmem:[%s6823_s30 + $0x48] sm:$0xff] }
  0xef   : > { %v5511_v9 = vld [vmem:[%s6823_s30 + $0x40] sm:$0xff] }
 0x177   : > { %v1036_v26 = vpop.xlane.xlu1 %1035 }
 0x178   : > { %v1038_v27 = vmul.f32 0.032258064, %v1036_v26 }
 0x17a   : > { %6593 = vrsqrt.f32 %v1038_v27  ;;  %vm1041_vm2 = vcmp.eq.f32.partialorder %v1038_v27, inf  ;;  %v1044_v32 = vand.u32 2147483648, %v1038_v27  ;;  %vm1043_vm3 = vcmp.eq.f32.partialorder %v1038_v27, 0.0 }
 0x17b   : > { %v1071_v28 = vpop.xlane.xlu1 %1070 }
 0x17c   : > { %v1072_v29 = vmul.f32 0.032258064, %v1071_v28 }
 0x17e   : > { %6595 = vrsqrt.f32 %v1072_v29  ;;  %vm1075_vm4 = vcmp.eq.f32.partialorder %v1072_v29, inf  ;;  %v1078_v38 = vand.u32 2147483648, %v1072_v29  ;;  %vm1077_vm5 = vcmp.eq.f32.partialorder %v1072_v29, 0.0 }
 0x184   : > { %v6594_v30 = vpop.eup %6593 }
 0x185   : > { %v1040_v31 = vmul.f32 %v6594_v30, %v1038_v27 }
 0x187   : > { %v1042_v33 = vsel %vm1041_vm2, %v1038_v27, %v1040_v31 }
 0x188   : > { %v6596_v34 = vpop.eup %6595  ;;  %v1045_v35 = vsel %vm1043_vm3, %v1044_v32, %v1042_v33 }
 0x189   : > { %v1046_v36 = vadd.f32 1e-06, %v1045_v35  ;;  %v1074_v37 = vmul.f32 %v6596_v34, %v1072_v29 }
 0x18b   : > { %6597 = vrcp.f32 %v1046_v36  ;;  %v1076_v39 = vsel %vm1075_vm4, %v1072_v29, %v1074_v37  ;;  %v5484_v37 = vld [vmem:[%s6823_s30 + $0x20] sm:$0xff] }
 0x18c   : > { %v1079_v40 = vsel %vm1077_vm5, %v1078_v38, %v1076_v39  ;;  %v5485_v38 = vld [vmem:[%s6823_s30 + $0x28] sm:$0xff] }
 0x18d   : > { %v1080_v41 = vadd.f32 1e-06, %v1079_v40  ;;  %v6324_v40 = vpack.c.bf16 %v5485_v38, %v5484_v37 }
 0x18f   : > { %6599 = vrcp.f32 %v1080_v41 }
 0x195   : > { %v6598_v42 = vpop.eup %6597 }
 0x196   : > { %v1048_v44 = vmul.f32 %v6598_v42, %v6984_v4  ;;  %v5486_v42 = vld [vmem:[%s6823_s30 + $0x30] sm:$0xff] }
 0x198   : > { %v1055_v46 = vmul.f32 %v5466_v43, %v1048_v44 }
 0x199   : > { %v6600_v47 = vpop.eup %6599 }
 0x19a   : > { %v7016_v48 = vadd.f32 %v5467_v45, %v1055_v46  ;;  %v1082_v49 = vmul.f32 %v6600_v47, %v6989_v8  ;;  %v6321_v8 = vpack.c.bf16 %v5480_v7, %v5479_v6  ;;  %v5489_v47 = vld [vmem:[%s7559_s6 + $0x1] ss:$0 sm:$0xff] }
 0x19c   : > { %5889 = vmatmul.mubr.msk.f32.vlgmr.msra.gmra.mrb[0].mxu1 %vm1026_vm0, %v7016_v48  ;;  %v1083_v52 = vmul.f32 %v5466_v43, %v1082_v49  ;;  %v5487_v43 = vld [vmem:[%s6823_s30 + $0x38] sm:$0xff] }
 0x19d   : > { %5909 = vmatprep.mubr.msk.f32.mxu1 %vm6752_vm1, %v6753_v23  ;;  %v6327_v44 = vpack.c.bf16 %v5487_v43, %v5486_v42 }
 0x19e   : > { %v7025_v54 = vadd.f32 %v5467_v45, %v1083_v52 }
 0x1a0   : > { %5878 = vmatmul.mubr.msk.f32.vlgmr.msra.gmra.mrb[0].mxu0 %vm1026_vm0, %v7025_v54 }
 0x1a1   : > { %6313 = vmatpush3.bf16.msra.mxu0 %v6312_v53  ;;  %5899 = vmatprep.mubr.msk.f32.mxu0 %vm6752_vm1, %v6753_v23  ;;  %v5496_v53 = vld [vmem:[%s6838_s20 + $0x1] ss:$0 sm:$0xff] }
 0x1a2   : > { %6314 = vmatprep.subr.bf16.mxu0 %v6751_v15 }
 0x1a5   : > { %6316 = vmatpush3.bf16.msra.mxu0 %v6315_v57 }
 0x1a6   : > { %5902 = vmatprep.subr.mxu0 %v6753_v23 }
 0x1a8   : > { %5900 = vmatmul.mubr.msk.f32.vlgmr.msra.gmra.mrb[2].mxu0 %vm1026_vm0, %v7016_v48 }
 0x1a9   : > { %5904 = vmatprep.mubr.msk.f32.mxu0 %vm6752_vm1, %v6753_v23 }
 0x26f   : > { %v1249_v59 = vpop.f32.mrb[0].mxu1 }
 0x270   : > { %v1250_v60 = vadd.f32 %v5470_v58, %v1249_v59  ;;  %v5890_v61 = vpop.f32.mrb[1].mxu1 }
 0x272   : > { %5903 = vmatpush3.xpose.msk.msra.mxu0 %vm1334_vm6, %v1250_v60 }
 0x273   : > { %v1165_v2 = vpop.f32.mrb[0].mxu0  ;;  %6317 = vmatprep.subr.bf16.mxu0 %v6751_v15 }
 0x274   : > { %v1166_v4 = vadd.f32 %v5468_v1, %v1165_v2  ;;  %v5879_v5 = vpop.f32.mrb[1].mxu0 }
 0x276   : > { %5905 = vmatmul.mubr.msk.f32.vlgmr.msra.gmra.mrb[4].mxu0 %vm1334_vm6, %v1166_v4  ;;  %v5501_v4 = vld [vmem:[%s6843_s27 + $0x8] sm:$0xff] }
 0x277   : > { %6319 = vmatpush3.bf16.msra.mxu0 %v6318_v3  ;;  %5920 = vmatprep.mubr.msk.f32.mxu0 %vm6752_vm1, %v6753_v23 }
 0x278   : > { %6320 = vmatprep.subr.bf16.mxu0 %v6751_v15 }
 0x27b   : > { %v1330_v12 = vpop.f32.mrb[2].mxu0  ;;  %6322 = vmatpush3.bf16.msra.mxu0 %v6321_v8  ;;  %v1497_v8 = vld [vmem:[%s6843_s27] sm:$0xff] }
 0x27c   : > { %v1331_v14 = vadd.f32 %v5472_v11, %v1330_v12  ;;  %v5901_v16 = vpop.f32.mrb[3].mxu0  ;;  %6329 = vmatprep.subr.bf16.mxu0 %v6751_v15  ;;  %v6342_v11 = vpack.c.bf16 %v5512_v10, %v5511_v9  ;;  %v5513_v12 = vld [vmem:[%s6823_s30 + $0x50] sm:$0xff]  ;;  %v5545_v9 = vld [vmem:[%s6833_s12 + $0x68] sm:$0xff] }
 0x27d   : > { %v5504_v16 = vld [vmem:[%s6813_s19 + $0x40] sm:$0xff] }
 0x27e   : > { %5908 = vmatpush3.msra.mxu1 %v1331_v14  ;;  %5921 = vmatmul.mubr.msk.f32.vlgmr.msra.gmra.mrb[6].mxu0 %vm1026_vm0, %v7025_v54  ;;  %v6336_v18 = vpack.c.bf16 %v5505_v17, %v5504_v16  ;;  %v5538_v16 = vld [vmem:[%s6823_s30 + $0x68] sm:$0xff] }
 0x27f   : > { %6331 = vmatpush3.bf16.msra.mxu0 %v6330_v13  ;;  %5942 = vmatprep.mubr.msk.f32.mxu0 %vm6752_vm1, %v6753_v23  ;;  %v5514_v13 = vld [vmem:[%s6823_s30 + $0x58] sm:$0xff] }
 0x280   : > { %6332 = vmatprep.subr.bf16.mxu0 %v6751_v15  ;;  %6323 = vmatprep.subr.bf16.mxu1 %v6751_v15  ;;  %v6345_v14 = vpack.c.bf16 %v5514_v13, %v5513_v12  ;;  %v5547_v12 = vld [vmem:[%s6833_s12 + $0x78] sm:$0xff] }
 0x283   : > { %6334 = vmatpush3.bf16.msra.mxu0 %v6333_v19  ;;  %v5506_v19 = vld [vmem:[%s6813_s19 + $0x50] sm:$0xff] }
 0x284   : > { %5955 = vmatprep.subr.mxu0 %v6753_v23 }
 0x286   : > { %5943 = vmatmul.mubr.msk.f32.vlgmr.msra.gmra.mrb[8].mxu0 %vm1026_vm0, %v7016_v48 }
 0x287   : > { %5957 = vmatprep.mubr.msk.f32.mxu0 %vm6752_vm1, %v6753_v23  ;;  %5956 = vmatpush3.msra.mxu0 %v5501_v4 }
 0x288   : > { %6335 = vmatprep.subr.bf16.mxu0 %v6751_v15 }
 0x349   : > { %v1407_v20 = vpop.f32.mrb[4].mxu0 }
 0x34a   : > { %v1411_v22 = vmul.f32 0.35355338, %v1407_v20  ;;  %v5906_v24 = vpop.f32.mrb[5].mxu0  ;;  %v5507_v20 = vld [vmem:[%s6813_s19 + $0x58] sm:$0xff] }
 0x34c   : > { %v1412_v25 = vadd.f32 %v1411_v22, %v7070_v21 }
 0x34e   : > { %v1413_v26 = vsel %vm1334_vm6, %v1412_v25, -inf }
 0x34f   : > { %1414 = vmax.xlane.f32.xlu0 %v1413_v26  ;;  %v5518_v26 = vld [vmem:[%s6833_s12 + $0x40] sm:$0xff] }
 0x351   : > { %v1577_v27 = vpop.f32.mrb[6].mxu0 }
 0x352   : > { %v5922_v28 = vpop.f32.mrb[7].mxu0  ;;  %v1578_v55 = vadd.f32 %v5482_v50, %v1577_v27  ;;  %v5519_v27 = vld [vmem:[%s6833_s12 + $0x48] sm:$0xff] }
 0x359   : > { %v1743_v29 = vpop.f32.mrb[8].mxu0 }
 0x35a   : > { %v5944_v30 = vpop.f32.mrb[9].mxu0  ;;  %v1744_v56 = vadd.f32 %v5496_v53, %v1743_v29 }
 0x35b   : > { %v6348_v30 = vpack.c.bf16 %v5519_v27, %v5518_v26 }
 0x3dc   : > { %v1415_v31 = vpop.xlane.xlu0 %1414 }
 0x3dd   : > { %v1416_v32 = vsub.f32 %v1412_v25, %v1415_v31  ;;  %v6339_v25 = vpack.c.bf16 %v5507_v20, %v5506_v19  ;;  %v5520_v31 = vld [vmem:[%s6833_s12 + $0x50] sm:$0xff] }
 0x3df   : > { %v1417_v33 = vmul.f32 1.442695, %v1416_v32  ;;  %v5521_v32 = vld [vmem:[%s6833_s12 + $0x58] sm:$0xff] }
 0x3e1   : > { %6601 = vpow2.f32 %v1417_v33  ;;  %v5516_v33 = vld [vmem:[%s7559_s6 + $0x2] ss:$0 sm:$0xff] }
 0x3eb   : > { %v6602_v34 = vpop.eup %6601 }
 0x3ec   : > { %v1419_v35 = vsel %vm1334_vm6, %v6602_v34, 0.0 }
 0x3ed   : > { %1420 = vadd.xlane.f32.xlu1 %v1419_v35 }
 0x47a   : > { %v1421_v36 = vpop.xlane.xlu1 %1420 }
 0x47b   : > { %6603 = vrcp.f32 %v1421_v36 }
 0x485   : > { %v6604_v39 = vpop.eup %6603 }
 0x486   : > { %v1423_v41 = vmul.f32 %v6604_v39, %v6602_v34  ;;  %v6351_v34 = vpack.c.bf16 %v5521_v32, %v5520_v31  ;;  %v5542_v31 = vld [vmem:[%s7559_s6 + $0x3] ss:$0 sm:$0xff] }
 0x488   : > { %5910 = vmatmul.mubr.msk.f32.vlgmr.msra.gmra.mrb[2].mxu1 %vm1334_vm6, %v1423_v41  ;;  %v5509_v41 = vld [vmem:[%s6818_s24 + $0x2] ss:$0 sm:$0xff] }
 0x489   : > { %6325 = vmatpush3.bf16.msra.mxu1 %v6324_v40  ;;  %5931 = vmatprep.mubr.msk.f32.mxu1 %vm6752_vm1, %v6753_v23 }
 0x48a   : > { %6326 = vmatprep.subr.bf16.mxu1 %v6751_v15 }
 0x48d   : > { %6328 = vmatpush3.bf16.msra.mxu1 %v6327_v44 }
 0x48e   : > { %5945 = vmatprep.subr.mxu1 %v6753_v23 }
 0x490   : > { %5932 = vmatmul.mubr.msk.f32.vlgmr.msra.gmra.mrb[4].mxu1 %vm1026_vm0, %v7016_v48 }
 0x491   : > { %5947 = vmatprep.mubr.msk.f32.mxu1 %vm6752_vm1, %v6753_v23 }
 0x55b   : > { %v1493_v45 = vpop.f32.mrb[2].mxu1 }
 0x55c   : > { %v5911_v46 = vpop.f32.mrb[3].mxu1 }
 0x563   : > { %v1660_v49 = vpop.f32.mrb[4].mxu1 }
 0x564   : > { %v1661_v51 = vadd.f32 %v5489_v47, %v1660_v49  ;;  %v5933_v52 = vpop.f32.mrb[5].mxu1 }
 0x566   : > { %5946 = vmatpush3.xpose.msk.msra.mxu1 %vm1334_vm6, %v1661_v51 }
 0x567   : > { %5950 = vmatprep.subr.mxu1 %v6753_v23 }
 0x569   : > { %5948 = vmatmul.mubr.msk.f32.vlgmr.msra.gmra.mrb[6].mxu1 %vm1334_vm6, %v1578_v55 }
 0x56a   : > { %5951 = vmatpush3.msra.mxu1 %v1744_v56  ;;  %5952 = vmatprep.mubr.msk.f32.mxu1 %vm6752_vm1, %v6753_v23 }
 0x56b   : > { %5960 = vmatprep.subr.mxu1 %v6753_v23 }
 0x63c   : > { %v1819_v57 = vpop.f32.mrb[6].mxu1 }
 0x63d   : > { %v1823_v58 = vmul.f32 0.35355338, %v1819_v57  ;;  %v5949_v59 = vpop.f32.mrb[7].mxu1 }
 0x63f   : > { %v1824_v60 = vadd.f32 %v1823_v58, %v7070_v21 }
 0x641   : > { %v1825_v61 = vsel %vm1334_vm6, %v1824_v60, -inf }
 0x642   : > { %1826 = vmax.xlane.f32.xlu0 %v1825_v61  ;;  %v5528_v61 = vld [vmem:[%s6843_s27 + $0x10] sm:$0xff] }
 0x6cf   : > { %v1827_v62 = vpop.xlane.xlu0 %1826 }
 0x6d0   : > { %v1828_v63 = vsub.f32 %v1824_v60, %v1827_v62 }
 0x6d2   : > { %v1829_v1 = vmul.f32 1.442695, %v1828_v63  ;;  %v5530_v63 = vld [vmem:[%s6813_s19 + $0x60] sm:$0xff] }
 0x6d4   : > { %6605 = vpow2.f32 %v1829_v1  ;;  %v5531_v1 = vld [vmem:[%s6813_s19 + $0x68] sm:$0xff] }
 0x6de   : > { %v6606_v2 = vpop.eup %6605 }
 0x6df   : > { %v1831_v3 = vsel %vm1334_vm6, %v6606_v2, 0.0 }
 0x6e0   : > { %1832 = vadd.xlane.f32.xlu1 %v1831_v3  ;;  %v6354_v3 = vpack.c.bf16 %v5531_v1, %v5530_v63 }
 0x76d   : > { %v1833_v5 = vpop.xlane.xlu1 %1832 }
 0x76e   : > { %6607 = vrcp.f32 %v1833_v5  ;;  %v5532_v5 = vld [vmem:[%s6813_s19 + $0x70] sm:$0xff] }
 0x778   : > { %v6608_v6 = vpop.eup %6607 }
 0x779   : > { %v1835_v7 = vmul.f32 %v6608_v6, %v6606_v2  ;;  %v5533_v6 = vld [vmem:[%s6813_s19 + $0x78] sm:$0xff] }
 0x77b   : > { %5953 = vmatmul.mubr.msk.f32.vlgmr.msra.gmra.mrb[8].mxu1 %vm1334_vm6, %v1835_v7  ;;  %v6357_v7 = vpack.c.bf16 %v5533_v6, %v5532_v5  ;;  %v3160_v5 = vld [vmem:[%s6863_s17] sm:$0xff] }
 0x77c   : > { %5961 = vmatpush3.msra.mxu1 %v1497_v8  ;;  %5962 = vmatprep.mubr.msk.f32.mxu1 %vm6752_vm1, %v6753_v23  ;;  %v5544_v8 = vld [vmem:[%s6833_s12 + $0x60] sm:$0xff] }
 0x77d   : > { %6341 = vmatprep.subr.bf16.mxu1 %v6751_v15  ;;  %v6366_v10 = vpack.c.bf16 %v5545_v9, %v5544_v8  ;;  %v3163_v8 = vld [vmem:[%s6863_s17 + $0x18] sm:$0xff] }
 0x77f   : > { %5963 = vmatmul.mubr.msk.f32.vlgmr.msra.gmra.mrb[10].mxu1 %vm1334_vm6, %v1493_v45  ;;  %v5523_v45 = vld [vmem:[%s6838_s20 + $0x2] ss:$0 sm:$0xff] }
 0x780   : > { %6343 = vmatpush3.bf16.msra.mxu1 %v6342_v11  ;;  %5984 = vmatprep.mubr.msk.f32.mxu1 %vm6752_vm1, %v6753_v23  ;;  %v5546_v11 = vld [vmem:[%s6833_s12 + $0x70] sm:$0xff] }
 0x781   : > { %6344 = vmatprep.subr.bf16.mxu1 %v6751_v15  ;;  %v6369_v13 = vpack.c.bf16 %v5547_v12, %v5546_v11  ;;  %v3077_v11 = vld [vmem:[%s7565_s0 + $0x8] sm:$0xff]  ;;  %v3078_v12 = vld [vmem:[%s7565_s0 + $0x10] sm:$0xff] }
 0x784   : > { %6346 = vmatpush3.bf16.msra.mxu1 %v6345_v14  ;;  %v5537_v14 = vld [vmem:[%s6823_s30 + $0x60] sm:$0xff] }
 0x785   : > { %5998 = vmatprep.subr.mxu1 %v6753_v23  ;;  %v6360_v17 = vpack.c.bf16 %v5538_v16, %v5537_v14  ;;  %v3079_v14 = vld [vmem:[%s7565_s0 + $0x18] sm:$0xff]  ;;  %v7239_v16 = vld [vmem:[%s7214_s2 + $0x8] sm:$0xff] }
 0x787   : > { %5985 = vmatmul.mubr.msk.f32.vlgmr.msra.gmra.mrb[12].mxu1 %vm1026_vm0, %v7016_v48 }
 0x788   : > { %6000 = vmatprep.mubr.msk.f32.mxu1 %vm6752_vm1, %v6753_v23 }
 0x84e   : > { %v1905_v22 = vpop.f32.mrb[8].mxu1 }
 0x84f   : > { %v5954_v24 = vpop.f32.mrb[9].mxu1  ;;  %5958 = vmatmul.mubr.msk.f32.vlgmr.msra.gmra.mrb[10].mxu0 %vm1334_vm6, %v1905_v22 }
 0x850   : > { %6337 = vmatpush3.bf16.msra.mxu0 %v6336_v18  ;;  %5973 = vmatprep.mubr.msk.f32.mxu0 %vm6752_vm1, %v6753_v23  ;;  %v5540_v18 = vld [vmem:[%s6823_s30 + $0x78] sm:$0xff] }
 0x851   : > { %6338 = vmatprep.subr.bf16.mxu0 %v6751_v15 }
 0x852   : > { %v2053_v28 = vpop.f32.mrb[10].mxu1 }
 0x853   : > { %v5964_v29 = vpop.f32.mrb[11].mxu1 }
 0x854   : > { %6340 = vmatpush3.bf16.msra.mxu0 %v6339_v25 }
 0x855   : > { %6347 = vmatprep.subr.bf16.mxu0 %v6751_v15 }
 0x857   : > { %5974 = vmatmul.mubr.msk.f32.vlgmr.msra.gmra.mrb[12].mxu0 %vm1026_vm0, %v7025_v54 }
 0x858   : > { %6349 = vmatpush3.bf16.msra.mxu0 %v6348_v30  ;;  %5995 = vmatprep.mubr.msk.f32.mxu0 %vm6752_vm1, %v6753_v23 }
 0x859   : > { %6350 = vmatprep.subr.bf16.mxu0 %v6751_v15 }
 0x85a   : > { %v2219_v35 = vpop.f32.mrb[12].mxu1 }
 0x85b   : > { %v2220_v36 = vadd.f32 %v5516_v33, %v2219_v35  ;;  %v5986_v37 = vpop.f32.mrb[13].mxu1  ;;  %v5535_v33 = vld [vmem:[%s6818_s24 + $0x3] ss:$0 sm:$0xff] }
 0x85c   : > { %6352 = vmatpush3.bf16.msra.mxu0 %v6351_v34 }
 0x85d   : > { %5999 = vmatpush3.xpose.msk.msra.mxu1 %vm1334_vm6, %v2220_v36  ;;  %6008 = vmatprep.subr.mxu0 %v6753_v23  ;;  %v5549_v36 = vld [vmem:[%s6838_s20 + $0x3] ss:$0 sm:$0xff] }
 0x85e   : > { %6003 = vmatprep.subr.mxu1 %v6753_v23 }
 0x85f   : > { %5996 = vmatmul.mubr.msk.f32.vlgmr.msra.gmra.mrb[14].mxu0 %vm1026_vm0, %v7016_v48 }
 0x860   : > { %6010 = vmatprep.mubr.msk.f32.mxu0 %vm6752_vm1, %v6753_v23  ;;  %6009 = vmatpush3.msra.mxu0 %v5528_v61 }
 0x861   : > { %6359 = vmatprep.subr.bf16.mxu0 %v6751_v15 }
 0x922   : > { %v1980_v38 = vpop.f32.mrb[10].mxu0 }
 0x923   : > { %v7146_v39 = vadd.f32 %v2053_v28, %v1980_v38  ;;  %v5959_v40 = vpop.f32.mrb[11].mxu0 }
 0x92a   : > { %v2136_v42 = vpop.f32.mrb[12].mxu0 }
 0x92b   : > { %v2137_v43 = vadd.f32 %v5509_v41, %v2136_v42  ;;  %v5975_v44 = vpop.f32.mrb[13].mxu0 }
 0x92d   : > { %6001 = vmatmul.mubr.msk.f32.vlgmr.msra.gmra.mrb[14].mxu1 %vm1334_vm6, %v2137_v43 }
 0x92e   : > { %6005 = vmatprep.mubr.msk.f32.mxu1 %vm6752_vm1, %v6753_v23 }
 0x932   : > { %v2302_v46 = vpop.f32.mrb[14].mxu0 }
 0x933   : > { %v2303_v47 = vadd.f32 %v5523_v45, %v2302_v46  ;;  %v5997_v49 = vpop.f32.mrb[15].mxu0 }
 0x934   : > { %v5554_v49 = vld [vmem:[%s6843_s27 + $0x18] sm:$0xff] }
 0x935   : > { %6004 = vmatpush3.msra.mxu1 %v2303_v47 }
 0x936   : > { %6353 = vmatprep.subr.bf16.mxu1 %v6751_v15 }
 0xa00   : > { %v2378_v50 = vpop.f32.mrb[14].mxu1 }
 0xa01   : > { %v2382_v51 = vmul.f32 0.35355338, %v2378_v50  ;;  %v6002_v52 = vpop.f32.mrb[15].mxu1 }
 0xa02   : > { %v7217_v52 = vld [vmem:[%s7214_s2] sm:$0xff]  ;;  %s7568_s2 = sld [smem:[#allocation16_spill]] }
 0xa03   : > { %v2383_v53 = vadd.f32 %v2382_v51, %v7070_v21 }
 0xa05   : > { %v2384_v55 = vsel %vm1334_vm6, %v2383_v53, -inf }
 0xa06   : > { %2385 = vmax.xlane.f32.xlu0 %v2384_v55 }
 0xa93   : > { %v2386_v56 = vpop.xlane.xlu0 %2385 }
 0xa94   : > { %v2387_v57 = vsub.f32 %v2383_v53, %v2386_v56 }
 0xa96   : > { %v2388_v58 = vmul.f32 1.442695, %v2387_v57  ;;  %v5556_v57 = vld [vmem:[%s7564_s4] ss:$0 sm:$0xff]  ;;  %s7567_s4 = sld [smem:[#allocation9_spill]] }
 0xa98   : > { %6609 = vpow2.f32 %v2388_v58 }
 0xaa2   : > { %v6610_v59 = vpop.eup %6609 }
 0xaa3   : > { %v2390_v60 = vsel %vm1334_vm6, %v6610_v59, 0.0 }
 0xaa4   : > { %2391 = vadd.xlane.f32.xlu1 %v2390_v60 }
 0xb31   : > { %v2392_v62 = vpop.xlane.xlu1 %2391 }
 0xb32   : > { %6611 = vrcp.f32 %v2392_v62 }
 0xb3c   : > { %v6612_v2 = vpop.eup %6611 }
 0xb3d   : > { %v2394_v4 = vmul.f32 %v6612_v2, %v6610_v59 }
 0xb3f   : > { %6006 = vmatmul.mubr.msk.f32.vlgmr.msra.gmra.mrb[16].mxu1 %vm1334_vm6, %v2394_v4 }
 0xb40   : > { %6355 = vmatpush3.bf16.msra.mxu1 %v6354_v3  ;;  %6021 = vmatprep.mubr.msk.f32.mxu1 %vm6752_vm1, %v6753_v23 }
 0xb41   : > { %6356 = vmatprep.subr.bf16.mxu1 %v6751_v15 }
 0xb44   : > { %6358 = vmatpush3.bf16.msra.mxu1 %v6357_v7  ;;  %v3162_v7 = vld [vmem:[%s6863_s17 + $0x10] sm:$0xff] }
 0xb45   : > { %6365 = vmatprep.subr.bf16.mxu1 %v6751_v15  ;;  %v6381_v9 = vpack.c.bf16 %v3163_v8, %v3162_v7  ;;  %v5564_v8 = vld [vmem:[%s7574_s9] ss:$0 sm:$0xff] }
 0xb47   : > { %6022 = vmatmul.mubr.msk.f32.vlgmr.msra.gmra.mrb[18].mxu1 %vm1026_vm0, %v7025_v54  ;;  %v5539_v54 = vld [vmem:[%s6823_s30 + $0x70] sm:$0xff] }
 0xb48   : > { %6367 = vmatpush3.bf16.msra.mxu1 %v6366_v10  ;;  %6043 = vmatprep.mubr.msk.f32.mxu1 %vm6752_vm1, %v6753_v23  ;;  %v6363_v22 = vpack.c.bf16 %v5540_v18, %v5539_v54  ;;  %v3076_v10 = vld [vmem:[%s7565_s0] sm:$0xff] }
 0xb49   : > { %6368 = vmatprep.subr.bf16.mxu1 %v6751_v15 }
 0xb4c   : > { %6370 = vmatpush3.bf16.msra.mxu1 %v6369_v13  ;;  %v6372_v13 = vpack.c.bf16 %v3077_v11, %v3076_v10 }
 0xb4d   : > { %6056 = vmatprep.subr.mxu1 %v6753_v23 }
 0xb4f   : > { %6044 = vmatmul.mubr.msk.f32.vlgmr.msra.gmra.mrb[20].mxu1 %vm1026_vm0, %v7016_v48 }
 0xb50   : > { %6058 = vmatprep.mubr.msk.f32.mxu1 %vm6752_vm1, %v6753_v23  ;;  %6057 = vmatpush3.msra.mxu1 %v5554_v49 }
 0xc12   : > { %v2464_v19 = vpop.f32.mrb[16].mxu1 }
 0xc13   : > { %v6007_v20 = vpop.f32.mrb[17].mxu1  ;;  %6011 = vmatmul.mubr.msk.f32.vlgmr.msra.gmra.mrb[16].mxu0 %vm1334_vm6, %v2464_v19 }
 0xc14   : > { %6361 = vmatpush3.bf16.msra.mxu0 %v6360_v17  ;;  %6032 = vmatprep.mubr.msk.f32.mxu0 %vm6752_vm1, %v6753_v23  ;;  %v6375_v17 = vpack.c.bf16 %v3079_v14, %v3078_v12  ;;  %v5579_v14 = vld [vmem:[%s6863_s17 + $0x28] sm:$0xff] }
 0xc15   : > { %6362 = vmatprep.subr.bf16.mxu0 %v6751_v15 }
 0xc18   : > { %6364 = vmatpush3.bf16.msra.mxu0 %v6363_v22 }
 0xc19   : > { %6046 = vmatprep.subr.mxu0 %v6753_v23 }
 0xc1a   : > { %v2623_v24 = vpop.f32.mrb[18].mxu1 }
 0xc1b   : > { %v6023_v25 = vpop.f32.mrb[19].mxu1  ;;  %6033 = vmatmul.mubr.msk.f32.vlgmr.msra.gmra.mrb[18].mxu0 %vm1026_vm0, %v7016_v48  ;;  %v2624_v37 = vadd.f32 %v5535_v33, %v2623_v24  ;;  %v5561_v33 = vld [vmem:[%s7568_s2] ss:$0 sm:$0xff] }
 0xc1c   : > { %6048 = vmatprep.mubr.msk.f32.mxu0 %vm6752_vm1, %v6753_v23 }
 0xc22   : > { %v2789_v26 = vpop.f32.mrb[20].mxu1 }
 0xc23   : > { %v6045_v27 = vpop.f32.mrb[21].mxu1  ;;  %v2790_v48 = vadd.f32 %v5549_v36, %v2789_v26 }
 0xce6   : > { %v2539_v28 = vpop.f32.mrb[16].mxu0 }
 0xce7   : > { %v2543_v29 = vadd.f32 %v2539_v28, %v7146_v39  ;;  %v6012_v30 = vpop.f32.mrb[17].mxu0  ;;  %v5557_v28 = vld [vmem:[%s7566_s10] ss:$0 sm:$0xff]  ;;  %s7573_s10 = sld [smem:[#allocation7_spill]] }
 0xce8   : > { %v5558_v30 = vld [vmem:[%s7567_s4] ss:$0 sm:$0xff]  ;;  %s7572_s4 = sld [smem:[#allocation17_spill]] }
 0xced   : > { %s1015_s6 = scalar_lea.vmem %s7573_s10, %s6975_s28  ;;  %s7576_s28 = sld [smem:[#allocation20_spill]] }
 0xcee   : > { %v2706_v32 = vpop.f32.mrb[18].mxu0  ;;  %s7577_s10 = sld [smem:[#allocation21_spill]] }
 0xcef   : > { %v2707_v34 = vadd.f32 %v5542_v31, %v2706_v32  ;;  %v6034_v35 = vpop.f32.mrb[19].mxu0 }
 0xcf1   : > { %6047 = vmatpush3.xpose.msk.msra.mxu0 %vm1334_vm6, %v2707_v34 }
 0xcf2   : > { %6051 = vmatprep.subr.mxu0 %v6753_v23 }
 0xcf4   : > { %6049 = vmatmul.mubr.msk.f32.vlgmr.msra.gmra.mrb[20].mxu0 %vm1334_vm6, %v2624_v37 }
 0xcf5   : > { %6052 = vmatpush3.msra.mxu0 %v2790_v48  ;;  %6053 = vmatprep.mubr.msk.f32.mxu0 %vm6752_vm1, %v6753_v23 }
 0xcf6   : > { %6371 = vmatprep.subr.bf16.mxu0 %v6751_v15 }
 0xdc7   : > { %v2865_v38 = vpop.f32.mrb[20].mxu0 }
 0xdc8   : > { %v2869_v39 = vmul.f32 0.35355338, %v2865_v38  ;;  %v6050_v40 = vpop.f32.mrb[21].mxu0 }
 0xdc9   : > { %v5572_v40 = vld [vmem:[%s7565_s0 + $0x28] sm:$0xff] }
 0xdca   : > { %v2870_v41 = vadd.f32 %v2869_v39, %v7070_v21  ;;  %v5571_v39 = vld [vmem:[%s7565_s0 + $0x20] sm:$0xff] }
 0xdcc   : > { %v2871_v42 = vsel %vm1334_vm6, %v2870_v41, -inf }
 0xdcd   : > { %2872 = vmax.xlane.f32.xlu0 %v2871_v42 }
 0xe5a   : > { %v2873_v43 = vpop.xlane.xlu0 %2872 }
 0xe5b   : > { %v2874_v44 = vsub.f32 %v2870_v41, %v2873_v43  ;;  %v5559_v41 = vld [vmem:[%s7569_s5] ss:$0 sm:$0xff]  ;;  %v6401_v43 = vpack.c.bf16 %v5572_v40, %v5571_v39  ;;  %v5589_v40 = vld [vmem:[%s7572_s4 + $0x38] sm:$0xff] }
 0xe5d   : > { %v2875_v45 = vmul.f32 1.442695, %v2874_v44 }
 0xe5f   : > { %6613 = vpow2.f32 %v2875_v45 }
 0xe69   : > { %v6614_v46 = vpop.eup %6613 }
 0xe6a   : > { %v2877_v47 = vsel %vm1334_vm6, %v6614_v46, 0.0 }
 0xe6b   : > { %2878 = vadd.xlane.f32.xlu1 %v2877_v47  ;;  %v5574_v47 = vld [vmem:[%s7565_s0 + $0x38] sm:$0xff] }
 0xef8   : > { %v2879_v50 = vpop.xlane.xlu1 %2878 }
 0xef9   : > { %6615 = vrcp.f32 %v2879_v50  ;;  %v3252_v50 = vld [vmem:[%s7572_s4] sm:$0xff] }
 0xf03   : > { %v6616_v51 = vpop.eup %6615 }
 0xf04   : > { %v2881_v21 = vmul.f32 %v6616_v51, %v6614_v46  ;;  %v5573_v46 = vld [vmem:[%s7565_s0 + $0x30] sm:$0xff]  ;;  %v3253_v51 = vld [vmem:[%s7572_s4 + $0x8] sm:$0xff] }
 0xf05   : > { %v6404_v49 = vpack.c.bf16 %v5574_v47, %v5573_v46 }
 0xf06   : > { %6054 = vmatmul.mubr.msk.f32.vlgmr.msra.gmra.mrb[22].mxu0 %vm1334_vm6, %v2881_v21  ;;  %v3254_v21 = vld [vmem:[%s7572_s4 + $0x10] sm:$0xff] }
 0xf07   : > { %6069 = vmatprep.mubr.msk.f32.mxu0 %vm6752_vm1, %v6753_v23  ;;  %6373 = vmatpush3.bf16.msra.mxu0 %v6372_v13  ;;  %v5578_v13 = vld [vmem:[%s6863_s17 + $0x20] sm:$0xff] }
 0xf08   : > { %6374 = vmatprep.subr.bf16.mxu0 %v6751_v15 }
 0xf0b   : > { %6376 = vmatpush3.bf16.msra.mxu0 %v6375_v17  ;;  %v6406_v17 = vpack.c.bf16 %v5579_v14, %v5578_v13  ;;  %v5604_v13 = vld [vmem:[%s7565_s0 + $0x58] sm:$0xff] }
 0xfd9   : > { %v2951_v53 = vpop.f32.mrb[22].mxu0 }
 0xfda   : > { %v6055_v55 = vpop.f32.mrb[23].mxu0  ;;  %6059 = vmatmul.mubr.msk.f32.vlgmr.msra.gmra.mrb[22].mxu1 %vm1334_vm6, %v2951_v53  ;;  %v6385_v53 = vpack.c.bf16 %v3253_v51, %v3252_v50 }
 0xfdb   : > { %6080 = vmatprep.mubr.msk.f32.mxu1 %vm1026_vm0, %v7217_v52  ;;  %v3255_v55 = vld [vmem:[%s7572_s4 + $0x18] sm:$0xff] }
 0xfdc   : > { %6386 = vmatprep.subr.bf16.mxu0 %v6385_v53 }
0x10ad   : > { %v3026_v56 = vpop.f32.mrb[22].mxu1 }
0x10ae   : > { %v3030_v58 = vadd.f32 %v3026_v56, %v2543_v29  ;;  %v6060_v59 = vpop.f32.mrb[23].mxu1  ;;  %v6389_v56 = vpack.c.bf16 %v3255_v55, %v3254_v21  ;;  %v5591_v55 = vld [vmem:[%s7574_s9 + $0x1] ss:$0 sm:$0xff] }
0x10b0   : > { %v3038_v60 = vadd.f32 %v5556_v57, %v3030_v58  ;;  %v7289_v58 = vld [vmem:[%s1015_s6] sm:$0xff]  ;;  %s7575_s6 = sld [smem:[#allocation19_spill]] }
0x10b2   : > { %v7224_v61 = vadd.f32 %v3038_v60, %v6979_v0  ;;  %v3161_v0 = vld [vmem:[%s6863_s17 + $0x8] sm:$0xff] }
0x10b3   : > { %v6377_v6 = vpack.c.bf16 %v3161_v0, %v3160_v5 }
0x10b4   : > { %v3042_v62 = vsel %vm1026_vm0, %v7224_v61, 0.0 }
0x10b5   : > { %3043 = vadd.xlane.f32.xlu0 %v3042_v62  ;;  %6378 = vmatprep.subr.bf16.mxu1 %v6377_v6 }
0x10b6   : > { %6380 = vmatpush3.bf16.msra.mxu1 %v6377_v6 }
0x10b7   : > { %6382 = vmatprep.subr.bf16.mxu1 %v6381_v9 }
0x10ba   : > { %6384 = vmatpush3.bf16.msra.mxu1 %v6381_v9 }
0x10bb   : > { %6393 = vmatprep.subr.bf16.mxu1 %v6751_v15 }
0x10bd   : > { %6081 = vmatmul.mubr.msk.f32.vlgmr.msra.gmra.mrb[24].mxu1 %vm1026_vm0, %v7239_v16 }
0x10be   : > { %6098 = vmatprep.mubr.msk.f32.mxu1 %vm6752_vm1, %v6753_v23 }
0x1142   : > { %v3044_v63 = vpop.xlane.xlu0 %3043 }
0x1143   : > { %v3045_v1 = vmul.f32 0.03125, %v3044_v63 }
0x1145   : > { %v3046_v2 = vsub.f32 %v7224_v61, %v3045_v1 }
0x1147   : > { %v3047_v3 = vmul.f32 %v3046_v2, %v3046_v2 }
0x1149   : > { %v3048_v4 = vsel %vm1026_vm0, %v3047_v3, 0.0 }
0x114a   : > { %3049 = vadd.xlane.f32.xlu1 %v3048_v4 }
0x1190   : > { %v6082_v34 = vpop.f32.mrb[24].mxu1 }
0x1191   : > { %v3249_v35 = vadd.f32 %v6082_v34, %v5561_v33  ;;  %v3243_v36 = vpop.f32.mrb[25].mxu1  ;;  %v5576_v34 = vld [vmem:[%s7569_s5 + $0x1] ss:$0 sm:$0xff] }
0x1192   : > { %v3244_v37 = vadd.f32 %v5561_v33, %v3243_v36  ;;  %v5586_v36 = vld [vmem:[%s7572_s4 + $0x20] sm:$0xff] }
0x1194   : > { %v6394_v38 = vpack.c.bf16 %v3249_v35, %v3244_v37  ;;  %v5587_v37 = vld [vmem:[%s7572_s4 + $0x28] sm:$0xff] }
0x1195   : > { %v6414_v39 = vpack.c.bf16 %v5587_v37, %v5586_v36  ;;  %v5616_v36 = vld [vmem:[%s7572_s4 + $0x40] sm:$0xff]  ;;  %v5617_v37 = vld [vmem:[%s7572_s4 + $0x48] sm:$0xff] }
0x1196   : > { %6396 = vmatpush3.bf16.xpose.msk.msra.mxu1 %vm7258_vm9, %v6394_v38  ;;  %v5588_v38 = vld [vmem:[%s7572_s4 + $0x30] sm:$0xff] }
0x1197   : > { %6400 = vmatprep.subr.bf16.mxu1 %v6751_v15 }
0x11d7   : > { %v3050_v54 = vpop.xlane.xlu1 %3049 }
0x11d8   : > { %v3051_v18 = vmul.f32 0.032258064, %v3050_v54 }
0x11da   : > { %6617 = vrsqrt.f32 %v3051_v18  ;;  %vm3054_vm7 = vcmp.eq.f32.partialorder %v3051_v18, inf  ;;  %v3057_v22 = vand.u32 2147483648, %v3051_v18  ;;  %vm3056_vm8 = vcmp.eq.f32.partialorder %v3051_v18, 0.0 }
0x11e4   : > { %v6618_v19 = vpop.eup %6617 }
0x11e5   : > { %v3053_v20 = vmul.f32 %v6618_v19, %v3051_v18  ;;  %v5581_v19 = vld [vmem:[%s6863_s17 + $0x38] sm:$0xff] }
0x11e7   : > { %v3055_v24 = vsel %vm3054_vm7, %v3051_v18, %v3053_v20  ;;  %v5580_v18 = vld [vmem:[%s6863_s17 + $0x30] sm:$0xff] }
0x11e8   : > { %v3058_v25 = vsel %vm3056_vm8, %v3057_v22, %v3055_v24  ;;  %v6410_v24 = vpack.c.bf16 %v5581_v19, %v5580_v18 }
0x11e9   : > { %v3059_v26 = vadd.f32 1e-06, %v3058_v25 }
0x11eb   : > { %6619 = vrcp.f32 %v3059_v26 }
0x11f5   : > { %v6620_v27 = vpop.eup %6619 }
0x11f6   : > { %v3061_v29 = vmul.f32 %v6620_v27, %v3046_v2  ;;  %v5583_v27 = vld [vmem:[%s7568_s2 + $0x1] ss:$0 sm:$0xff] }
0x11f8   : > { %v3068_v31 = vmul.f32 %v5557_v28, %v3061_v29 }
0x11fa   : > { %v7249_v32 = vadd.f32 %v5558_v30, %v3068_v31 }
0x11fc   : > { %6070 = vmatmul.mubr.msk.f32.vlgmr.msra.gmra.mrb[24].mxu0 %vm1026_vm0, %v7249_v32 }
0x11fd   : > { %6091 = vmatprep.mubr.msk.f32.mxu0 %vm1026_vm0, %v7217_v52  ;;  %6388 = vmatpush3.bf16.msra.mxu0 %v6385_v53 }
0x11fe   : > { %6390 = vmatprep.subr.bf16.mxu0 %v6389_v56 }
0x1201   : > { %6392 = vmatpush3.bf16.msra.mxu0 %v6389_v56 }
0x1202   : > { %6397 = vmatprep.subr.bf16.mxu0 %v6751_v15 }
0x1204   : > { %6092 = vmatmul.mubr.msk.f32.vlgmr.msra.gmra.mrb[26].mxu0 %vm1026_vm0, %v7239_v16 }
0x1205   : > { %6105 = vmatprep.mubr.msk.f32.mxu0 %vm6752_vm1, %v6753_v23 }
0x12cf   : > { %v3156_v42 = vpop.f32.mrb[24].mxu0 }
0x12d0   : > { %v3157_v44 = vadd.f32 %v5559_v41, %v3156_v42  ;;  %v6071_v45 = vpop.f32.mrb[25].mxu0  ;;  %v6418_v41 = vpack.c.bf16 %v5589_v40, %v5588_v38  ;;  %v5618_v38 = vld [vmem:[%s7572_s4 + $0x50] sm:$0xff]  ;;  %v5619_v40 = vld [vmem:[%s7572_s4 + $0x58] sm:$0xff] }
0x12d2   : > { %6099 = vmatmul.mubr.msk.f32.vlgmr.msra.gmra.mrb[26].mxu1 %vm1334_vm6, %v3157_v44 }
0x12d3   : > { %6402 = vmatpush3.bf16.msra.mxu1 %v6401_v43  ;;  %6116 = vmatprep.mubr.msk.f32.mxu1 %vm6752_vm1, %v6753_v23 }
0x12d4   : > { %6403 = vmatprep.subr.bf16.mxu1 %v6751_v15 }
0x12d7   : > { %6405 = vmatpush3.bf16.msra.mxu1 %v6404_v49  ;;  %v6093_v7 = vpop.f32.mrb[26].mxu0 }
0x12d8   : > { %v3329_v9 = vpop.f32.mrb[27].mxu0  ;;  %v3335_v10 = vadd.f32 %v6093_v7, %v5564_v8  ;;  %6415 = vmatprep.subr.bf16.mxu1 %v6414_v39  ;;  %v5611_v7 = vld [vmem:[%s6863_s17 + $0x58] sm:$0xff] }
0x12d9   : > { %v3330_v11 = vadd.f32 %v5564_v8, %v3329_v9  ;;  %v5601_v9 = vld [vmem:[%s7565_s0 + $0x40] sm:$0xff] }
0x12da   : > { %6117 = vmatmul.mubr.msk.f32.vlgmr.msra.gmra.mrb[28].mxu1 %vm1026_vm0, %v7249_v32 }
0x12db   : > { %6138 = vmatprep.mubr.msk.f32.mxu1 %vm1026_vm0, %v7217_v52  ;;  %v6398_v12 = vpack.c.bf16 %v3335_v10, %v3330_v11  ;;  %6417 = vmatpush3.bf16.msra.mxu1 %v6414_v39  ;;  %v5602_v10 = vld [vmem:[%s7565_s0 + $0x48] sm:$0xff]  ;;  %v6443_v39 = vpack.c.bf16 %v5617_v37, %v5616_v36 }
0x12dc   : > { %6419 = vmatprep.subr.bf16.mxu1 %v6418_v41  ;;  %v6430_v11 = vpack.c.bf16 %v5602_v10, %v5601_v9  ;;  %v5638_v9 = vld [vmem:[%s6863_s17 + $0x68] sm:$0xff] }
0x12dd   : > { %6399 = vmatpush3.bf16.msra.mxu0 %v6398_v12  ;;  %v5603_v12 = vld [vmem:[%s7565_s0 + $0x50] sm:$0xff] }
0x12de   : > { %6407 = vmatprep.subr.bf16.mxu0 %v6406_v17 }
0x12df   : > { %6421 = vmatpush3.bf16.msra.mxu1 %v6418_v41  ;;  %v6447_v41 = vpack.c.bf16 %v5619_v40, %v5618_v38 }
0x12e0   : > { %6426 = vmatprep.subr.bf16.mxu1 %v6751_v15 }
0x12e2   : > { %6139 = vmatmul.mubr.msk.f32.vlgmr.msra.gmra.mrb[30].mxu1 %vm1026_vm0, %v7239_v16 }
0x12e3   : > { %6152 = vmatprep.mubr.msk.f32.mxu1 %vm6752_vm1, %v6753_v23 }
0x13a5   : > { %v3413_v57 = vpop.f32.mrb[26].mxu1 }
0x13a6   : > { %v3417_v59 = vmul.f32 0.35355338, %v3413_v57  ;;  %v6100_v60 = vpop.f32.mrb[27].mxu1 }
0x13a8   : > { %v3418_v62 = vadd.f32 %v3417_v59, %v7289_v58 }
0x13aa   : > { %v3420_v63 = vsel %vm3419_vm10, %v3418_v62, -inf }
0x13ab   : > { %3421 = vmax.xlane.f32.xlu0 %v3420_v63 }
0x13ad   : > { %v3584_v1 = vpop.f32.mrb[28].mxu1 }
0x13ae   : > { %v6118_v2 = vpop.f32.mrb[29].mxu1  ;;  %v3585_v35 = vadd.f32 %v5576_v34, %v3584_v1  ;;  %v5608_v1 = vld [vmem:[%s6863_s17 + $0x40] sm:$0xff] }
0x13af   : > { %v5609_v2 = vld [vmem:[%s6863_s17 + $0x48] sm:$0xff] }
0x13b5   : > { %v6140_v53 = vpop.f32.mrb[30].mxu1 }
0x13b6   : > { %v3755_v56 = vpop.f32.mrb[31].mxu1  ;;  %v3761_v57 = vadd.f32 %v6140_v53, %v5591_v55 }
0x13b7   : > { %v3756_v59 = vadd.f32 %v5591_v55, %v3755_v56  ;;  %v5621_v55 = vld [vmem:[%s7574_s9 + $0x2] ss:$0 sm:$0xff] }
0x13b9   : > { %v6427_v60 = vpack.c.bf16 %v3761_v57, %v3756_v59 }
0x13bb   : > { %6428 = vmatpush3.bf16.msra.mxu1 %v6427_v60 }
0x13bc   : > { %6160 = vmatprep.subr.mxu1 %v6753_v23 }
0x1438   : > { %v3422_v3 = vpop.xlane.xlu0 %3421 }
0x1439   : > { %v3423_v4 = vsub.f32 %v3418_v62, %v3422_v3  ;;  %v5598_v62 = vld [vmem:[%s7575_s6 + $0x8] sm:$0xff] }
0x143b   : > { %v3424_v5 = vmul.f32 1.442695, %v3423_v4 }
0x143d   : > { %6621 = vpow2.f32 %v3424_v5  ;;  %v3504_v5 = vld [vmem:[%s7575_s6] sm:$0xff] }
0x1447   : > { %v6622_v0 = vpop.eup %6621 }
0x1448   : > { %v3426_v6 = vsel %vm3419_vm10, %v6622_v0, 0.0 }
0x1449   : > { %3427 = vadd.xlane.f32.xlu1 %v3426_v6  ;;  %v5610_v6 = vld [vmem:[%s6863_s17 + $0x50] sm:$0xff] }
0x144a   : > { %v6439_v8 = vpack.c.bf16 %v5611_v7, %v5610_v6  ;;  %v5633_v6 = vld [vmem:[%s7565_s0 + $0x78] sm:$0xff] }
0x14d6   : > { %v3428_v54 = vpop.xlane.xlu1 %3427 }
0x14d7   : > { %6623 = vrcp.f32 %v3428_v54  ;;  %v6433_v54 = vpack.c.bf16 %v5604_v13, %v5603_v12  ;;  %v5640_v12 = vld [vmem:[%s6863_s17 + $0x78] sm:$0xff] }
0x14e1   : > { %v6624_v20 = vpop.eup %6623 }
0x14e2   : > { %v3430_v22 = vmul.f32 %v6624_v20, %v6622_v0  ;;  %v6435_v0 = vpack.c.bf16 %v5609_v2, %v5608_v1  ;;  %v5613_v20 = vld [vmem:[%s7568_s2 + $0x2] ss:$0 sm:$0xff]  ;;  %v5631_v2 = vld [vmem:[%s7565_s0 + $0x68] sm:$0xff] }
0x14e3   : > { %v5630_v1 = vld [vmem:[%s7565_s0 + $0x60] sm:$0xff] }
0x14e4   : > { %6106 = vmatmul.mubr.msk.f32.vlgmr.msra.gmra.mrb[28].mxu0 %vm3419_vm10, %v3430_v22 }
0x14e5   : > { %6409 = vmatpush3.bf16.msra.mxu0 %v6406_v17  ;;  %6127 = vmatprep.mubr.msk.f32.mxu0 %vm1026_vm0, %v7217_v52 }
0x14e6   : > { %6411 = vmatprep.subr.bf16.mxu0 %v6410_v24 }
0x14e9   : > { %6413 = vmatpush3.bf16.msra.mxu0 %v6410_v24 }
0x14ea   : > { %6422 = vmatprep.subr.bf16.mxu0 %v6751_v15 }
0x14ec   : > { %6128 = vmatmul.mubr.msk.f32.vlgmr.msra.gmra.mrb[30].mxu0 %vm1026_vm0, %v7239_v16 }
0x14ed   : > { %6145 = vmatprep.mubr.msk.f32.mxu0 %vm6752_vm1, %v6753_v23 }
0x15b7   : > { %v7307_v25 = vpop.f32.mrb[28].mxu0 }
0x15b8   : > { %v6107_v26 = vpop.f32.mrb[29].mxu0 }
0x15bf   : > { %v6129_v28 = vpop.f32.mrb[30].mxu0 }
0x15c0   : > { %v3673_v29 = vadd.f32 %v6129_v28, %v5583_v27  ;;  %v3667_v30 = vpop.f32.mrb[31].mxu0 }
0x15c1   : > { %v3668_v31 = vadd.f32 %v5583_v27, %v3667_v30 }
0x15c3   : > { %v6423_v33 = vpack.c.bf16 %v3673_v29, %v3668_v31  ;;  %v5606_v31 = vld [vmem:[%s7569_s5 + $0x2] ss:$0 sm:$0xff] }
0x15c5   : > { %6425 = vmatpush3.bf16.xpose.msk.msra.mxu0 %vm7258_vm9, %v6423_v33 }
0x15c6   : > { %6155 = vmatprep.subr.mxu0 %v6753_v23 }
0x15cc   : > { %6146 = vmatmul.mubr.msk.f32.vlgmr.msra.gmra.mrb[32].mxu0 %vm1334_vm6, %v3585_v35 }
0x15cd   : > { %6157 = vmatprep.mubr.msk.f32.mxu0 %vm6752_vm1, %v6753_v23  ;;  %6156 = vmatpush3.msra.mxu0 %v5598_v62  ;;  %v5628_v62 = vld [vmem:[%s7575_s6 + $0x10] sm:$0xff] }
0x15ce   : > { %6429 = vmatprep.subr.bf16.mxu0 %v6751_v15 }
0x169f   : > { %v3839_v42 = vpop.f32.mrb[32].mxu0 }
0x16a0   : > { %v3843_v43 = vmul.f32 0.35355338, %v3839_v42  ;;  %v6147_v44 = vpop.f32.mrb[33].mxu0 }
0x16a2   : > { %v3844_v45 = vadd.f32 %v3843_v43, %v7289_v58 }
0x16a4   : > { %v3845_v46 = vsel %vm3419_vm10, %v3844_v45, -inf }
0x16a5   : > { %3846 = vmax.xlane.f32.xlu0 %v3845_v46 }
0x1732   : > { %v3847_v47 = vpop.xlane.xlu0 %3846 }
0x1733   : > { %v3848_v49 = vsub.f32 %v3844_v45, %v3847_v47 }
0x1735   : > { %v3849_v50 = vmul.f32 1.442695, %v3848_v49 }
0x1737   : > { %6625 = vpow2.f32 %v3849_v50 }
0x1741   : > { %v6626_v51 = vpop.eup %6625 }
0x1742   : > { %v3851_v21 = vsel %vm3419_vm10, %v6626_v51, 0.0 }
0x1743   : > { %3852 = vadd.xlane.f32.xlu1 %v3851_v21 }
0x17d0   : > { %v3853_v63 = vpop.xlane.xlu1 %3852 }
0x17d1   : > { %6627 = vrcp.f32 %v3853_v63 }
0x17db   : > { %v6628_v3 = vpop.eup %6627 }
0x17dc   : > { %v3855_v4 = vmul.f32 %v6628_v3, %v6626_v51 }
0x17de   : > { %6153 = vmatmul.mubr.msk.f32.vlgmr.msra.gmra.mrb[32].mxu1 %vm3419_vm10, %v3855_v4  ;;  %v6459_v4 = vpack.c.bf16 %v5631_v2, %v5630_v1 }
0x17df   : > { %6161 = vmatpush3.msra.mxu1 %v3504_v5  ;;  %6162 = vmatprep.mubr.msk.f32.mxu1 %vm6752_vm1, %v6753_v23 }
0x17e0   : > { %6436 = vmatprep.subr.bf16.mxu1 %v6435_v0 }
0x17e2   : > { %6163 = vmatmul.mubr.msk.f32.vlgmr.msra.gmra.mrb[34].mxu1 %vm1334_vm6, %v7307_v25 }
0x17e3   : > { %6438 = vmatpush3.bf16.msra.mxu1 %v6435_v0  ;;  %6184 = vmatprep.mubr.msk.f32.mxu1 %vm1026_vm0, %v7217_v52  ;;  %v5632_v0 = vld [vmem:[%s7565_s0 + $0x70] sm:$0xff]  ;;  %s7579_s0 = sld [smem:[#allocation11_spill]] }
0x17e4   : > { %6440 = vmatprep.subr.bf16.mxu1 %v6439_v8  ;;  %v6462_v7 = vpack.c.bf16 %v5633_v6, %v5632_v0 }
0x17e7   : > { %6442 = vmatpush3.bf16.msra.mxu1 %v6439_v8  ;;  %v5637_v8 = vld [vmem:[%s6863_s17 + $0x60] sm:$0xff] }
0x17e8   : > { %6451 = vmatprep.subr.bf16.mxu1 %v6751_v15  ;;  %v6464_v10 = vpack.c.bf16 %v5638_v9, %v5637_v8  ;;  %v5123_v8 = vld [vmem:[%s7577_s10 + $0x8] sm:$0xff] }
0x17ea   : > { %6185 = vmatmul.mubr.msk.f32.vlgmr.msra.gmra.mrb[36].mxu1 %vm1026_vm0, %v7239_v16 }
0x17eb   : > { %6202 = vmatprep.mubr.msk.f32.mxu1 %vm6752_vm1, %v6753_v23 }
0x18b1   : > { %v3925_v14 = vpop.f32.mrb[32].mxu1 }
0x18b2   : > { %v6154_v17 = vpop.f32.mrb[33].mxu1  ;;  %6158 = vmatmul.mubr.msk.f32.vlgmr.msra.gmra.mrb[34].mxu0 %vm1334_vm6, %v3925_v14 }
0x18b3   : > { %6431 = vmatpush3.bf16.msra.mxu0 %v6430_v11  ;;  %6173 = vmatprep.mubr.msk.f32.mxu0 %vm6752_vm1, %v6753_v23  ;;  %v5639_v11 = vld [vmem:[%s6863_s17 + $0x70] sm:$0xff] }
0x18b4   : > { %6432 = vmatprep.subr.bf16.mxu0 %v6751_v15  ;;  %v6468_v13 = vpack.c.bf16 %v5640_v12, %v5639_v11  ;;  %v5207_v12 = vld [vmem:[%s6903_s14] sm:$0xff] }
0x18b5   : > { %v4073_v18 = vpop.f32.mrb[34].mxu1 }
0x18b6   : > { %v6164_v19 = vpop.f32.mrb[35].mxu1 }
0x18b7   : > { %6434 = vmatpush3.bf16.msra.mxu0 %v6433_v54 }
0x18b8   : > { %6444 = vmatprep.subr.bf16.mxu0 %v6443_v39 }
0x18ba   : > { %6174 = vmatmul.mubr.msk.f32.vlgmr.msra.gmra.mrb[36].mxu0 %vm1026_vm0, %v7249_v32 }
0x18bb   : > { %6195 = vmatprep.mubr.msk.f32.mxu0 %vm1026_vm0, %v7217_v52  ;;  %6446 = vmatpush3.bf16.msra.mxu0 %v6443_v39 }
0x18bc   : > { %6448 = vmatprep.subr.bf16.mxu0 %v6447_v41 }
0x18bd   : > { %v6186_v22 = vpop.f32.mrb[36].mxu1 }
0x18be   : > { %v4245_v24 = vadd.f32 %v6186_v22, %v5613_v20  ;;  %v4239_v25 = vpop.f32.mrb[37].mxu1 }
0x18bf   : > { %v4240_v26 = vadd.f32 %v5613_v20, %v4239_v25  ;;  %6450 = vmatpush3.bf16.msra.mxu0 %v6447_v41  ;;  %v5642_v20 = vld [vmem:[%s7568_s2 + $0x3] ss:$0 sm:$0xff]  ;;  %s7582_s2 = sld [smem:[#allocation24_spill]] }
0x18c0   : > { %6455 = vmatprep.subr.bf16.mxu0 %v6751_v15 }
0x18c1   : > { %v6452_v27 = vpack.c.bf16 %v4245_v24, %v4240_v26 }
0x18c2   : > { %6196 = vmatmul.mubr.msk.f32.vlgmr.msra.gmra.mrb[38].mxu0 %vm1026_vm0, %v7239_v16 }
0x18c3   : > { %6454 = vmatpush3.bf16.xpose.msk.msra.mxu1 %vm7258_vm9, %v6452_v27  ;;  %6209 = vmatprep.mubr.msk.f32.mxu0 %vm6752_vm1, %v6753_v23 }
0x18c4   : > { %6212 = vmatprep.subr.mxu1 %v6753_v23 }
0x1985   : > { %v4000_v28 = vpop.f32.mrb[34].mxu0 }
0x1986   : > { %v7366_v29 = vadd.f32 %v4073_v18, %v4000_v28  ;;  %v6159_v30 = vpop.f32.mrb[35].mxu0  ;;  %v5635_v28 = vld [vmem:[%s7569_s5 + $0x3] ss:$0 sm:$0xff] }
0x198d   : > { %v4156_v33 = vpop.f32.mrb[36].mxu0 }
0x198e   : > { %v4157_v34 = vadd.f32 %v5606_v31, %v4156_v33  ;;  %v6175_v35 = vpop.f32.mrb[37].mxu0  ;;  %v5646_v31 = vld [vmem:[%s7572_s4 + $0x68] sm:$0xff]  ;;  %v5647_v33 = vld [vmem:[%s7572_s4 + $0x70] sm:$0xff] }
0x198f   : > { %v5648_v35 = vld [vmem:[%s7572_s4 + $0x78] sm:$0xff] }
0x1990   : > { %6203 = vmatmul.mubr.msk.f32.vlgmr.msra.gmra.mrb[38].mxu1 %vm1334_vm6, %v4157_v34  ;;  %v6476_v36 = vpack.c.bf16 %v5648_v35, %v5647_v33 }
0x1991   : > { %6214 = vmatprep.mubr.msk.f32.mxu1 %vm6752_vm1, %v6753_v23  ;;  %6213 = vmatpush3.msra.mxu1 %v5628_v62 }
0x1992   : > { %6465 = vmatprep.subr.bf16.mxu1 %v6464_v10 }
0x1995   : > { %v6197_v53 = vpop.f32.mrb[38].mxu0 }
0x1996   : > { %v4327_v56 = vpop.f32.mrb[39].mxu0  ;;  %v4333_v57 = vadd.f32 %v6197_v53, %v5621_v55 }
0x1997   : > { %v4328_v59 = vadd.f32 %v5621_v55, %v4327_v56 }
0x1999   : > { %v6456_v60 = vpack.c.bf16 %v4333_v57, %v4328_v59 }
0x199b   : > { %6457 = vmatpush3.bf16.msra.mxu0 %v6456_v60  ;;  %v5659_v60 = vld [vmem:[%s7576_s28] ss:$0 sm:$0xff]  ;;  %s7578_s28 = sld [smem:[#allocation10_spill]] }
0x199c   : > { %6458 = vmatprep.subr.bf16.mxu0 %v6751_v15 }
0x1a63   : > { %v4411_v42 = vpop.f32.mrb[38].mxu1 }
0x1a64   : > { %v4415_v43 = vmul.f32 0.35355338, %v4411_v42  ;;  %v6204_v44 = vpop.f32.mrb[39].mxu1 }
0x1a66   : > { %v4416_v45 = vadd.f32 %v4415_v43, %v7289_v58 }
0x1a68   : > { %v4417_v46 = vsel %vm3419_vm10, %v4416_v45, -inf }
0x1a69   : > { %4418 = vmax.xlane.f32.xlu0 %v4417_v46  ;;  %v5650_v46 = vld [vmem:[%s7574_s9 + $0x3] ss:$0 sm:$0xff] }
0x1af6   : > { %v4419_v47 = vpop.xlane.xlu0 %4418 }
0x1af7   : > { %v4420_v49 = vsub.f32 %v4416_v45, %v4419_v47 }
0x1af9   : > { %v4421_v50 = vmul.f32 1.442695, %v4420_v49 }
0x1afb   : > { %6629 = vpow2.f32 %v4421_v50 }
0x1b05   : > { %v6630_v51 = vpop.eup %6629 }
0x1b06   : > { %v4423_v21 = vsel %vm3419_vm10, %v6630_v51, 0.0 }
0x1b07   : > { %4424 = vadd.xlane.f32.xlu1 %v4423_v21 }
0x1b94   : > { %v4425_v63 = vpop.xlane.xlu1 %4424 }
0x1b95   : > { %6631 = vrcp.f32 %v4425_v63 }
0x1b9f   : > { %v6632_v3 = vpop.eup %6631 }
0x1ba0   : > { %v4427_v5 = vmul.f32 %v6632_v3, %v6630_v51 }
0x1ba2   : > { %6210 = vmatmul.mubr.msk.f32.vlgmr.msra.gmra.mrb[40].mxu0 %vm3419_vm10, %v4427_v5 }
0x1ba3   : > { %6460 = vmatpush3.bf16.msra.mxu0 %v6459_v4  ;;  %6225 = vmatprep.mubr.msk.f32.mxu0 %vm6752_vm1, %v6753_v23 }
0x1ba4   : > { %6461 = vmatprep.subr.bf16.mxu0 %v6751_v15 }
0x1ba7   : > { %6463 = vmatpush3.bf16.msra.mxu0 %v6462_v7  ;;  %v5122_v7 = vld [vmem:[%s7577_s10] sm:$0xff] }
0x1ba8   : > { %v6488_v9 = vpack.c.bf16 %v5123_v8, %v5122_v7 }
0x1baa   : > { %6226 = vmatmul.mubr.msk.f32.vlgmr.msra.gmra.mrb[42].mxu0 %vm1026_vm0, %v7249_v32 }
0x1bab   : > { %6247 = vmatprep.mubr.msk.f32.mxu0 %vm1026_vm0, %v7217_v52 }
0x1c75   : > { %v4497_v14 = vpop.f32.mrb[40].mxu0 }
0x1c76   : > { %v6211_v17 = vpop.f32.mrb[41].mxu0  ;;  %6215 = vmatmul.mubr.msk.f32.vlgmr.msra.gmra.mrb[40].mxu1 %vm1334_vm6, %v4497_v14  ;;  %v5209_v14 = vld [vmem:[%s6903_s14 + $0x10] sm:$0xff] }
0x1c77   : > { %6467 = vmatpush3.bf16.msra.mxu1 %v6464_v10  ;;  %6236 = vmatprep.mubr.msk.f32.mxu1 %vm1026_vm0, %v7217_v52  ;;  %v5125_v10 = vld [vmem:[%s7577_s10 + $0x18] sm:$0xff] }
0x1c78   : > { %6469 = vmatprep.subr.bf16.mxu1 %v6468_v13 }
0x1c7b   : > { %6471 = vmatpush3.bf16.msra.mxu1 %v6468_v13  ;;  %v5208_v13 = vld [vmem:[%s6903_s14 + $0x8] sm:$0xff] }
0x1c7c   : > { %6480 = vmatprep.subr.bf16.mxu1 %v6751_v15  ;;  %v6494_v17 = vpack.c.bf16 %v5208_v13, %v5207_v12 }
0x1c7d   : > { %v4656_v32 = vpop.f32.mrb[42].mxu0 }
0x1c7e   : > { %v6227_v54 = vpop.f32.mrb[43].mxu0  ;;  %6237 = vmatmul.mubr.msk.f32.vlgmr.msra.gmra.mrb[42].mxu1 %vm1026_vm0, %v7239_v16  ;;  %v4657_v30 = vadd.f32 %v5635_v28, %v4656_v32  ;;  %v5210_v32 = vld [vmem:[%s6903_s14 + $0x18] sm:$0xff] }
0x1c7f   : > { %6254 = vmatprep.mubr.msk.f32.mxu1 %vm6752_vm1, %v6753_v23  ;;  %v6497_v54 = vpack.c.bf16 %v5210_v32, %v5209_v14 }
0x1d49   : > { %v4572_v18 = vpop.f32.mrb[40].mxu1 }
0x1d4a   : > { %v7412_v19 = vadd.f32 %v4572_v18, %v7366_v29  ;;  %v6216_v52 = vpop.f32.mrb[41].mxu1  ;;  %v5645_v29 = vld [vmem:[%s7572_s4 + $0x60] sm:$0xff]  ;;  %s5667_s4 = sshll.u32 %s6711_s22, 7  ;;  %s6754_s22 = smov [#allocation2]  }
0x1d4b   : > { %v6472_v34 = vpack.c.bf16 %v5646_v31, %v5645_v29  ;;  %v5211_v18 = vld [vmem:[%s6903_s14 + $0x20] sm:$0xff] }
0x1d4c   : > { %v5660_v31 = vld [vmem:[%s7578_s28] ss:$0 sm:$0xff]  ;;  %s990_s28 = sand.u32 1, %s6703_s16  }
0x1d4d   : > { %6473 = vmatprep.subr.bf16.mxu0 %v6472_v34  ;;  %s5299_s9 = scalar_lea.sflag [#allocation3], %s990_s28 }
0x1d4e   : > { %6475 = vmatpush3.bf16.msra.mxu0 %v6472_v34 }
0x1d4f   : > { %6477 = vmatprep.subr.bf16.mxu0 %v6476_v36 }
0x1d51   : > { %v6238_v22 = vpop.f32.mrb[42].mxu1 }
0x1d52   : > { %v4745_v24 = vadd.f32 %v6238_v22, %v5642_v20  ;;  %v4739_v25 = vpop.f32.mrb[43].mxu1  ;;  %6479 = vmatpush3.bf16.msra.mxu0 %v6476_v36  ;;  %v5213_v36 = vld [vmem:[%s6903_s14 + $0x30] sm:$0xff] }
0x1d53   : > { %v4740_v26 = vadd.f32 %v5642_v20, %v4739_v25  ;;  %6484 = vmatprep.subr.bf16.mxu0 %v6751_v15 }
0x1d55   : > { %v6481_v27 = vpack.c.bf16 %v4745_v24, %v4740_v26  ;;  %6248 = vmatmul.mubr.msk.f32.vlgmr.msra.gmra.mrb[44].mxu0 %vm1026_vm0, %v7239_v16 }
0x1d56   : > { %6261 = vmatprep.mubr.msk.f32.mxu0 %vm6752_vm1, %v6753_v23 }
0x1d57   : > { %6483 = vmatpush3.bf16.xpose.msk.msra.mxu1 %vm7258_vm9, %v6481_v27 }
0x1d58   : > { %6264 = vmatprep.subr.mxu1 %v6753_v23 }
0x1d5e   : > { %6255 = vmatmul.mubr.msk.f32.vlgmr.msra.gmra.mrb[44].mxu1 %vm1334_vm6, %v4657_v30 }
0x1d5f   : > { %6266 = vmatprep.mubr.msk.f32.mxu1 %vm6752_vm1, %v6753_v23 }
0x1e28   : > { %v6249_v45 = vpop.f32.mrb[44].mxu0 }
0x1e29   : > { %v4827_v47 = vpop.f32.mrb[45].mxu0  ;;  %v4833_v49 = vadd.f32 %v6249_v45, %v5650_v46 }
0x1e2a   : > { %v4828_v50 = vadd.f32 %v5650_v46, %v4827_v47 }
0x1e2c   : > { %v6485_v51 = vpack.c.bf16 %v4833_v49, %v4828_v50 }
0x1e2e   : > { %6486 = vmatpush3.bf16.msra.mxu0 %v6485_v51 }
0x1e2f   : > { %6487 = vmatprep.subr.bf16.mxu0 %v6751_v15 }
0x1e31   : > { %v4911_v48 = vpop.f32.mrb[44].mxu1 }
0x1e32   : > { %v4915_v37 = vmul.f32 0.35355338, %v4911_v48  ;;  %v6256_v38 = vpop.f32.mrb[45].mxu1  ;;  %v5214_v48 = vld [vmem:[%s6903_s14 + $0x38] sm:$0xff] }
0x1e33   : > { %v5662_v38 = vld [vmem:[%s7580_s8] ss:$0 sm:$0xff]  ;;  %s7478_s8 = scalar_lea.hbm %s7582_s2, %s5667_s4 }
0x1e34   : > { %v4916_v39 = vadd.f32 %v4915_v37, %v7289_v58  ;;  %v5657_v58 = vld [vmem:[%s7575_s6 + $0x18] sm:$0xff]  ;;  %v6503_v37 = vpack.c.bf16 %v5214_v48, %v5213_v36 }
0x1e35   : > { %6265 = vmatpush3.msra.mxu1 %v5657_v58 }
0x1e36   : > { %v4917_v40 = vsel %vm3419_vm10, %v4916_v39, -inf  ;;  %6493 = vmatprep.subr.bf16.mxu1 %v6751_v15 }
0x1e37   : > { %4918 = vmax.xlane.f32.xlu0 %v4917_v40 }
0x1ec4   : > { %v4919_v41 = vpop.xlane.xlu0 %4918 }
0x1ec5   : > { %v4920_v42 = vsub.f32 %v4916_v39, %v4919_v41 }
0x1ec7   : > { %v4921_v43 = vmul.f32 1.442695, %v4920_v42 }
0x1ec9   : > { %6633 = vpow2.f32 %v4921_v43  ;;  %v5664_v43 = vld [vmem:[%s7581_s3] ss:$0 sm:$0xff] }
0x1ed3   : > { %v6634_v44 = vpop.eup %6633 }
0x1ed4   : > { %v4923_v16 = vsel %vm3419_vm10, %v6634_v44, 0.0 }
0x1ed5   : > { %4924 = vadd.xlane.f32.xlu1 %v4923_v16 }
0x1f62   : > { %v4925_v21 = vpop.xlane.xlu1 %4924 }
0x1f63   : > { %6635 = vrcp.f32 %v4925_v21 }
0x1f6d   : > { %v6636_v53 = vpop.eup %6635 }
0x1f6e   : > { %v4927_v55 = vmul.f32 %v6636_v53, %v6634_v44 }
0x1f70   : > { %6262 = vmatmul.mubr.msk.f32.vlgmr.msra.gmra.mrb[46].mxu0 %vm3419_vm10, %v4927_v55 }
0x1f71   : > { %6277 = vmatprep.mubr.msk.f32.mxu0 %vm6752_vm1, %v6753_v23  ;;  %6489 = vmatpush3.bf16.msra.mxu0 %v6488_v9 }
0x1f72   : > { %6490 = vmatprep.subr.bf16.mxu0 %v6751_v15 }
0x2043   : > { %v4997_v56 = vpop.f32.mrb[46].mxu0 }
0x2044   : > { %v6263_v57 = vpop.f32.mrb[47].mxu0  ;;  %6267 = vmatmul.mubr.msk.f32.vlgmr.msra.gmra.mrb[46].mxu1 %vm1334_vm6, %v4997_v56 }
0x2045   : > { %6296 = vmatprep.mubr.msk.f32.mxu1 %vm6752_vm1, %v6753_v23  ;;  %6495 = vmatpush3.bf16.msra.mxu1 %v6494_v17 }
0x2046   : > { %6496 = vmatprep.subr.bf16.mxu1 %v6751_v15 }
0x2049   : > { %6498 = vmatpush3.bf16.msra.mxu1 %v6497_v54 }
0x204a   : > { %6499 = vmatprep.subr.bf16.mxu1 %v6751_v15 }
0x2117   : > { %v5072_v59 = vpop.f32.mrb[46].mxu1 }
0x2118   : > { %v5076_v62 = vadd.f32 %v5072_v59, %v7412_v19  ;;  %v6268_v63 = vpop.f32.mrb[47].mxu1  ;;  %v5212_v19 = vld [vmem:[%s6903_s14 + $0x28] sm:$0xff] }
0x2119   : > { %v6500_v52 = vpack.c.bf16 %v5212_v19, %v5211_v18 }
0x211a   : > { %v5084_v1 = vadd.f32 %v5659_v60, %v5076_v62 }
0x211b   : > { %6501 = vmatpush3.bf16.msra.mxu1 %v6500_v52 }
0x211c   : > { %v7447_v2 = vadd.f32 %v5084_v1, %v7224_v61  ;;  %v5124_v61 = vld [vmem:[%s7577_s10 + $0x10] sm:$0xff]  ;;  %6502 = vmatprep.subr.bf16.mxu1 %v6751_v15  ;;  %v5661_v15 = vld [vmem:[%s7579_s0] ss:$0 sm:$0xff]  ;;  %s5460_s0 = sshll.u32 %s990_s28, 3 }
0x211d   : > { %v6491_v11 = vpack.c.bf16 %v5125_v10, %v5124_v61  ;;  %s992_s5 = scalar_lea.vmem [#allocation2], %s5460_s0  ;;  %s6645_s0 = sshll.u32 %s6754_s22, 4  ;;  %s6646_s0 = int_to_ptr.vmem [resolvable:$false] %s6645_s0 }
0x211e   : > { %v5088_v3 = vsel %vm1026_vm0, %v7447_v2, 0.0  ;;  %s5313_s6 = sshll.u32 %s992_s5, 4  ;;  %s6647_s3 = scalar_lea.vmem %s6646_s0, 256  ;;  %s7480_s6 = int_to_ptr.vmem [resolvable:$true] %s5313_s6 }
0x211f   : > { %5089 = vadd.xlane.f32.xlu0 %v5088_v3  ;;  %6492 = vmatpush3.bf16.msra.mxu0 %v6491_v11  ;;  %s6641_s10 = scalar_lea.vmem %s7480_s6, 128  ;;  %p6648_p1 = scmp.lt.s32.totalorder %s7480_s6, %s6646_s0 }
0x2120   : > { %6504 = vmatpush3.bf16.msra.mxu1 %v6503_v37  ;;  %p6642_p12 = scmp.ne.s32.totalorder %s7480_s6, %s6641_s10  ;;  %p6649_p2 = scmp.lt.s32.totalorder %s6647_s3, %s6641_s10 }
0x2122   : > { %p6643_p13 = pnand %p6642_p12, %p6955_p4  ;;  %p6650_p3 = por %p6649_p2, %p6648_p1 }
0x2124   : > { %p6644_p0 = pneg %p6643_p13 }
0x2126   : > { %p6651_p5 = pnand %p6650_p3, %p6644_p0 }
0x21ac   : > { %v5090_v4 = vpop.xlane.xlu0 %5089 }
0x21ad   : > { %v5091_v23 = vmul.f32 0.03125, %v5090_v4 }
0x21af   : > { %v5092_v5 = vsub.f32 %v7447_v2, %v5091_v23 }
0x21b1   : > { %v5093_v0 = vmul.f32 %v5092_v5, %v5092_v5 }
0x21b3   : > { %v5094_v6 = vsel %vm1026_vm0, %v5093_v0, 0.0 }
0x21b4   : > { %5095 = vadd.xlane.f32.xlu1 %v5094_v6 }
0x2241   : > { %v5096_v20 = vpop.xlane.xlu1 %5095 }
0x2242   : > { %v5097_v22 = vmul.f32 0.032258064, %v5096_v20 }
0x2244   : > { %6637 = vrsqrt.f32 %v5097_v22  ;;  %vm5100_vm11 = vcmp.eq.f32.partialorder %v5097_v22, inf  ;;  %v5103_v26 = vand.u32 2147483648, %v5097_v22  ;;  %vm5102_vm12 = vcmp.eq.f32.partialorder %v5097_v22, 0.0 }
0x224e   : > { %v6638_v24 = vpop.eup %6637 }
0x224f   : > { %v5099_v25 = vmul.f32 %v6638_v24, %v5097_v22 }
0x2251   : > { %v5101_v27 = vsel %vm5100_vm11, %v5097_v22, %v5099_v25 }
0x2252   : > { %v5104_v28 = vsel %vm5102_vm12, %v5103_v26, %v5101_v27 }
0x2253   : > { %v5105_v30 = vadd.f32 1e-06, %v5104_v28 }
0x2255   : > { %6639 = vrcp.f32 %v5105_v30 }
0x225f   : > { %v6640_v29 = vpop.eup %6639 }
0x2260   : > { %v5107_v33 = vmul.f32 %v6640_v29, %v5092_v5 }
0x2262   : > { %v5114_v34 = vmul.f32 %v5660_v31, %v5107_v33 }
0x2264   : > { %v5121_v35 = vadd.f32 %v5661_v15, %v5114_v34 }
0x2266   : > { %6278 = vmatmul.mubr.msk.f32.vlgmr.msra.gmra.mrb[48].mxu0 %vm1026_vm0, %v5121_v35 }
0x2339   : > { %v5202_v39 = vpop.f32.mrb[48].mxu0 }
0x233a   : > { %v5203_v40 = vadd.f32 %v5662_v38, %v5202_v39  ;;  %v6279_v41 = vpop.f32.mrb[49].mxu0 }
0x233c   : > { %v5206_v42 = vmax.f32 %v5203_v40, 0.0 }
0x233e   : > { %6297 = vmatmul.mubr.msk.f32.vlgmr.msra.gmra.mrb[48].mxu1 %vm5222_vm13, %v5206_v42 }
0x2411   : > { %v5292_v44 = vpop.f32.mrb[48].mxu1 }
0x2412   : > { %v5293_v16 = vadd.f32 %v5664_v43, %v5292_v44  ;;  %v6298_v45 = vpop.f32.mrb[49].mxu1 }
0x2414   : > { %v5296_v46 = vadd.f32 %v5293_v16, %v7447_v2 }
0x2416   : > { %5297 = vst.msk [vmem:[%s992_s5] sm:$0xff] %vm1026_vm0, %v5296_v46 }
0x2417   : > { %6654 = shalt.err (!%p6651_p5)
}
0x2418   : > { %s6655_s5 = scalar_lea.hbm %s7478_s8, 128  ;;  %s6659_s4 = scalar_lea.hbm %s7582_s2, 256 }
0x2419   : > { %p6656_p6 = scmp.ne.s32.totalorder %s7478_s8, %s6655_s5  ;;  %p6660_p10 = scmp.lt.u32.totalorder %s7478_s8, %s7582_s2 }
0x241a   : > { %p6661_p11 = scmp.lt.u32.totalorder %s6659_s4, %s6655_s5  ;;  %p6663_p13 = scmp.lt.u32.totalorder %s6655_s5, %s7478_s8 }
0x241b   : > { %p6657_p7 = pnand %p6656_p6, %p6955_p4 }
0x241c   : > { %p6662_p12 = por %p6661_p11, %p6660_p10 }
0x241d   : > { %p6658_p9 = pneg %p6657_p7 }
0x241e   : > { %p6664_p1 = por %p6663_p13, %p6662_p12 }
0x2420   : > { %p6665_p0 = pnand %p6664_p1, %p6658_p9 }
0x2422   : > { %6668 = shalt.err (!%p6665_p0)
}
0x2423   : > { %6505 = dma.vmem_to_hbm [thread:$0]  (%p6955_p4), %s7480_s6, 128, %s7478_s8, %s5299_s9  }
0x2424 PF: > { %p6511_p2 = scmp.ge.s32.totalorder %s6719_s26, 2  ;;  %s5325_s3 = sand.u32 1, %s6699_s15  }
0x2425   : > { %s5326_s10 = scalar_lea.sflag [#allocation3], %s5325_s3 }
0x2426   : > { %p6508_p3 = pnand %p6511_p2, %p6962_p8 }
0x2428   : > { %6694 = dma.done.wait (!%p6508_p3), %s5326_s10, 128  }
0x2429   : > { %6696 = vsyncadd (!%p6508_p3), %s5326_s10, 4294967168  ;;  %s74_s26 = sadd.s32 1, %s6719_s26   ;;  %s7583_s15 = smov %s6703_s16 }
0x242a   : > { %p71_p5 = scmp.ge.s32.totalorder %s74_s26, 4   ;;  %s7584_s16 = smov %s6707_s18 }
0x242b   : > { %s7585_s18 = smov %s6968_s29  ;;  %s7586_s22 = smov %s6715_s23 }
0x242c   : > { %s7587_s23 = smov %s7589_s1  ;;  %73 = sbr.rel (!%p71_p5) target bundleno = 60 (0x3c), region = 257 }
0x2433   :  { %5331 = vsyncpa [#allocation3], 1 }
0x2434   :  { %5333 = vsyncpa [#allocation3 + $0x1], 1 }

</bundles_post_ra>
